<compile_context>
chip_gen: v7x
topology: tpu7x:2x2x1
jax: 0.10.0
libtpu: 0.0.40
codegen_flags: <defaults>
</compile_context>

<pallas_src>
import jax
import jax.numpy as jnp
from jax.experimental import pallas as pl
from jax.experimental.pallas import tpu as pltpu

BN_EPS = 1e-3  # matches BatchNorm2d(..., eps=0.001)


def fused_add_conv1x1_bn_kernel(x1_ref, x2_ref, w_ref, gamma_ref, beta_ref, o_ref):
    # x1, x2: [Cin, NHW] f32    w: [Cout, Cin] bf16
    # gamma, beta: [Cout, 1] f32    o: [Cout, NHW] f32
    xs = x1_ref[...] + x2_ref[...]                            # elementwise add, f32 (VPU)
    y = jnp.dot(w_ref[...], xs.astype(jnp.bfloat16),          # 1x1 conv == MXU matmul
                preferred_element_type=jnp.float32)           # f32 accumulate -> [Cout, NHW]

    # Training-mode BatchNorm2d: per-channel (sublane row) stats over NHW (lane
    # axis), biased variance, single pass over y.
    inv_n = 1.0 / y.shape[1]
    mean = jnp.sum(y, axis=1, keepdims=True) * inv_n          # [Cout, 1] (XLU reduce)
    mean_sq = jnp.sum(y * y, axis=1, keepdims=True) * inv_n   # [Cout, 1]
    var = mean_sq - mean * mean

    # Fold affine BN into a single per-channel FMA.
    inv_std = jax.lax.rsqrt(var + BN_EPS)                     # EUP
    scale = gamma_ref[...] * inv_std                          # [Cout, 1]
    bias = beta_ref[...] - mean * scale                       # [Cout, 1]
    o_ref[...] = (y * scale + bias).astype(o_ref.dtype)


def add_conv1x1_bn(x132, x118, w, gamma, beta):
    """x132, x118: [N, Cin, H, W] (NCHW).  w: [Cout, Cin, 1, 1].  Returns [N, Cout, H, W]."""
    N, Cin, H, W_ = x132.shape
    Cout = w.shape[0]
    nhw = N * H * W_

    if N == 1:
        # Zero-copy: NCHW with N=1 is already channel-major over the 7x7 plane.
        x1 = x132.reshape(Cin, nhw)
        x2 = x118.reshape(Cin, nhw)
    else:
        # TODO(synk): for N > 1 this transpose is a real HBM round trip; a per-batch
        # grid with a two-pass BN (accumulate sum/sumsq over N) would avoid it.
        x1 = jnp.transpose(x132, (1, 0, 2, 3)).reshape(Cin, nhw)
        x2 = jnp.transpose(x118, (1, 0, 2, 3)).reshape(Cin, nhw)

    w2 = w.reshape(Cout, Cin).astype(jnp.bfloat16)            # free reshape + cheap cast
    g = gamma.reshape(Cout, 1).astype(jnp.float32)
    b = beta.reshape(Cout, 1).astype(jnp.float32)

    cost = pl.CostEstimate(
        flops=2 * Cout * Cin * nhw + 6 * Cout * nhw,
        transcendentals=Cout,
        bytes_accessed=2 * Cin * nhw * 4 + Cout * Cin * 2 + 2 * Cout * 4 + Cout * nhw * 4,
    )

    out = pl.pallas_call(
        fused_add_conv1x1_bn_kernel,
        out_shape=jax.ShapeDtypeStruct((Cout, nhw), jnp.float32),
        grid=(1,),                                            # single step: overhead-bound shape
        in_specs=[
            pl.BlockSpec((Cin, nhw), lambda i: (0, 0)),       # x1 (full)
            pl.BlockSpec((Cin, nhw), lambda i: (0, 0)),       # x2 (full)
            pl.BlockSpec((Cout, Cin), lambda i: (0, 0)),      # W  (full)
            pl.BlockSpec((Cout, 1), lambda i: (0, 0)),        # gamma
            pl.BlockSpec((Cout, 1), lambda i: (0, 0)),        # beta
        ],
        out_specs=pl.BlockSpec((Cout, nhw), lambda i: (0, 0)),
        compiler_params=pltpu.CompilerParams(
            dimension_semantics=("arbitrary",)),
        cost_estimate=cost,
    )(x1, x2, w2, g, b)

    if N == 1:
        return out.reshape(1, Cout, H, W_)                    # free reshape back to NCHW
    return jnp.transpose(out.reshape(Cout, N, H, W_), (1, 0, 2, 3))


if __name__ == "__main__":
    key = jax.random.PRNGKey(0)
    k1, k2, k3 = jax.random.split(key, 3)

    # Shapes from the module spec.
    N, Cin, H, W = 1, 96, 7, 7
    Cout = 576

    x132 = jax.random.normal(k1, (N, Cin, H, W), dtype=jnp.float32)
    x118 = jax.random.normal(k2, (N, Cin, H, W), dtype=jnp.float32)

    # Conv2d(96, 576, kernel_size=1, bias=False): weight [576, 96, 1, 1]
    bound = 1.0 / jnp.sqrt(Cin)
    w = jax.random.uniform(k3, (Cout, Cin, 1, 1), dtype=jnp.float32,
                           minval=-bound, maxval=bound)
    # BatchNorm2d(576, affine=True) default init: weight=1, bias=0
    gamma = jnp.ones((Cout,), dtype=jnp.float32)
    beta = jnp.zeros((Cout,), dtype=jnp.float32)
    # TODO(synk): PyTorch training-mode BN also updates running_mean/running_var
    # (momentum=0.01) and num_batches_tracked; those side effects are not produced
    # here, only the forward output.

    out = add_conv1x1_bn(x132, x118, w, gamma, beta)
    jax.block_until_ready(out)

    assert out.shape == (N, Cout, H, W), out.shape
    assert bool(jnp.isfinite(out).all())
    print("KERNEL_OK")
</pallas_src>

<mosaic_0001>
module attributes {stable_mosaic.version = 11 : i64} {
  func.func @fused_add_conv1x1_bn_kernel(%arg0: i32, %arg1: memref<96x49xf32, #tpu.memory_space<vmem>>, %arg2: memref<96x49xf32, #tpu.memory_space<vmem>>, %arg3: memref<576x96xbf16, #tpu.memory_space<vmem>>, %arg4: memref<576x1xf32, #tpu.memory_space<vmem>>, %arg5: memref<576x1xf32, #tpu.memory_space<vmem>>, %arg6: memref<576x49xf32, #tpu.memory_space<vmem>>) attributes {dimension_semantics = [#tpu.dimension_semantics<arbitrary>], iteration_bounds = array<i64: 1>, scalar_prefetch = 0 : i64, scratch_operands = 0 : i64, tpu.core_type = #tpu.core_type<tc>, window_params = [{pipeline_mode = #tpu.pipeline_mode<synchronous>, transform_indices = @transform_0, window_bounds = array<i64: 96, 49>}, {pipeline_mode = #tpu.pipeline_mode<synchronous>, transform_indices = @transform_1, window_bounds = array<i64: 96, 49>}, {pipeline_mode = #tpu.pipeline_mode<synchronous>, transform_indices = @transform_2, window_bounds = array<i64: 576, 96>}, {pipeline_mode = #tpu.pipeline_mode<synchronous>, transform_indices = @transform_3, window_bounds = array<i64: 576, 1>}, {pipeline_mode = #tpu.pipeline_mode<synchronous>, transform_indices = @transform_4, window_bounds = array<i64: 576, 1>}, {pipeline_mode = #tpu.pipeline_mode<synchronous>, transform_indices = @transform_5, window_bounds = array<i64: 576, 49>}]} {
    %c0 = arith.constant 0 : index
    %c0_0 = arith.constant 0 : index
    %0 = vector.load %arg1[%c0, %c0_0] : memref<96x49xf32, #tpu.memory_space<vmem>>, vector<96x49xf32>
    %c0_1 = arith.constant 0 : index
    %c0_2 = arith.constant 0 : index
    %1 = vector.load %arg2[%c0_1, %c0_2] : memref<96x49xf32, #tpu.memory_space<vmem>>, vector<96x49xf32>
    %2 = arith.addf %0, %1 : vector<96x49xf32>
    %c0_3 = arith.constant 0 : index
    %c0_4 = arith.constant 0 : index
    %3 = vector.load %arg3[%c0_3, %c0_4] : memref<576x96xbf16, #tpu.memory_space<vmem>>, vector<576x96xbf16>
    %4 = arith.truncf %2 : vector<96x49xf32> to vector<96x49xbf16>
    %cst = arith.constant dense<0.000000e+00> : vector<576x49xf32>
    %5 = tpu.matmul %3, %4, %cst {dimension_numbers = #tpu.dot_dimension_numbers<[1], [0], [0], [1], [0, 0, 1, 1], [], []>} : vector<576x96xbf16>, vector<96x49xbf16>, vector<576x49xf32> -> vector<576x49xf32>
    %cst_5 = arith.constant dense<0.000000e+00> : vector<576xf32>
    %6 = vector.multi_reduction <add>, %5, %cst_5 [1] : vector<576x49xf32> to vector<576xf32>
    %7 = vector.shape_cast %6 : vector<576xf32> to vector<576x1xf32>
    %cst_6 = arith.constant 0.0204081628 : f32
    %8 = vector.broadcast %cst_6 : f32 to vector<576x1xf32>
    %9 = arith.mulf %7, %8 : vector<576x1xf32>
    %10 = arith.mulf %5, %5 : vector<576x49xf32>
    %cst_7 = arith.constant dense<0.000000e+00> : vector<576xf32>
    %11 = vector.multi_reduction <add>, %10, %cst_7 [1] : vector<576x49xf32> to vector<576xf32>
    %12 = vector.shape_cast %11 : vector<576xf32> to vector<576x1xf32>
    %cst_8 = arith.constant 0.0204081628 : f32
    %13 = vector.broadcast %cst_8 : f32 to vector<576x1xf32>
    %14 = arith.mulf %12, %13 : vector<576x1xf32>
    %15 = arith.mulf %9, %9 : vector<576x1xf32>
    %16 = arith.subf %14, %15 : vector<576x1xf32>
    %cst_9 = arith.constant 1.000000e-03 : f32
    %17 = vector.broadcast %cst_9 : f32 to vector<576x1xf32>
    %18 = arith.addf %16, %17 : vector<576x1xf32>
    %19 = math.rsqrt %18 : vector<576x1xf32>
    %c0_10 = arith.constant 0 : index
    %c0_11 = arith.constant 0 : index
    %20 = vector.load %arg4[%c0_10, %c0_11] : memref<576x1xf32, #tpu.memory_space<vmem>>, vector<576x1xf32>
    %21 = arith.mulf %20, %19 : vector<576x1xf32>
    %c0_12 = arith.constant 0 : index
    %c0_13 = arith.constant 0 : index
    %22 = vector.load %arg5[%c0_12, %c0_13] : memref<576x1xf32, #tpu.memory_space<vmem>>, vector<576x1xf32>
    %23 = arith.mulf %9, %21 : vector<576x1xf32>
    %24 = arith.subf %22, %23 : vector<576x1xf32>
    %25 = vector.broadcast %21 : vector<576x1xf32> to vector<576x49xf32>
    %26 = arith.mulf %5, %25 : vector<576x49xf32>
    %27 = vector.broadcast %24 : vector<576x1xf32> to vector<576x49xf32>
    %28 = arith.addf %26, %27 : vector<576x49xf32>
    %c0_14 = arith.constant 0 : index
    %c0_15 = arith.constant 0 : index
    %29 = vector.load %arg6[%c0_14, %c0_15] : memref<576x49xf32, #tpu.memory_space<vmem>>, vector<576x49xf32>
    tpu.vector_store %arg6[%c0_14, %c0_15], %28 {strides = array<i32>} : memref<576x49xf32, #tpu.memory_space<vmem>>, vector<576x49xf32>,
    return
  }
  func.func @transform_0(%arg0: i32) -> (i32, i32) {
    %c0_i32 = arith.constant 0 : i32
    %c0_i32_0 = arith.constant 0 : i32
    %c0_i32_1 = arith.constant 0 : i32
    return %c0_i32, %c0_i32_0 : i32, i32
  }
  func.func @transform_1(%arg0: i32) -> (i32, i32) {
    %c0_i32 = arith.constant 0 : i32
    %c0_i32_0 = arith.constant 0 : i32
    %c0_i32_1 = arith.constant 0 : i32
    return %c0_i32, %c0_i32_0 : i32, i32
  }
  func.func @transform_2(%arg0: i32) -> (i32, i32) {
    %c0_i32 = arith.constant 0 : i32
    %c0_i32_0 = arith.constant 0 : i32
    %c0_i32_1 = arith.constant 0 : i32
    return %c0_i32, %c0_i32_0 : i32, i32
  }
  func.func @transform_3(%arg0: i32) -> (i32, i32) {
    %c0_i32 = arith.constant 0 : i32
    %c0_i32_0 = arith.constant 0 : i32
    %c0_i32_1 = arith.constant 0 : i32
    return %c0_i32, %c0_i32_0 : i32, i32
  }
  func.func @transform_4(%arg0: i32) -> (i32, i32) {
    %c0_i32 = arith.constant 0 : i32
    %c0_i32_0 = arith.constant 0 : i32
    %c0_i32_1 = arith.constant 0 : i32
    return %c0_i32, %c0_i32_0 : i32, i32
  }
  func.func @transform_5(%arg0: i32) -> (i32, i32) {
    %c0_i32 = arith.constant 0 : i32
    %c0_i32_0 = arith.constant 0 : i32
    %c0_i32_1 = arith.constant 0 : i32
    return %c0_i32, %c0_i32_0 : i32, i32
  }
}

</mosaic_0001>

<bundles_post_ra>
// kernel: tpu_custom_call.1
= control target key start
LH: loop header
LB: loop body
LE: loop exit
PB: predicated region body
PF: predicated region fallthrough
CT: control target
= control target key end

     0   :  { %vm315_vm0 = vcmask 785408   ;;  %vm745_vm1 = vcmask 400384   ;;  %s6193_s0 = inlined_call_operand.vmem [shape: f32[96,49], index: 0, kind: input, shape index: {}]   ;;  %s6194_s1 = inlined_call_operand.vmem [shape: f32[96,49], index: 1, kind: input, shape index: {}]   ;;  %s6195_s2 = inlined_call_operand.vmem [shape: bf16[576,96], index: 2, kind: input, shape index: {}]   ;;  %s6196_s3 = inlined_call_operand.vmem [shape: f32[576,1], index: 3, kind: input, shape index: {}]   ;;  %s6197_s4 = inlined_call_operand.vmem [shape: f32[576,1], index: 4, kind: input, shape index: {}]   ;;  %s6198_s5 = inlined_call_operand.vmem [shape: f32[576,49], index: 5, kind: output, shape index: {}]  }
   0x1   :  { %v21_v0 = vld [vmem:[%s6193_s0] sm:$0xff]  ;;  %v22_v1 = vld [vmem:[%s6193_s0 + $0x8] sm:$0xff]  ;;  %v23_v5 = vld [vmem:[%s6193_s0 + $0x10] sm:$0xff] }
   0x2   :  { %v33_v2 = vld [vmem:[%s6194_s1] sm:$0xff]  ;;  %v34_v3 = vld [vmem:[%s6194_s1 + $0x8] sm:$0xff]  ;;  %v24_v6 = vld [vmem:[%s6193_s0 + $0x18] sm:$0xff] }
   0x3   :  { %v45_v4 = vadd.f32 %v33_v2, %v21_v0  ;;  %v46_v7 = vadd.f32 %v34_v3, %v22_v1  ;;  %v35_v8 = vld [vmem:[%s6194_s1 + $0x10] sm:$0xff]  ;;  %v36_v9 = vld [vmem:[%s6194_s1 + $0x18] sm:$0xff]  ;;  %v25_v10 = vld [vmem:[%s6193_s0 + $0x20] sm:$0xff] }
   0x4   :  { %v47_v11 = vadd.f32 %v35_v8, %v23_v5  ;;  %v48_v12 = vadd.f32 %v36_v9, %v24_v6  ;;  %v26_v13 = vld [vmem:[%s6193_s0 + $0x28] sm:$0xff]  ;;  %v37_v14 = vld [vmem:[%s6194_s1 + $0x20] sm:$0xff]  ;;  %v27_v19 = vld [vmem:[%s6193_s0 + $0x30] sm:$0xff] }
   0x5   :  { %v38_v15 = vld [vmem:[%s6194_s1 + $0x28] sm:$0xff]  ;;  %v129_v16 = vpack.c.bf16 %v46_v7, %v45_v4  ;;  %v49_v17 = vadd.f32 %v37_v14, %v25_v10  ;;  %v28_v21 = vld [vmem:[%s6193_s0 + $0x38] sm:$0xff]  ;;  %v39_v22 = vld [vmem:[%s6194_s1 + $0x30] sm:$0xff] }
   0x6   :  { %v50_v18 = vadd.f32 %v38_v15, %v26_v13  ;;  %v130_v20 = vpack.c.bf16 %v48_v12, %v47_v11  ;;  %v40_v23 = vld [vmem:[%s6194_s1 + $0x38] sm:$0xff]  ;;  %v29_v24 = vld [vmem:[%s6193_s0 + $0x40] sm:$0xff]  ;;  %v30_v25 = vld [vmem:[%s6193_s0 + $0x48] sm:$0xff]  ;;  %v51_v29 = vadd.f32 %v39_v22, %v27_v19 }
   0x7   :  { %3096 = vmatprep.subr.bf16.mxu0 %v129_v16  ;;  %3180 = vmatprep.subr.bf16.mxu1 %v129_v16  ;;  %v41_v26 = vld [vmem:[%s6194_s1 + $0x40] sm:$0xff]  ;;  %v42_v27 = vld [vmem:[%s6194_s1 + $0x48] sm:$0xff]  ;;  %v52_v30 = vadd.f32 %v40_v23, %v28_v21  ;;  %v3196_v32 = vld [vmem:[%s6195_s2 + $0x90] sm:$0xff]  }
   0x8   :  { %3097 = vmatpush3.bf16.msra.mxu0 %v129_v16  ;;  %3186 = vmatpush3.bf16.msra.mxu1 %v129_v16  ;;  %v131_v28 = vpack.c.bf16 %v50_v18, %v49_v17  ;;  %v3195_v31 = vld [vmem:[%s6195_s2] sm:$0xff]   ;;  %v31_v33 = vld [vmem:[%s6193_s0 + $0x50] sm:$0xff]  ;;  %v32_v34 = vld [vmem:[%s6193_s0 + $0x58] sm:$0xff]  ;;  %v53_v36 = vadd.f32 %v41_v26, %v29_v24  ;;  %v54_v37 = vadd.f32 %v42_v27, %v30_v25 }
   0x9   :  { %3098 = vmatprep.subr.bf16.mxu0 %v130_v20  ;;  %3181 = vmatprep.subr.bf16.mxu1 %v130_v20  ;;  %v132_v35 = vpack.c.bf16 %v52_v30, %v51_v29  ;;  %v43_v38 = vld [vmem:[%s6194_s1 + $0x50] sm:$0xff]  ;;  %v44_v39 = vld [vmem:[%s6194_s1 + $0x58] sm:$0xff]  ;;  %v3197_v44 = vld [vmem:[%s6195_s2 + $0x8] sm:$0xff]  }
   0xa   :  { %3108 = vmatprep.mubr.msk.bf16.mxu0 %vm315_vm0, %v3195_v31  ;;  %3144 = vmatprep.mubr.msk.bf16.mxu1 %vm315_vm0, %v3196_v32  ;;  %v133_v40 = vpack.c.bf16 %v54_v37, %v53_v36  ;;  %v55_v41 = vadd.f32 %v43_v38, %v31_v33  ;;  %v56_v42 = vadd.f32 %v44_v39, %v32_v34  ;;  %v3198_v45 = vld [vmem:[%s6195_s2 + $0x98] sm:$0xff]   ;;  %v3199_v46 = vld [vmem:[%s6195_s2 + $0x10] sm:$0xff]   ;;  %v3201_v47 = vld [vmem:[%s6195_s2 + $0xa0] sm:$0xff]  }
   0xb   :  { %v3200_v48 = vld [vmem:[%s6195_s2 + $0x18] sm:$0xff]   ;;  %v3202_v49 = vld [vmem:[%s6195_s2 + $0xa8] sm:$0xff]   ;;  %v3203_v50 = vld [vmem:[%s6195_s2 + $0x20] sm:$0xff]  }
   0xc   :  { %3099 = vmatpush3.bf16.msra.mxu0 %v130_v20  ;;  %3187 = vmatpush3.bf16.msra.mxu1 %v130_v20  ;;  %v134_v43 = vpack.c.bf16 %v56_v42, %v55_v41  ;;  %v3205_v51 = vld [vmem:[%s6195_s2 + $0xb0] sm:$0xff]   ;;  %v3204_v52 = vld [vmem:[%s6195_s2 + $0x28] sm:$0xff]   ;;  %v3206_v53 = vld [vmem:[%s6195_s2 + $0xb8] sm:$0xff]  }
   0xd   :  { %3100 = vmatprep.subr.bf16.mxu0 %v131_v28  ;;  %3182 = vmatprep.subr.bf16.mxu1 %v131_v28  ;;  %v3207_v54 = vld [vmem:[%s6195_s2 + $0x30] sm:$0xff]   ;;  %v3209_v55 = vld [vmem:[%s6195_s2 + $0xc0] sm:$0xff]   ;;  %v3208_v56 = vld [vmem:[%s6195_s2 + $0x38] sm:$0xff]  }
   0xe   :  { %v3210_v57 = vld [vmem:[%s6195_s2 + $0xc8] sm:$0xff]   ;;  %v3211_v58 = vld [vmem:[%s6195_s2 + $0x40] sm:$0xff]   ;;  %v3213_v59 = vld [vmem:[%s6195_s2 + $0xd0] sm:$0xff]  }
   0xf   :  { %v3212_v60 = vld [vmem:[%s6195_s2 + $0x48] sm:$0xff]   ;;  %v3214_v61 = vld [vmem:[%s6195_s2 + $0xd8] sm:$0xff]   ;;  %v3215_v62 = vld [vmem:[%s6195_s2 + $0x50] sm:$0xff]  }
  0x10   :  { %3101 = vmatpush3.bf16.msra.mxu0 %v131_v28  ;;  %3188 = vmatpush3.bf16.msra.mxu1 %v131_v28  ;;  %v3217_v63 = vld [vmem:[%s6195_s2 + $0xe0] sm:$0xff]   ;;  %v3216_v0 = vld [vmem:[%s6195_s2 + $0x58] sm:$0xff]   ;;  %v3218_v1 = vld [vmem:[%s6195_s2 + $0xe8] sm:$0xff]  }
  0x11   :  { %3102 = vmatprep.subr.bf16.mxu0 %v132_v35  ;;  %3183 = vmatprep.subr.bf16.mxu1 %v132_v35  ;;  %v3219_v2 = vld [vmem:[%s6195_s2 + $0x60] sm:$0xff]   ;;  %v3221_v3 = vld [vmem:[%s6195_s2 + $0xf0] sm:$0xff]   ;;  %v3220_v4 = vld [vmem:[%s6195_s2 + $0x68] sm:$0xff]  }
  0x12   :  { %v3222_v5 = vld [vmem:[%s6195_s2 + $0xf8] sm:$0xff]   ;;  %v3223_v6 = vld [vmem:[%s6195_s2 + $0x70] sm:$0xff]   ;;  %v3225_v8 = vld [vmem:[%s6195_s2 + $0x100] sm:$0xff]  }
  0x13   :  { %v3224_v7 = vld [vmem:[%s6195_s2 + $0x78] sm:$0xff]   ;;  %v3226_v9 = vld [vmem:[%s6195_s2 + $0x108] sm:$0xff]   ;;  %v3227_v10 = vld [vmem:[%s6195_s2 + $0x80] sm:$0xff]  }
  0x14   :  { %3103 = vmatpush3.bf16.msra.mxu0 %v132_v35  ;;  %3189 = vmatpush3.bf16.msra.mxu1 %v132_v35  ;;  %v3228_v11 = vld [vmem:[%s6195_s2 + $0x88] sm:$0xff]   ;;  %v3229_v12 = vld [vmem:[%s6195_s2 + $0x110] sm:$0xff]   ;;  %v3230_v13 = vld [vmem:[%s6195_s2 + $0x118] sm:$0xff]  }
  0x15   :  { %3104 = vmatprep.subr.bf16.mxu0 %v133_v40  ;;  %3184 = vmatprep.subr.bf16.mxu1 %v133_v40 }
  0x18   :  { %3105 = vmatpush3.bf16.msra.mxu0 %v133_v40  ;;  %3190 = vmatpush3.bf16.msra.mxu1 %v133_v40 }
  0x19   :  { %3106 = vmatprep.subr.bf16.mxu0 %v134_v43  ;;  %3185 = vmatprep.subr.bf16.mxu1 %v134_v43 }
  0x1c   :  { %3107 = vmatpush3.bf16.msra.mxu0 %v134_v43  ;;  %3191 = vmatpush3.bf16.msra.mxu1 %v134_v43 }
  0x1f   :  { %3109 = vmatmul.mubr.msk.bf16.vlgmr.msra.gmra.mrb[0].mxu0 %vm315_vm0, %v3197_v44  ;;  %3145 = vmatmul.mubr.msk.bf16.vlgmr.msra.gmra.mrb[0].mxu1 %vm315_vm0, %v3198_v45 }
  0x20   :  { %3112 = vmatprep.mubr.msk.bf16.mxu0 %vm315_vm0, %v3199_v46  ;;  %3148 = vmatprep.mubr.msk.bf16.mxu1 %vm315_vm0, %v3201_v47 }
  0x27   :  { %3113 = vmatmul.mubr.msk.bf16.gmra.mrb[4].mxu0 %vm315_vm0, %v3200_v48  ;;  %3149 = vmatmul.mubr.msk.bf16.gmra.mrb[4].mxu1 %vm315_vm0, %v3202_v49 }
  0x28   :  { %3116 = vmatprep.mubr.msk.bf16.mxu0 %vm315_vm0, %v3203_v50  ;;  %3152 = vmatprep.mubr.msk.bf16.mxu1 %vm315_vm0, %v3205_v51 }
  0x2f   :  { %3117 = vmatmul.mubr.msk.bf16.gmra.mrb[8].mxu0 %vm315_vm0, %v3204_v52  ;;  %3153 = vmatmul.mubr.msk.bf16.gmra.mrb[8].mxu1 %vm315_vm0, %v3206_v53 }
  0x30   :  { %3120 = vmatprep.mubr.msk.bf16.mxu0 %vm315_vm0, %v3207_v54  ;;  %3156 = vmatprep.mubr.msk.bf16.mxu1 %vm315_vm0, %v3209_v55 }
  0x37   :  { %3121 = vmatmul.mubr.msk.bf16.gmra.mrb[12].mxu0 %vm315_vm0, %v3208_v56  ;;  %3157 = vmatmul.mubr.msk.bf16.gmra.mrb[12].mxu1 %vm315_vm0, %v3210_v57 }
  0x38   :  { %3124 = vmatprep.mubr.msk.bf16.mxu0 %vm315_vm0, %v3211_v58  ;;  %3160 = vmatprep.mubr.msk.bf16.mxu1 %vm315_vm0, %v3213_v59 }
  0x3f   :  { %3125 = vmatmul.mubr.msk.bf16.gmra.mrb[16].mxu0 %vm315_vm0, %v3212_v60  ;;  %3161 = vmatmul.mubr.msk.bf16.gmra.mrb[16].mxu1 %vm315_vm0, %v3214_v61 }
  0x40   :  { %3128 = vmatprep.mubr.msk.bf16.mxu0 %vm315_vm0, %v3215_v62  ;;  %3164 = vmatprep.mubr.msk.bf16.mxu1 %vm315_vm0, %v3217_v63 }
  0x47   :  { %3129 = vmatmul.mubr.msk.bf16.gmra.mrb[20].mxu0 %vm315_vm0, %v3216_v0  ;;  %3165 = vmatmul.mubr.msk.bf16.gmra.mrb[20].mxu1 %vm315_vm0, %v3218_v1 }
  0x48   :  { %3132 = vmatprep.mubr.msk.bf16.mxu0 %vm315_vm0, %v3219_v2  ;;  %3168 = vmatprep.mubr.msk.bf16.mxu1 %vm315_vm0, %v3221_v3 }
  0x4f   :  { %3133 = vmatmul.mubr.msk.bf16.gmra.mrb[24].mxu0 %vm315_vm0, %v3220_v4  ;;  %3169 = vmatmul.mubr.msk.bf16.gmra.mrb[24].mxu1 %vm315_vm0, %v3222_v5 }
  0x50   :  { %3136 = vmatprep.mubr.msk.bf16.mxu0 %vm315_vm0, %v3223_v6  ;;  %3172 = vmatprep.mubr.msk.bf16.mxu1 %vm315_vm0, %v3225_v8 }
  0x57   :  { %3137 = vmatmul.mubr.msk.bf16.gmra.mrb[28].mxu0 %vm315_vm0, %v3224_v7  ;;  %3173 = vmatmul.mubr.msk.bf16.gmra.mrb[28].mxu1 %vm315_vm0, %v3226_v9 }
  0x58   :  { %3140 = vmatprep.mubr.msk.bf16.mxu0 %vm315_vm0, %v3227_v10  ;;  %3176 = vmatprep.mubr.msk.bf16.mxu1 %vm315_vm0, %v3229_v12 }
  0x5f   :  { %3141 = vmatmul.mubr.msk.bf16.gmra.mrb[32].mxu0 %vm315_vm0, %v3228_v11  ;;  %3177 = vmatmul.mubr.msk.bf16.gmra.mrb[32].mxu1 %vm315_vm0, %v3230_v13 }
  0xf2   :  { %v3622_v14 = vpop.f32.mrb[0].mxu0  ;;  %v3624_v15 = vpop.f32.mrb[0].mxu1 }
  0xf3   :  { %6326 = vst [vmem:[#allocation2_spill] sm:$0xff] %v3622_v14  ;;  %6327 = vst [vmem:[#allocation3_spill] sm:$0xff] %v3624_v15  ;;  %v3626_v16 = vpop.f32.mrb[1].mxu0  ;;  %v860_v17 = vsel %vm745_vm1, %v3624_v15, 0.0  ;;  %v752_v18 = vsel %vm745_vm1, %v3622_v14, 0.0  ;;  %v3632_v19 = vpop.f32.mrb[1].mxu1  ;;  %v1036_v30 = vmul.f32 %v3622_v14, %v3622_v14  ;;  %v1072_v39 = vmul.f32 %v3624_v15, %v3624_v15 }
  0xf4   :  { %6328 = vst [vmem:[#allocation4_spill] sm:$0xff] %v3626_v16  ;;  %6329 = vst [vmem:[#allocation5_spill] sm:$0xff] %v3632_v19  ;;  %861 = vadd.xlane.f32.xlu0 %v860_v17  ;;  %753 = vadd.xlane.f32.xlu1 %v752_v18  ;;  %v3634_v20 = vpop.f32.mrb[2].mxu0  ;;  %v3636_v21 = vpop.f32.mrb[2].mxu1  ;;  %v746_v24 = vsel %vm745_vm1, %v3626_v16, 0.0  ;;  %v854_v28 = vsel %vm745_vm1, %v3632_v19, 0.0  ;;  %v1034_v55 = vmul.f32 %v3626_v16, %v3626_v16 }
  0xf5   :  { %6330 = vst [vmem:[#allocation6_spill] sm:$0xff] %v3634_v20  ;;  %6331 = vst [vmem:[#allocation7_spill] sm:$0xff] %v3636_v21  ;;  %v3638_v22 = vpop.f32.mrb[3].mxu0  ;;  %v3640_v23 = vpop.f32.mrb[3].mxu1  ;;  %v755_v25 = vsel %vm745_vm1, %v3634_v20, 0.0  ;;  %v863_v29 = vsel %vm745_vm1, %v3636_v21, 0.0  ;;  %v1037_v40 = vmul.f32 %v3634_v20, %v3634_v20  ;;  %v1073_v45 = vmul.f32 %v3636_v21, %v3636_v21 }
  0xf6   :  { %6332 = vst [vmem:[#allocation8_spill] sm:$0xff] %v3638_v22  ;;  %6333 = vst [vmem:[#allocation9_spill] sm:$0xff] %v3640_v23  ;;  %v1112_v37 = vsel %vm745_vm1, %v1036_v30, 0.0  ;;  %v857_v38 = vsel %vm745_vm1, %v3640_v23, 0.0  ;;  %v1220_v43 = vsel %vm745_vm1, %v1072_v39, 0.0  ;;  %v749_v53 = vsel %vm745_vm1, %v3638_v22, 0.0 }
  0xf7   :  { %v1115_v44 = vsel %vm745_vm1, %v1037_v40, 0.0  ;;  %v1223_v52 = vsel %vm745_vm1, %v1073_v45, 0.0  ;;  %v1035_v54 = vmul.f32 %v3638_v22, %v3638_v22  ;;  %v1106_v59 = vsel %vm745_vm1, %v1034_v55, 0.0 }
  0xf8   :  { %747 = vadd.xlane.f32.xlu0 %v746_v24  ;;  %756 = vadd.xlane.f32.xlu1 %v755_v25  ;;  %v1071_v60 = vmul.f32 %v3640_v23, %v3640_v23  ;;  %v1070_v61 = vmul.f32 %v3632_v19, %v3632_v19 }
  0xf9   :  { %v1109_v58 = vsel %vm745_vm1, %v1035_v54, 0.0 }
  0xfa   :  { %v3646_v26 = vpop.f32.mrb[4].mxu0  ;;  %v3648_v27 = vpop.f32.mrb[4].mxu1  ;;  %v1217_v4 = vsel %vm745_vm1, %v1071_v60, 0.0  ;;  %v1214_v5 = vsel %vm745_vm1, %v1070_v61, 0.0 }
  0xfb   :  { %6334 = vst [vmem:[#allocation10_spill] sm:$0xff] %v3646_v26  ;;  %6335 = vst [vmem:[#allocation11_spill] sm:$0xff] %v3648_v27  ;;  %v3656_v31 = vpop.f32.mrb[5].mxu0  ;;  %v3658_v32 = vpop.f32.mrb[5].mxu1  ;;  %v764_v8 = vsel %vm745_vm1, %v3646_v26, 0.0  ;;  %v872_v24 = vsel %vm745_vm1, %v3648_v27, 0.0  ;;  %v1040_v54 = vmul.f32 %v3646_v26, %v3646_v26  ;;  %v1076_v60 = vmul.f32 %v3648_v27, %v3648_v27 }
  0xfc   :  { %6336 = vst [vmem:[#allocation12_spill] sm:$0xff] %v3656_v31  ;;  %6337 = vst [vmem:[#allocation13_spill] sm:$0xff] %v3658_v32  ;;  %855 = vadd.xlane.f32.xlu0 %v854_v28  ;;  %864 = vadd.xlane.f32.xlu1 %v863_v29  ;;  %v3660_v33 = vpop.f32.mrb[6].mxu0  ;;  %v3662_v34 = vpop.f32.mrb[6].mxu1  ;;  %v758_v30 = vsel %vm745_vm1, %v3656_v31, 0.0 }
  0xfd   :  { %6338 = vst [vmem:[#allocation14_spill] sm:$0xff] %v3660_v33  ;;  %6339 = vst [vmem:[#allocation15_spill] sm:$0xff] %v3662_v34  ;;  %v3664_v35 = vpop.f32.mrb[7].mxu0  ;;  %v3666_v36 = vpop.f32.mrb[7].mxu1  ;;  %v767_v9 = vsel %vm745_vm1, %v3660_v33, 0.0  ;;  %v875_v25 = vsel %vm745_vm1, %v3662_v34, 0.0  ;;  %v1041_v55 = vmul.f32 %v3660_v33, %v3660_v33  ;;  %v1077_v61 = vmul.f32 %v3662_v34, %v3662_v34 }
  0xfe   :  { %6340 = vst [vmem:[#allocation16_spill] sm:$0xff] %v3664_v35  ;;  %6341 = vst [vmem:[#allocation17_spill] sm:$0xff] %v3666_v36 }
 0x100   :  { %1113 = vadd.xlane.f32.xlu0 %v1112_v37  ;;  %858 = vadd.xlane.f32.xlu1 %v857_v38  ;;  %v761_v37 = vsel %vm745_vm1, %v3664_v35, 0.0 }
 0x102   :  { %v3675_v41 = vpop.f32.mrb[8].mxu0  ;;  %v3677_v42 = vpop.f32.mrb[8].mxu1 }
 0x103   :  { %6342 = vst [vmem:[#allocation18_spill] sm:$0xff] %v3675_v41  ;;  %6343 = vst [vmem:[#allocation19_spill] sm:$0xff] %v3677_v42  ;;  %v3683_v46 = vpop.f32.mrb[9].mxu0  ;;  %v3685_v47 = vpop.f32.mrb[9].mxu1 }
 0x104   :  { %6344 = vst [vmem:[#allocation20_spill] sm:$0xff] %v3683_v46  ;;  %6345 = vst [vmem:[#allocation21_spill] sm:$0xff] %v3685_v47  ;;  %1221 = vadd.xlane.f32.xlu0 %v1220_v43  ;;  %1116 = vadd.xlane.f32.xlu1 %v1115_v44  ;;  %v3687_v48 = vpop.f32.mrb[10].mxu0  ;;  %v3689_v49 = vpop.f32.mrb[10].mxu1 }
 0x105   :  { %6346 = vst [vmem:[#allocation22_spill] sm:$0xff] %v3687_v48  ;;  %6347 = vst [vmem:[#allocation23_spill] sm:$0xff] %v3689_v49  ;;  %v3691_v50 = vpop.f32.mrb[11].mxu0  ;;  %v3693_v51 = vpop.f32.mrb[11].mxu1 }
 0x106   :  { %6348 = vst [vmem:[#allocation24_spill] sm:$0xff] %v3691_v50  ;;  %6349 = vst [vmem:[#allocation25_spill] sm:$0xff] %v3693_v51 }
 0x108   :  { %1224 = vadd.xlane.f32.xlu1 %v1223_v52  ;;  %750 = vadd.xlane.f32.xlu0 %v749_v53  ;;  %v866_v52 = vsel %vm745_vm1, %v3658_v32, 0.0  ;;  %v869_v53 = vsel %vm745_vm1, %v3666_v36, 0.0 }
 0x10a   :  { %v3702_v56 = vpop.f32.mrb[12].mxu0  ;;  %v3704_v57 = vpop.f32.mrb[12].mxu1 }
 0x10b   :  { %6350 = vst [vmem:[#allocation26_spill] sm:$0xff] %v3702_v56  ;;  %6351 = vst [vmem:[#allocation27_spill] sm:$0xff] %v3704_v57  ;;  %v3712_v62 = vpop.f32.mrb[13].mxu0  ;;  %v3714_v63 = vpop.f32.mrb[13].mxu1  ;;  %v1048_v19 = vmul.f32 %v3702_v56, %v3702_v56 }
 0x10c   :  { %6352 = vst [vmem:[#allocation28_spill] sm:$0xff] %v3712_v62  ;;  %6353 = vst [vmem:[#allocation29_spill] sm:$0xff] %v3714_v63  ;;  %1110 = vadd.xlane.f32.xlu1 %v1109_v58  ;;  %1107 = vadd.xlane.f32.xlu0 %v1106_v59  ;;  %v3716_v0 = vpop.f32.mrb[14].mxu0  ;;  %v3718_v1 = vpop.f32.mrb[14].mxu1  ;;  %v1124_v58 = vsel %vm745_vm1, %v1040_v54, 0.0  ;;  %v1127_v59 = vsel %vm745_vm1, %v1041_v55, 0.0 }
 0x10d   :  { %6354 = vst [vmem:[#allocation30_spill] sm:$0xff] %v3716_v0  ;;  %6355 = vst [vmem:[#allocation31_spill] sm:$0xff] %v3718_v1  ;;  %v3720_v2 = vpop.f32.mrb[15].mxu0  ;;  %v3722_v3 = vpop.f32.mrb[15].mxu1  ;;  %v782_v15 = vsel %vm745_vm1, %v3712_v62, 0.0 }
 0x10e   :  { %6356 = vst [vmem:[#allocation32_spill] sm:$0xff] %v3720_v2  ;;  %6357 = vst [vmem:[#allocation33_spill] sm:$0xff] %v3722_v3 }
 0x110   :  { %1218 = vadd.xlane.f32.xlu1 %v1217_v4  ;;  %1215 = vadd.xlane.f32.xlu0 %v1214_v5  ;;  %v1232_v4 = vsel %vm745_vm1, %v1076_v60, 0.0  ;;  %v1235_v5 = vsel %vm745_vm1, %v1077_v61, 0.0  ;;  %v776_v61 = vsel %vm745_vm1, %v3675_v41, 0.0 }
 0x112   :  { %v3726_v6 = vpop.f32.mrb[16].mxu0  ;;  %v3728_v7 = vpop.f32.mrb[16].mxu1 }
 0x113   :  { %6358 = vst [vmem:[#allocation34_spill] sm:$0xff] %v3726_v6  ;;  %6359 = vst [vmem:[#allocation35_spill] sm:$0xff] %v3728_v7  ;;  %v3734_v10 = vpop.f32.mrb[17].mxu0  ;;  %v3736_v11 = vpop.f32.mrb[17].mxu1  ;;  %v1052_v21 = vmul.f32 %v3726_v6, %v3726_v6 }
 0x114   :  { %6360 = vst [vmem:[#allocation36_spill] sm:$0xff] %v3734_v10  ;;  %6361 = vst [vmem:[#allocation37_spill] sm:$0xff] %v3736_v11  ;;  %765 = vadd.xlane.f32.xlu0 %v764_v8  ;;  %768 = vadd.xlane.f32.xlu1 %v767_v9  ;;  %v3738_v12 = vpop.f32.mrb[18].mxu0  ;;  %v3740_v13 = vpop.f32.mrb[18].mxu1  ;;  %v1038_v8 = vmul.f32 %v3656_v31, %v3656_v31  ;;  %v1039_v9 = vmul.f32 %v3664_v35, %v3664_v35 }
 0x115   :  { %6362 = vst [vmem:[#allocation38_spill] sm:$0xff] %v3738_v12  ;;  %6363 = vst [vmem:[#allocation39_spill] sm:$0xff] %v3740_v13  ;;  %v3742_v17 = vpop.f32.mrb[19].mxu0  ;;  %v3744_v18 = vpop.f32.mrb[19].mxu1 }
 0x116   :  { %6364 = vst [vmem:[#allocation40_spill] sm:$0xff] %v3742_v17  ;;  %6365 = vst [vmem:[#allocation41_spill] sm:$0xff] %v3744_v18 }
 0x118   :  { %873 = vadd.xlane.f32.xlu0 %v872_v24  ;;  %876 = vadd.xlane.f32.xlu1 %v875_v25  ;;  %v1118_v24 = vsel %vm745_vm1, %v1038_v8, 0.0  ;;  %v1121_v25 = vsel %vm745_vm1, %v1039_v9, 0.0 }
 0x11a   :  { %v3750_v28 = vpop.f32.mrb[20].mxu0  ;;  %v3752_v29 = vpop.f32.mrb[20].mxu1 }
 0x11b   :  { %6366 = vst [vmem:[#allocation42_spill] sm:$0xff] %v3750_v28  ;;  %6367 = vst [vmem:[#allocation43_spill] sm:$0xff] %v3752_v29  ;;  %v3758_v38 = vpop.f32.mrb[21].mxu0  ;;  %v3760_v39 = vpop.f32.mrb[21].mxu1 }
 0x11c   :  { %6368 = vst [vmem:[#allocation44_spill] sm:$0xff] %v3758_v38  ;;  %6369 = vst [vmem:[#allocation45_spill] sm:$0xff] %v3760_v39  ;;  %759 = vadd.xlane.f32.xlu0 %v758_v30  ;;  %762 = vadd.xlane.f32.xlu1 %v761_v37  ;;  %v3762_v40 = vpop.f32.mrb[22].mxu0  ;;  %v3764_v43 = vpop.f32.mrb[22].mxu1  ;;  %v1074_v30 = vmul.f32 %v3658_v32, %v3658_v32  ;;  %v1075_v37 = vmul.f32 %v3666_v36, %v3666_v36 }
 0x11d   :  { %6370 = vst [vmem:[#allocation46_spill] sm:$0xff] %v3762_v40  ;;  %6371 = vst [vmem:[#allocation47_spill] sm:$0xff] %v3764_v43  ;;  %v3766_v44 = vpop.f32.mrb[23].mxu0  ;;  %v3768_v45 = vpop.f32.mrb[23].mxu1 }
 0x11e   :  { %6372 = vst [vmem:[#allocation48_spill] sm:$0xff] %v3766_v44  ;;  %6373 = vst [vmem:[#allocation49_spill] sm:$0xff] %v3768_v45  ;;  %v1229_v54 = vsel %vm745_vm1, %v1075_v37, 0.0  ;;  %v773_v37 = vsel %vm745_vm1, %v3691_v50, 0.0 }
 0x120   :  { %867 = vadd.xlane.f32.xlu0 %v866_v52  ;;  %870 = vadd.xlane.f32.xlu1 %v869_v53  ;;  %v1226_v53 = vsel %vm745_vm1, %v1074_v30, 0.0  ;;  %v770_v30 = vsel %vm745_vm1, %v3683_v46, 0.0 }
 0x122   :  { %v3796_v52 = vpop.f32.mrb[24].mxu0 }
 0x123   :  { %6374 = vst [vmem:[#allocation50_spill] sm:$0xff] %v3796_v52  ;;  %v3800_v55 = vpop.f32.mrb[25].mxu0 }
 0x124   :  { %1125 = vadd.xlane.f32.xlu0 %v1124_v58  ;;  %1128 = vadd.xlane.f32.xlu1 %v1127_v59  ;;  %6375 = vst [vmem:[#allocation51_spill] sm:$0xff] %v3800_v55  ;;  %v3802_v58 = vpop.f32.mrb[26].mxu0  ;;  %v3804_v59 = vpop.f32.mrb[24].mxu1 }
 0x125   :  { %6376 = vst [vmem:[#allocation52_spill] sm:$0xff] %v3802_v58  ;;  %6377 = vst [vmem:[#allocation53_spill] sm:$0xff] %v3804_v59  ;;  %v3806_v60 = vpop.f32.mrb[27].mxu0 }
 0x126   :  { %6378 = vst [vmem:[#allocation54_spill] sm:$0xff] %v3806_v60 }
 0x128   :  { %1233 = vadd.xlane.f32.xlu0 %v1232_v4  ;;  %1236 = vadd.xlane.f32.xlu1 %v1235_v5  ;;  %v779_v4 = vsel %vm745_vm1, %v3687_v48, 0.0  ;;  %v3812_v5 = vpop.f32.mrb[25].mxu1 }
 0x129   :  { %6379 = vst [vmem:[#allocation55_spill] sm:$0xff] %v3812_v5  ;;  %v3814_v8 = vpop.f32.mrb[26].mxu1 }
 0x12a   :  { %6380 = vst [vmem:[#allocation56_spill] sm:$0xff] %v3814_v8  ;;  %v3816_v9 = vpop.f32.mrb[27].mxu1 }
 0x12b   :  { %6381 = vst [vmem:[#allocation57_spill] sm:$0xff] %v3816_v9 }
 0x12c   :  { %1119 = vadd.xlane.f32.xlu0 %v1118_v24  ;;  %1122 = vadd.xlane.f32.xlu1 %v1121_v25  ;;  %v884_v24 = vsel %vm745_vm1, %v3677_v42, 0.0  ;;  %v887_v25 = vsel %vm745_vm1, %v3689_v49, 0.0 }
 0x130   :  { %1227 = vadd.xlane.f32.xlu0 %v1226_v53  ;;  %1230 = vadd.xlane.f32.xlu1 %v1229_v54  ;;  %v878_v53 = vsel %vm745_vm1, %v3685_v47, 0.0  ;;  %v881_v54 = vsel %vm745_vm1, %v3693_v51, 0.0 }
 0x134   :  { %777 = vadd.xlane.f32.xlu0 %v776_v61  ;;  %780 = vadd.xlane.f32.xlu1 %v779_v4  ;;  %v1044_v61 = vmul.f32 %v3675_v41, %v3675_v41  ;;  %v1045_v4 = vmul.f32 %v3687_v48, %v3687_v48 }
 0x138   :  { %885 = vadd.xlane.f32.xlu0 %v884_v24  ;;  %888 = vadd.xlane.f32.xlu1 %v887_v25  ;;  %v1136_v24 = vsel %vm745_vm1, %v1044_v61, 0.0  ;;  %v1139_v25 = vsel %vm745_vm1, %v1045_v4, 0.0 }
 0x13c   :  { %771 = vadd.xlane.f32.xlu0 %v770_v30  ;;  %774 = vadd.xlane.f32.xlu1 %v773_v37  ;;  %v1080_v30 = vmul.f32 %v3677_v42, %v3677_v42  ;;  %v1081_v37 = vmul.f32 %v3689_v49, %v3689_v49  ;;  %v785_v49 = vsel %vm745_vm1, %v3720_v2, 0.0 }
 0x13e   :  { %v1244_v27 = vsel %vm745_vm1, %v1080_v30, 0.0  ;;  %v1247_v32 = vsel %vm745_vm1, %v1081_v37, 0.0  ;;  %v3852_v30 = vpop.f32.mrb[28].mxu0 }
 0x13f   :  { %6382 = vst [vmem:[#allocation58_spill] sm:$0xff] %v3852_v30 }
 0x140   :  { %879 = vadd.xlane.f32.xlu0 %v878_v53  ;;  %882 = vadd.xlane.f32.xlu1 %v881_v54  ;;  %v1042_v53 = vmul.f32 %v3683_v46, %v3683_v46  ;;  %v1043_v54 = vmul.f32 %v3691_v50, %v3691_v50 }
 0x142   :  { %v1130_v61 = vsel %vm745_vm1, %v1042_v53, 0.0  ;;  %v1133_v4 = vsel %vm745_vm1, %v1043_v54, 0.0  ;;  %v3862_v54 = vpop.f32.mrb[28].mxu1 }
 0x143   :  { %6386 = vst [vmem:[#allocation62_spill] sm:$0xff] %v3862_v54 }
 0x144   :  { %1137 = vadd.xlane.f32.xlu0 %v1136_v24  ;;  %1140 = vadd.xlane.f32.xlu1 %v1139_v25  ;;  %v1078_v24 = vmul.f32 %v3685_v47, %v3685_v47  ;;  %v1079_v25 = vmul.f32 %v3693_v51, %v3693_v51  ;;  %v3868_v47 = vpop.f32.mrb[29].mxu1 }
 0x145   :  { %6387 = vst [vmem:[#allocation63_spill] sm:$0xff] %v3868_v47 }
 0x146   :  { %v1238_v37 = vsel %vm745_vm1, %v1078_v24, 0.0  ;;  %v1241_v42 = vsel %vm745_vm1, %v1079_v25, 0.0  ;;  %v3870_v24 = vpop.f32.mrb[30].mxu1 }
 0x147   :  { %6388 = vst [vmem:[#allocation64_spill] sm:$0xff] %v3870_v24  ;;  %v3872_v25 = vpop.f32.mrb[31].mxu1 }
 0x148   :  { %1245 = vadd.xlane.f32.xlu0 %v1244_v27  ;;  %1248 = vadd.xlane.f32.xlu1 %v1247_v32  ;;  %v3856_v27 = vpop.f32.mrb[29].mxu0  ;;  %6389 = vst [vmem:[#allocation65_spill] sm:$0xff] %v3872_v25 }
 0x149   :  { %6383 = vst [vmem:[#allocation59_spill] sm:$0xff] %v3856_v27  ;;  %v3858_v32 = vpop.f32.mrb[30].mxu0 }
 0x14a   :  { %6384 = vst [vmem:[#allocation60_spill] sm:$0xff] %v3858_v32  ;;  %v3860_v53 = vpop.f32.mrb[31].mxu0 }
 0x14b   :  { %6385 = vst [vmem:[#allocation61_spill] sm:$0xff] %v3860_v53 }
 0x14c   :  { %1131 = vadd.xlane.f32.xlu0 %v1130_v61  ;;  %1134 = vadd.xlane.f32.xlu1 %v1133_v4  ;;  %v788_v61 = vsel %vm745_vm1, %v3702_v56, 0.0  ;;  %v791_v4 = vsel %vm745_vm1, %v3716_v0, 0.0  ;;  %v1160_v56 = vsel %vm745_vm1, %v1052_v21, 0.0  ;;  %v1051_v21 = vmul.f32 %v3742_v17, %v3742_v17 }
 0x150   :  { %1239 = vadd.xlane.f32.xlu0 %v1238_v37  ;;  %1242 = vadd.xlane.f32.xlu1 %v1241_v42  ;;  %v896_v42 = vsel %vm745_vm1, %v3704_v57, 0.0  ;;  %v899_v37 = vsel %vm745_vm1, %v3718_v1, 0.0 }
 0x154   :  { %789 = vadd.xlane.f32.xlu0 %v788_v61  ;;  %792 = vadd.xlane.f32.xlu1 %v791_v4  ;;  %v890_v61 = vsel %vm745_vm1, %v3714_v63, 0.0  ;;  %v893_v4 = vsel %vm745_vm1, %v3722_v3, 0.0 }
 0x158   :  { %897 = vadd.xlane.f32.xlu0 %v896_v42  ;;  %900 = vadd.xlane.f32.xlu1 %v899_v37  ;;  %v1049_v42 = vmul.f32 %v3716_v0, %v3716_v0  ;;  %v1148_v37 = vsel %vm745_vm1, %v1048_v19, 0.0  ;;  %v1047_v19 = vmul.f32 %v3720_v2, %v3720_v2 }
 0x15a   :  { %v1151_v51 = vsel %vm745_vm1, %v1049_v42, 0.0  ;;  %v1145_v42 = vsel %vm745_vm1, %v1047_v19, 0.0  ;;  %v3918_v19 = vpop.f32.mrb[32].mxu1 }
 0x15b   :  { %6394 = vst [vmem:[#allocation70_spill] sm:$0xff] %v3918_v19 }
 0x15c   :  { %783 = vadd.xlane.f32.xlu0 %v782_v15  ;;  %786 = vadd.xlane.f32.xlu1 %v785_v49  ;;  %v1084_v15 = vmul.f32 %v3704_v57, %v3704_v57  ;;  %v1085_v49 = vmul.f32 %v3718_v1, %v3718_v1  ;;  %v794_v1 = vsel %vm745_vm1, %v3734_v10, 0.0 }
 0x15e   :  { %v1256_v34 = vsel %vm745_vm1, %v1084_v15, 0.0  ;;  %v1259_v36 = vsel %vm745_vm1, %v1085_v49, 0.0  ;;  %v3908_v15 = vpop.f32.mrb[32].mxu0 }
 0x15f   :  { %6390 = vst [vmem:[#allocation66_spill] sm:$0xff] %v3908_v15 }
 0x160   :  { %891 = vadd.xlane.f32.xlu0 %v890_v61  ;;  %894 = vadd.xlane.f32.xlu1 %v893_v4  ;;  %v1046_v61 = vmul.f32 %v3712_v62, %v3712_v62  ;;  %v1089_v62 = vmul.f32 %v3740_v13, %v3740_v13 }
 0x162   :  { %v1142_v4 = vsel %vm745_vm1, %v1046_v61, 0.0 }
 0x164   :  { %1149 = vadd.xlane.f32.xlu0 %v1148_v37  ;;  %1152 = vadd.xlane.f32.xlu1 %v1151_v51  ;;  %v1082_v37 = vmul.f32 %v3714_v63, %v3714_v63  ;;  %v1083_v51 = vmul.f32 %v3722_v3, %v3722_v3  ;;  %v3924_v63 = vpop.f32.mrb[33].mxu1  ;;  %v797_v3 = vsel %vm745_vm1, %v3742_v17, 0.0 }
 0x165   :  { %6395 = vst [vmem:[#allocation71_spill] sm:$0xff] %v3924_v63 }
 0x166   :  { %v1250_v49 = vsel %vm745_vm1, %v1082_v37, 0.0  ;;  %v1253_v57 = vsel %vm745_vm1, %v1083_v51, 0.0  ;;  %v3926_v37 = vpop.f32.mrb[34].mxu1 }
 0x167   :  { %6396 = vst [vmem:[#allocation72_spill] sm:$0xff] %v3926_v37  ;;  %v3928_v51 = vpop.f32.mrb[35].mxu1 }
 0x168   :  { %1257 = vadd.xlane.f32.xlu0 %v1256_v34  ;;  %1260 = vadd.xlane.f32.xlu1 %v1259_v36  ;;  %v3912_v34 = vpop.f32.mrb[33].mxu0  ;;  %6397 = vst [vmem:[#allocation73_spill] sm:$0xff] %v3928_v51 }
 0x169   :  { %6391 = vst [vmem:[#allocation67_spill] sm:$0xff] %v3912_v34  ;;  %v3914_v36 = vpop.f32.mrb[34].mxu0 }
 0x16a   :  { %6392 = vst [vmem:[#allocation68_spill] sm:$0xff] %v3914_v36  ;;  %v3916_v61 = vpop.f32.mrb[35].mxu0 }
 0x16b   :  { %6393 = vst [vmem:[#allocation69_spill] sm:$0xff] %v3916_v61 }
 0x16c   :  { %1143 = vadd.xlane.f32.xlu0 %v1142_v4  ;;  %1146 = vadd.xlane.f32.xlu1 %v1145_v42  ;;  %v800_v4 = vsel %vm745_vm1, %v3726_v6, 0.0  ;;  %v803_v42 = vsel %vm745_vm1, %v3738_v12, 0.0 }
 0x170   :  { %1251 = vadd.xlane.f32.xlu0 %v1250_v49  ;;  %1254 = vadd.xlane.f32.xlu1 %v1253_v57  ;;  %v908_v57 = vsel %vm745_vm1, %v3728_v7, 0.0  ;;  %v911_v49 = vsel %vm745_vm1, %v3740_v13, 0.0 }
 0x174   :  { %801 = vadd.xlane.f32.xlu0 %v800_v4  ;;  %804 = vadd.xlane.f32.xlu1 %v803_v42  ;;  %v902_v4 = vsel %vm745_vm1, %v3736_v11, 0.0  ;;  %v905_v42 = vsel %vm745_vm1, %v3744_v18, 0.0 }
 0x178   :  { %909 = vadd.xlane.f32.xlu0 %v908_v57  ;;  %912 = vadd.xlane.f32.xlu1 %v911_v49  ;;  %v1053_v57 = vmul.f32 %v3738_v12, %v3738_v12 }
 0x17c   :  { %795 = vadd.xlane.f32.xlu0 %v794_v1  ;;  %798 = vadd.xlane.f32.xlu1 %v797_v3  ;;  %v1163_v1 = vsel %vm745_vm1, %v1053_v57, 0.0  ;;  %v1088_v3 = vmul.f32 %v3728_v7, %v3728_v7 }
 0x17e   :  { %v1268_v12 = vsel %vm745_vm1, %v1088_v3, 0.0  ;;  %v1086_v3 = vmul.f32 %v3736_v11, %v3736_v11 }
 0x180   :  { %903 = vadd.xlane.f32.xlu0 %v902_v4  ;;  %906 = vadd.xlane.f32.xlu1 %v905_v42  ;;  %v1271_v4 = vsel %vm745_vm1, %v1089_v62, 0.0  ;;  %v1050_v42 = vmul.f32 %v3734_v10, %v3734_v10  ;;  %v1087_v62 = vmul.f32 %v3744_v18, %v3744_v18 }
 0x181   :  { %v862_v49 = vpop.xlane.xlu0 %861  ;;  %v754_v23 = vpop.xlane.xlu1 %753 }
 0x182   :  { %v3958_v46 = vmul.f32 0.020408163, %v754_v23  ;;  %v3966_v13 = vmul.f32 0.020408163, %v862_v49  ;;  %v1265_v17 = vsel %vm745_vm1, %v1087_v62, 0.0  ;;  %v812_v62 = vsel %vm745_vm1, %v3750_v28, 0.0 }
 0x184   :  { %1161 = vadd.xlane.f32.xlu0 %v1160_v56  ;;  %1164 = vadd.xlane.f32.xlu1 %v1163_v1  ;;  %v1154_v56 = vsel %vm745_vm1, %v1050_v42, 0.0  ;;  %v1157_v1 = vsel %vm745_vm1, %v1051_v21, 0.0  ;;  %6398 = vst [vmem:[#allocation74_spill] sm:$0xff] %v3966_v13  ;;  %v1396_v23 = vmul.f32 %v3958_v46, %v3958_v46  ;;  %v1262_v21 = vsel %vm745_vm1, %v1086_v3, 0.0 }
 0x185   :  { %v748_v6 = vpop.xlane.xlu0 %747  ;;  %v757_v41 = vpop.xlane.xlu1 %756 }
 0x186   :  { %v3970_v10 = vmul.f32 0.020408163, %v757_v41 }
 0x188   :  { %1269 = vadd.xlane.f32.xlu0 %v1268_v12  ;;  %1272 = vadd.xlane.f32.xlu1 %v1271_v4  ;;  %v1397_v41 = vmul.f32 %v3970_v10, %v3970_v10 }
 0x189   :  { %v856_v57 = vpop.xlane.xlu0 %855  ;;  %v865_v7 = vpop.xlane.xlu1 %864 }
 0x18a   :  { %v3978_v49 = vmul.f32 0.020408163, %v865_v7 }
 0x18c   :  { %1155 = vadd.xlane.f32.xlu0 %v1154_v56  ;;  %1158 = vadd.xlane.f32.xlu1 %v1157_v1  ;;  %v3976_v56 = vmul.f32 %v3966_v13, %v3966_v13  ;;  %6399 = vst [vmem:[#allocation75_spill] sm:$0xff] %v3978_v49  ;;  %v4012_v13 = vmul.f32 0.020408163, %v856_v57  ;;  %v914_v57 = vsel %vm745_vm1, %v3760_v39, 0.0 }
 0x18d   :  { %v1114_v12 = vpop.xlane.xlu0 %1113  ;;  %v859_v4 = vpop.xlane.xlu1 %858 }
 0x18e   :  { %v1324_v42 = vmul.f32 0.020408163, %v1114_v12  ;;  %6401 = vst [vmem:[#allocation77_spill] sm:$0xff] %v4012_v13 }
 0x190   :  { %v1468_v0 = vsub.f32 %v1324_v42, %v1396_v23  ;;  %1263 = vadd.xlane.f32.xlu0 %v1262_v21  ;;  %1266 = vadd.xlane.f32.xlu1 %v1265_v17  ;;  %v815_v17 = vsel %vm745_vm1, %v3762_v40, 0.0  ;;  %v3990_v42 = vmul.f32 0.020408163, %v748_v6  ;;  %v806_v6 = vsel %vm745_vm1, %v3758_v38, 0.0 }
 0x191   :  { %v1222_v1 = vpop.xlane.xlu0 %1221  ;;  %v1117_v2 = vpop.xlane.xlu1 %1116 }
 0x192   :  { %v1540_v48 = vadd.f32 0.001, %v1468_v0  ;;  %v3982_v12 = vmul.f32 0.020408163, %v1222_v1  ;;  %v1325_v3 = vmul.f32 0.020408163, %v1117_v2  ;;  %v3994_v2 = vmul.f32 %v3978_v49, %v3978_v49 }
 0x194   :  { %3231 = vrsqrt.f32 %v1540_v48  ;;  %v1469_v23 = vsub.f32 %v1325_v3, %v1397_v41  ;;  %813 = vadd.xlane.f32.xlu0 %v812_v62  ;;  %816 = vadd.xlane.f32.xlu1 %v815_v17  ;;  %v920_v48 = vsel %vm745_vm1, %v3752_v29, 0.0  ;;  %v923_v41 = vsel %vm745_vm1, %v3764_v43, 0.0 }
 0x195   :  { %v1225_v21 = vpop.xlane.xlu1 %1224  ;;  %v751_v0 = vpop.xlane.xlu0 %750  ;;  %v1394_v3 = vmul.f32 %v3990_v42, %v3990_v42 }
 0x196   :  { %v1541_v1 = vadd.f32 0.001, %v1469_v23  ;;  %v3996_v50 = vmul.f32 0.020408163, %v1225_v21  ;;  %v3998_v11 = vmul.f32 0.020408163, %v751_v0 }
 0x197   :  { %v4008_v23 = vmul.f32 0.020408163, %v859_v4  ;;  %v1684_v4 = vld [vmem:[%s6196_s3 + $0x10] sm:$0xff] }
 0x198   :  { %921 = vadd.xlane.f32.xlu0 %v920_v48  ;;  %924 = vadd.xlane.f32.xlu1 %v923_v41  ;;  %3233 = vrsqrt.f32 %v1541_v1  ;;  %v1395_v21 = vmul.f32 %v3998_v11, %v3998_v11  ;;  %v809_v48 = vsel %vm745_vm1, %v3766_v44, 0.0 }
 0x199   :  { %v1111_v62 = vpop.xlane.xlu1 %1110  ;;  %v1108_v17 = vpop.xlane.xlu0 %1107  ;;  %6400 = vst [vmem:[#allocation76_spill] sm:$0xff] %v4008_v23 }
 0x19a   :  { %v1323_v0 = vmul.f32 0.020408163, %v1111_v62  ;;  %v1322_v7 = vmul.f32 0.020408163, %v1108_v17  ;;  %v1056_v62 = vmul.f32 %v3750_v28, %v3750_v28  ;;  %v1057_v17 = vmul.f32 %v3762_v40, %v3762_v40 }
 0x19b   :  { %v917_v28 = vsel %vm745_vm1, %v3768_v45, 0.0 }
 0x19c   :  { %v1467_v41 = vsub.f32 %v1323_v0, %v1395_v21  ;;  %v1466_v18 = vsub.f32 %v1322_v7, %v1394_v3  ;;  %807 = vadd.xlane.f32.xlu0 %v806_v6  ;;  %810 = vadd.xlane.f32.xlu1 %v809_v48  ;;  %v4029_v7 = vmul.f32 %v4008_v23, %v4008_v23 }
 0x19d   :  { %v1219_v1 = vpop.xlane.xlu1 %1218  ;;  %v1216_v49 = vpop.xlane.xlu0 %1215  ;;  %v4035_v0 = vmul.f32 %v4012_v13, %v4012_v13  ;;  %v3375_v13 = vmov 0  }
 0x19e   :  { %v3232_v31 = vpop.eup %3231  ;;  %v1539_v6 = vadd.f32 0.001, %v1467_v41  ;;  %v1538_v3 = vadd.f32 0.001, %v1466_v18  ;;  %v4031_v21 = vmul.f32 0.020408163, %v1219_v1  ;;  %3193 = vset.pattern.permute.xlu1 %v3375_v13  ;;  %3194 = vset.pattern.permute.xlu0 %v3375_v13 }
 0x19f   :  { %v4037_v48 = vmul.f32 0.020408163, %v1216_v49  ;;  %v4041_v26 = vmul.f32 %v3232_v31, %v1684_v4  ;;  %v1685_v31 = vld [vmem:[%s6196_s3 + $0x18] sm:$0xff] }
 0x1a0   :  { %3235 = vrsqrt.f32 %v1539_v6  ;;  %915 = vadd.xlane.f32.xlu0 %v914_v57  ;;  %918 = vadd.xlane.f32.xlu1 %v917_v28  ;;  %v1172_v28 = vsel %vm745_vm1, %v1056_v62, 0.0  ;;  %v1175_v57 = vsel %vm745_vm1, %v1057_v17, 0.0  ;;  %v1092_v6 = vmul.f32 %v3752_v29, %v3752_v29 }
 0x1a1   :  { %3237 = vrsqrt.f32 %v1538_v3  ;;  %v766_v41 = vpop.xlane.xlu0 %765  ;;  %v769_v1 = vpop.xlane.xlu1 %768  ;;  %v4052_v49 = vmul.f32 %v4041_v26, %v3958_v46  ;;  %v1093_v3 = vmul.f32 %v3764_v43, %v3764_v43  ;;  %v1054_v29 = vmul.f32 %v3758_v38, %v3758_v38 }
 0x1a2   :  { %v3234_v4 = vpop.eup %3233  ;;  %v1280_v62 = vsel %vm745_vm1, %v1092_v6, 0.0  ;;  %v1055_v43 = vmul.f32 %v3766_v44, %v3766_v44  ;;  %v1090_v6 = vmul.f32 %v3760_v39, %v3760_v39  ;;  %v4088_v35 = vmul.f32 0.020408163, %v766_v41 }
 0x1a3   :  { %6402 = vst [vmem:[#allocation78_spill] sm:$0xff] %v4052_v49  ;;  %v4060_v13 = vmul.f32 %v3234_v4, %v1685_v31  ;;  %v1283_v17 = vsel %vm745_vm1, %v1093_v3, 0.0  ;;  %v1683_v31 = vld [vmem:[%s6196_s3 + $0x8] sm:$0xff]  ;;  %v1166_v38 = vsel %vm745_vm1, %v1054_v29, 0.0  ;;  %v4094_v29 = vmul.f32 0.020408163, %v769_v1 }
 0x1a4   :  { %1173 = vadd.xlane.f32.xlu0 %v1172_v28  ;;  %1176 = vadd.xlane.f32.xlu1 %v1175_v57  ;;  %v1400_v41 = vmul.f32 %v4088_v35, %v4088_v35 }
 0x1a5   :  { %v874_v40 = vpop.xlane.xlu0 %873  ;;  %v877_v18 = vpop.xlane.xlu1 %876  ;;  %v4064_v46 = vmul.f32 %v4060_v13, %v3970_v10  ;;  %v1682_v10 = vld [vmem:[%s6196_s3] sm:$0xff] }
 0x1a6   :  { %v4106_v1 = vmul.f32 0.020408163, %v874_v40 }
 0x1a8   :  { %1281 = vadd.xlane.f32.xlu0 %v1280_v62  ;;  %1284 = vadd.xlane.f32.xlu1 %v1283_v17  ;;  %v1169_v62 = vsel %vm745_vm1, %v1055_v43, 0.0  ;;  %v1091_v17 = vmul.f32 %v3768_v45, %v3768_v45  ;;  %6405 = vst [vmem:[#allocation81_spill] sm:$0xff] %v4106_v1 }
 0x1a9   :  { %v760_v4 = vpop.xlane.xlu0 %759  ;;  %v763_v28 = vpop.xlane.xlu1 %762 }
 0x1aa   :  { %v3236_v57 = vpop.eup %3235  ;;  %v4114_v45 = vmul.f32 0.020408163, %v760_v4  ;;  %v4116_v22 = vmul.f32 0.020408163, %v763_v28  ;;  %v932_v4 = vsel %vm745_vm1, %v3804_v59, 0.0  ;;  %v935_v28 = vsel %vm745_vm1, %v3814_v8, 0.0 }
 0x1ab   :  { %v3238_v3 = vpop.eup %3237  ;;  %v4084_v44 = vmul.f32 %v3236_v57, %v1683_v31  ;;  %v1274_v31 = vsel %vm745_vm1, %v1090_v6, 0.0  ;;  %v824_v6 = vsel %vm745_vm1, %v3796_v52, 0.0 }
 0x1ac   :  { %1167 = vadd.xlane.f32.xlu0 %v1166_v38  ;;  %1170 = vadd.xlane.f32.xlu1 %v1169_v62  ;;  %v4086_v23 = vmul.f32 %v3238_v3, %v1682_v10  ;;  %v1277_v38 = vsel %vm745_vm1, %v1091_v17, 0.0  ;;  %v827_v17 = vsel %vm745_vm1, %v3802_v58, 0.0 }
 0x1ad   :  { %v868_v33 = vpop.xlane.xlu0 %867  ;;  %v871_v16 = vpop.xlane.xlu1 %870  ;;  %v4092_v39 = vmul.f32 %v4084_v44, %v3998_v11  ;;  %v1401_v11 = vmul.f32 %v4094_v29, %v4094_v29 }
 0x1ae   :  { %v4098_v43 = vmul.f32 %v4086_v23, %v3990_v42  ;;  %v4108_v42 = vmul.f32 0.020408163, %v877_v18  ;;  %v4120_v18 = vmul.f32 %v4106_v1, %v4106_v1  ;;  %v4144_v1 = vmul.f32 0.020408163, %v871_v16 }
 0x1af   :  { %6403 = vst [vmem:[#allocation79_spill] sm:$0xff] %v4092_v39 }
 0x1b0   :  { %6404 = vst [vmem:[#allocation80_spill] sm:$0xff] %v4098_v43  ;;  %1275 = vadd.xlane.f32.xlu0 %v1274_v31  ;;  %1278 = vadd.xlane.f32.xlu1 %v1277_v38  ;;  %6406 = vst [vmem:[#allocation82_spill] sm:$0xff] %v4108_v42 }
 0x1b1   :  { %v1126_v10 = vpop.xlane.xlu0 %1125  ;;  %v1129_v57 = vpop.xlane.xlu1 %1128  ;;  %6408 = vst [vmem:[#allocation84_spill] sm:$0xff] %v4144_v1 }
 0x1b2   :  { %v1328_v3 = vmul.f32 0.020408163, %v1126_v10  ;;  %v1329_v62 = vmul.f32 0.020408163, %v1129_v57 }
 0x1b4   :  { %v1472_v31 = vsub.f32 %v1328_v3, %v1400_v41  ;;  %v1473_v38 = vsub.f32 %v1329_v62, %v1401_v11  ;;  %825 = vadd.xlane.f32.xlu0 %v824_v6  ;;  %828 = vadd.xlane.f32.xlu1 %v827_v17  ;;  %v4126_v41 = vmul.f32 %v4108_v42, %v4108_v42 }
 0x1b5   :  { %v1234_v40 = vpop.xlane.xlu0 %1233  ;;  %v1237_v14 = vpop.xlane.xlu1 %1236  ;;  %v1398_v62 = vmul.f32 %v4114_v45, %v4114_v45 }
 0x1b6   :  { %v1544_v10 = vadd.f32 0.001, %v1472_v31  ;;  %v1545_v57 = vadd.f32 0.001, %v1473_v38  ;;  %v4122_v20 = vmul.f32 0.020408163, %v1234_v40  ;;  %v1399_v31 = vmul.f32 %v4116_v22, %v4116_v22 }
 0x1b7   :  { %v4128_v11 = vmul.f32 0.020408163, %v1237_v14  ;;  %v4142_v38 = vmul.f32 0.020408163, %v868_v33  ;;  %v1060_v14 = vmul.f32 %v3796_v52, %v3796_v52  ;;  %v1061_v33 = vmul.f32 %v3802_v58, %v3802_v58 }
 0x1b8   :  { %3239 = vrsqrt.f32 %v1544_v10  ;;  %933 = vadd.xlane.f32.xlu0 %v932_v4  ;;  %936 = vadd.xlane.f32.xlu1 %v935_v28  ;;  %v818_v4 = vsel %vm745_vm1, %v3800_v55, 0.0 }
 0x1b9   :  { %3241 = vrsqrt.f32 %v1545_v57  ;;  %v1120_v6 = vpop.xlane.xlu0 %1119  ;;  %v1123_v17 = vpop.xlane.xlu1 %1122  ;;  %6407 = vst [vmem:[#allocation83_spill] sm:$0xff] %v4142_v38  ;;  %v821_v57 = vsel %vm745_vm1, %v3806_v60, 0.0  ;;  %v4156_v16 = vmul.f32 %v4142_v38, %v4142_v38  ;;  %v1184_v52 = vsel %vm745_vm1, %v1060_v14, 0.0 }
 0x1ba   :  { %v1326_v40 = vmul.f32 0.020408163, %v1120_v6  ;;  %v1327_v10 = vmul.f32 0.020408163, %v1123_v17 }
 0x1bc   :  { %v1470_v28 = vsub.f32 %v1326_v40, %v1398_v62  ;;  %v1471_v3 = vsub.f32 %v1327_v10, %v1399_v31  ;;  %819 = vadd.xlane.f32.xlu0 %v818_v4  ;;  %822 = vadd.xlane.f32.xlu1 %v821_v57  ;;  %v4162_v62 = vmul.f32 %v4144_v1, %v4144_v1  ;;  %v926_v40 = vsel %vm745_vm1, %v3812_v5, 0.0 }
 0x1bd   :  { %v1228_v6 = vpop.xlane.xlu0 %1227  ;;  %v1231_v17 = vpop.xlane.xlu1 %1230  ;;  %v929_v10 = vsel %vm745_vm1, %v3816_v9, 0.0  ;;  %v1096_v4 = vmul.f32 %v3804_v59, %v3804_v59  ;;  %v1058_v59 = vmul.f32 %v3800_v55, %v3800_v55 }
 0x1be   :  { %v1542_v42 = vadd.f32 0.001, %v1470_v28  ;;  %v1543_v43 = vadd.f32 0.001, %v1471_v3  ;;  %v4158_v39 = vmul.f32 0.020408163, %v1228_v6 }
 0x1bf   :  { %v4164_v31 = vmul.f32 0.020408163, %v1231_v17  ;;  %v1688_v3 = vld [vmem:[%s6196_s3 + $0x30] sm:$0xff]  ;;  %v1689_v17 = vld [vmem:[%s6196_s3 + $0x38] sm:$0xff] }
 0x1c0   :  { %3243 = vrsqrt.f32 %v1542_v42  ;;  %927 = vadd.xlane.f32.xlu0 %v926_v40  ;;  %930 = vadd.xlane.f32.xlu1 %v929_v10  ;;  %v1097_v10 = vmul.f32 %v3814_v8, %v3814_v8 }
 0x1c1   :  { %3245 = vrsqrt.f32 %v1543_v43  ;;  %v778_v28 = vpop.xlane.xlu0 %777  ;;  %v781_v6 = vpop.xlane.xlu1 %780  ;;  %v1187_v43 = vsel %vm745_vm1, %v1061_v33, 0.0  ;;  %v1059_v33 = vmul.f32 %v3806_v60, %v3806_v60 }
 0x1c2   :  { %v3240_v42 = vpop.eup %3239  ;;  %v4220_v8 = vmul.f32 0.020408163, %v778_v28 }
 0x1c3   :  { %v3242_v40 = vpop.eup %3241  ;;  %v4186_v58 = vmul.f32 %v3240_v42, %v1688_v3  ;;  %v1295_v3 = vsel %vm745_vm1, %v1097_v10, 0.0  ;;  %v1095_v10 = vmul.f32 %v3816_v9, %v3816_v9 }
 0x1c4   :  { %1185 = vadd.xlane.f32.xlu0 %v1184_v52  ;;  %1188 = vadd.xlane.f32.xlu1 %v1187_v43  ;;  %v4188_v57 = vmul.f32 %v3242_v40, %v1689_v17  ;;  %v1292_v52 = vsel %vm745_vm1, %v1096_v4, 0.0  ;;  %v1178_v43 = vsel %vm745_vm1, %v1058_v59, 0.0  ;;  %v1094_v4 = vmul.f32 %v3812_v5, %v3812_v5  ;;  %6413 = vst [vmem:[#allocation89_spill] sm:$0xff] %v4220_v8 }
 0x1c5   :  { %v886_v38 = vpop.xlane.xlu0 %885  ;;  %v889_v1 = vpop.xlane.xlu1 %888  ;;  %v4192_v49 = vmul.f32 %v4186_v58, %v4088_v35  ;;  %v1686_v35 = vld [vmem:[%s6196_s3 + $0x20] sm:$0xff]  ;;  %v4240_v28 = vmul.f32 %v4220_v8, %v4220_v8 }
 0x1c6   :  { %6409 = vst [vmem:[#allocation85_spill] sm:$0xff] %v4188_v57  ;;  %v4198_v14 = vmul.f32 %v4188_v57, %v4094_v29  ;;  %v1687_v29 = vld [vmem:[%s6196_s3 + $0x28] sm:$0xff] }
 0x1c8   :  { %6410 = vst [vmem:[#allocation86_spill] sm:$0xff] %v4198_v14  ;;  %1293 = vadd.xlane.f32.xlu0 %v1292_v52  ;;  %1296 = vadd.xlane.f32.xlu1 %v1295_v3  ;;  %v1181_v52 = vsel %vm745_vm1, %v1059_v33, 0.0  ;;  %v4230_v14 = vmul.f32 0.020408163, %v781_v6  ;;  %v4246_v6 = vmul.f32 0.020408163, %v886_v38 }
 0x1c9   :  { %v772_v17 = vpop.xlane.xlu0 %771  ;;  %v775_v42 = vpop.xlane.xlu1 %774 }
 0x1ca   :  { %v3244_v40 = vpop.eup %3243  ;;  %6415 = vst [vmem:[#allocation91_spill] sm:$0xff] %v4230_v14  ;;  %6417 = vst [vmem:[#allocation93_spill] sm:$0xff] %v4246_v6  ;;  %v4268_v9 = vmul.f32 0.020408163, %v775_v42  ;;  %v941_v42 = vsel %vm745_vm1, %v3872_v25, 0.0 }
 0x1cb   :  { %v3246_v55 = vpop.eup %3245  ;;  %v4216_v3 = vmul.f32 %v3244_v40, %v1686_v35  ;;  %v1286_v35 = vsel %vm745_vm1, %v1094_v4, 0.0  ;;  %v4252_v4 = vmul.f32 0.020408163, %v889_v1  ;;  %v4264_v1 = vmul.f32 %v4246_v6, %v4246_v6 }
 0x1cc   :  { %1179 = vadd.xlane.f32.xlu0 %v1178_v43  ;;  %1182 = vadd.xlane.f32.xlu1 %v1181_v52  ;;  %v4218_v60 = vmul.f32 %v3246_v55, %v1687_v29  ;;  %v1289_v55 = vsel %vm745_vm1, %v1095_v10, 0.0  ;;  %v836_v10 = vsel %vm745_vm1, %v3852_v30, 0.0  ;;  %v839_v52 = vsel %vm745_vm1, %v3858_v32, 0.0  ;;  %6420 = vst [vmem:[#allocation96_spill] sm:$0xff] %v4268_v9 }
 0x1cd   :  { %6411 = vst [vmem:[#allocation87_spill] sm:$0xff] %v4216_v3  ;;  %v4222_v57 = vpop.xlane.xlu0 %879  ;;  %v4224_v59 = vpop.xlane.xlu1 %882  ;;  %v4228_v5 = vmul.f32 %v4216_v3, %v4114_v45  ;;  %v4244_v45 = vmul.f32 %v4230_v14, %v4230_v14  ;;  %6418 = vst [vmem:[#allocation94_spill] sm:$0xff] %v4252_v4  ;;  %v4292_v6 = vmul.f32 %v4268_v9, %v4268_v9  ;;  %v938_v3 = vsel %vm745_vm1, %v3868_v47, 0.0 }
 0x1ce   :  { %6412 = vst [vmem:[#allocation88_spill] sm:$0xff] %v4218_v60  ;;  %v4234_v33 = vmul.f32 %v4218_v60, %v4116_v22  ;;  %v1065_v9 = vmul.f32 %v3858_v32, %v3858_v32 }
 0x1cf   :  { %6414 = vst [vmem:[#allocation90_spill] sm:$0xff] %v4228_v5 }
 0x1d0   :  { %6416 = vst [vmem:[#allocation92_spill] sm:$0xff] %v4234_v33  ;;  %1287 = vadd.xlane.f32.xlu0 %v1286_v35  ;;  %1290 = vadd.xlane.f32.xlu1 %v1289_v55  ;;  %v4274_v35 = vmul.f32 %v4252_v4, %v4252_v4  ;;  %v1199_v33 = vsel %vm745_vm1, %v1065_v9, 0.0 }
 0x1d1   :  { %v1138_v29 = vpop.xlane.xlu0 %1137  ;;  %v1141_v40 = vpop.xlane.xlu1 %1140 }
 0x1d2   :  { %v4248_v22 = vmul.f32 0.020408163, %v1138_v29  ;;  %v4250_v43 = vmul.f32 0.020408163, %v1141_v40  ;;  %v4266_v40 = vmul.f32 0.020408163, %v772_v17  ;;  %v1100_v17 = vmul.f32 %v3862_v54, %v3862_v54 }
 0x1d4   :  { %837 = vadd.xlane.f32.xlu0 %v836_v10  ;;  %840 = vadd.xlane.f32.xlu1 %v839_v52  ;;  %6419 = vst [vmem:[#allocation95_spill] sm:$0xff] %v4266_v40  ;;  %v944_v10 = vsel %vm745_vm1, %v3862_v54, 0.0  ;;  %v947_v52 = vsel %vm745_vm1, %v3870_v24, 0.0  ;;  %v1304_v54 = vsel %vm745_vm1, %v1100_v17, 0.0 }
 0x1d5   :  { %v1246_v38 = vpop.xlane.xlu0 %1245  ;;  %v1249_v29 = vpop.xlane.xlu1 %1248 }
 0x1d6   :  { %v4270_v8 = vmul.f32 0.020408163, %v1246_v38  ;;  %v4276_v14 = vmul.f32 0.020408163, %v1249_v29  ;;  %v4288_v29 = vmul.f32 %v4266_v40, %v4266_v40 }
 0x1d8   :  { %945 = vadd.xlane.f32.xlu0 %v944_v10  ;;  %948 = vadd.xlane.f32.xlu1 %v947_v52  ;;  %v830_v10 = vsel %vm745_vm1, %v3856_v27, 0.0  ;;  %v833_v52 = vsel %vm745_vm1, %v3860_v53, 0.0 }
 0x1d9   :  { %v1132_v38 = vpop.xlane.xlu0 %1131  ;;  %v1135_v55 = vpop.xlane.xlu1 %1134 }
 0x1da   :  { %v4294_v4 = vmul.f32 0.020408163, %v1132_v38  ;;  %v4296_v60 = vmul.f32 0.020408163, %v1135_v55  ;;  %v1064_v55 = vmul.f32 %v3852_v30, %v3852_v30  ;;  %v1101_v30 = vmul.f32 %v3870_v24, %v3870_v24 }
 0x1dc   :  { %831 = vadd.xlane.f32.xlu0 %v830_v10  ;;  %834 = vadd.xlane.f32.xlu1 %v833_v52  ;;  %v1196_v32 = vsel %vm745_vm1, %v1064_v55, 0.0  ;;  %v1307_v24 = vsel %vm745_vm1, %v1101_v30, 0.0 }
 0x1dd   :  { %v4306_v40 = vpop.xlane.xlu0 %1239  ;;  %v4308_v38 = vpop.xlane.xlu1 %1242 }
 0x1e0   :  { %939 = vadd.xlane.f32.xlu0 %v938_v3  ;;  %942 = vadd.xlane.f32.xlu1 %v941_v42  ;;  %v1062_v42 = vmul.f32 %v3856_v27, %v3856_v27 }
 0x1e1   :  { %v4318_v10 = vpop.xlane.xlu0 %789  ;;  %v4320_v52 = vpop.xlane.xlu1 %792 }
 0x1e2   :  { %6421 = vst [vmem:[#allocation97_spill] sm:$0xff] %v4318_v10  ;;  %v1063_v10 = vmul.f32 %v3860_v53, %v3860_v53  ;;  %v1190_v27 = vsel %vm745_vm1, %v1062_v42, 0.0  ;;  %v848_v42 = vsel %vm745_vm1, %v3908_v15, 0.0 }
 0x1e4   :  { %1197 = vadd.xlane.f32.xlu0 %v1196_v32  ;;  %1200 = vadd.xlane.f32.xlu1 %v1199_v33  ;;  %v1098_v32 = vmul.f32 %v3868_v47, %v3868_v47  ;;  %v1099_v33 = vmul.f32 %v3872_v25, %v3872_v25  ;;  %v1193_v53 = vsel %vm745_vm1, %v1063_v10, 0.0 }
 0x1e5   :  { %v4328_v5 = vpop.xlane.xlu0 %897  ;;  %v4330_v3 = vpop.xlane.xlu1 %900 }
 0x1e8   :  { %1305 = vadd.xlane.f32.xlu0 %v1304_v54  ;;  %1308 = vadd.xlane.f32.xlu1 %v1307_v24  ;;  %v1298_v54 = vsel %vm745_vm1, %v1098_v32, 0.0  ;;  %v1301_v24 = vsel %vm745_vm1, %v1099_v33, 0.0  ;;  %v956_v32 = vsel %vm745_vm1, %v3918_v19, 0.0  ;;  %v959_v33 = vsel %vm745_vm1, %v3926_v37, 0.0 }
 0x1e9   :  { %v4338_v55 = vpop.xlane.xlu0 %783  ;;  %v4340_v9 = vpop.xlane.xlu1 %786 }
 0x1ea   :  { %6422 = vst [vmem:[#allocation98_spill] sm:$0xff] %v4340_v9 }
 0x1ec   :  { %1191 = vadd.xlane.f32.xlu0 %v1190_v27  ;;  %1194 = vadd.xlane.f32.xlu1 %v1193_v53  ;;  %v851_v27 = vsel %vm745_vm1, %v3914_v36, 0.0 }
 0x1ed   :  { %v4348_v17 = vpop.xlane.xlu0 %891  ;;  %v4350_v30 = vpop.xlane.xlu1 %894 }
 0x1ee   :  { %6423 = vst [vmem:[#allocation99_spill] sm:$0xff] %v4348_v17 }
 0x1f0   :  { %1299 = vadd.xlane.f32.xlu0 %v1298_v54  ;;  %1302 = vadd.xlane.f32.xlu1 %v1301_v24 }
 0x1f1   :  { %v4354_v47 = vpop.xlane.xlu0 %1149  ;;  %v4356_v9 = vpop.xlane.xlu1 %1152 }
 0x1f4   :  { %849 = vadd.xlane.f32.xlu0 %v848_v42  ;;  %852 = vadd.xlane.f32.xlu1 %v851_v27  ;;  %v842_v42 = vsel %vm745_vm1, %v3912_v34, 0.0  ;;  %v845_v27 = vsel %vm745_vm1, %v3916_v61, 0.0 }
 0x1f5   :  { %v4362_v53 = vpop.xlane.xlu0 %1257  ;;  %v4364_v10 = vpop.xlane.xlu1 %1260 }
 0x1f6   :  { %6424 = vst [vmem:[#allocation100_spill] sm:$0xff] %v4362_v53 }
 0x1f8   :  { %957 = vadd.xlane.f32.xlu0 %v956_v32  ;;  %960 = vadd.xlane.f32.xlu1 %v959_v33  ;;  %v1068_v32 = vmul.f32 %v3908_v15, %v3908_v15  ;;  %v1069_v33 = vmul.f32 %v3914_v36, %v3914_v36  ;;  %v1105_v15 = vmul.f32 %v3926_v37, %v3926_v37 }
 0x1f9   :  { %v4370_v54 = vpop.xlane.xlu0 %1143  ;;  %v4372_v24 = vpop.xlane.xlu1 %1146 }
 0x1fa   :  { %6425 = vst [vmem:[#allocation101_spill] sm:$0xff] %v4370_v54  ;;  %6426 = vst [vmem:[#allocation102_spill] sm:$0xff] %v4372_v24  ;;  %v950_v54 = vsel %vm745_vm1, %v3924_v63, 0.0  ;;  %v953_v24 = vsel %vm745_vm1, %v3928_v51, 0.0  ;;  %v1208_v36 = vsel %vm745_vm1, %v1068_v32, 0.0  ;;  %v1319_v37 = vsel %vm745_vm1, %v1105_v15, 0.0 }
 0x1fc   :  { %843 = vadd.xlane.f32.xlu0 %v842_v42  ;;  %846 = vadd.xlane.f32.xlu1 %v845_v27 }
 0x1fd   :  { %v4378_v25 = vpop.xlane.xlu0 %1251  ;;  %v4380_v17 = vpop.xlane.xlu1 %1254 }
 0x1fe   :  { %6427 = vst [vmem:[#allocation103_spill] sm:$0xff] %v4378_v25  ;;  %6428 = vst [vmem:[#allocation104_spill] sm:$0xff] %v4380_v17  ;;  %v1104_v25 = vmul.f32 %v3918_v19, %v3918_v19  ;;  %v1211_v17 = vsel %vm745_vm1, %v1069_v33, 0.0  ;;  %v1103_v33 = vmul.f32 %v3928_v51, %v3928_v51 }
 0x200   :  { %951 = vadd.xlane.f32.xlu0 %v950_v54  ;;  %954 = vadd.xlane.f32.xlu1 %v953_v24  ;;  %v1066_v24 = vmul.f32 %v3912_v34, %v3912_v34  ;;  %v1316_v19 = vsel %vm745_vm1, %v1104_v25, 0.0 }
 0x201   :  { %v4390_v42 = vpop.xlane.xlu0 %801  ;;  %v4392_v27 = vpop.xlane.xlu1 %804 }
 0x202   :  { %6429 = vst [vmem:[#allocation105_spill] sm:$0xff] %v4390_v42  ;;  %v1067_v42 = vmul.f32 %v3916_v61, %v3916_v61  ;;  %v1202_v34 = vsel %vm745_vm1, %v1066_v24, 0.0  ;;  %v6432_v24 = vsub.f32 %v3982_v12, %v3976_v56  ;;  %v6435_v56 = vsub.f32 %v4031_v21, %v4029_v7  ;;  %v1718_v7 = vld [vmem:[%s6196_s3 + $0x120] sm:$0xff] }
 0x204   :  { %1209 = vadd.xlane.f32.xlu0 %v1208_v36  ;;  %1212 = vadd.xlane.f32.xlu1 %v1211_v17  ;;  %v1102_v17 = vmul.f32 %v3924_v63, %v3924_v63  ;;  %v1205_v61 = vsel %vm745_vm1, %v1067_v42, 0.0  ;;  %v1576_v42 = vadd.f32 0.001, %v6432_v24  ;;  %v1575_v12 = vadd.f32 0.001, %v6435_v56  ;;  %v1721_v56 = vld [vmem:[%s6196_s3 + $0x138] sm:$0xff] }
 0x205   :  { %v4400_v53 = vpop.xlane.xlu0 %909  ;;  %v4402_v54 = vpop.xlane.xlu1 %912 }
 0x206   :  { %3247 = vrsqrt.f32 %v1576_v42 }
 0x208   :  { %1317 = vadd.xlane.f32.xlu0 %v1316_v19  ;;  %1320 = vadd.xlane.f32.xlu1 %v1319_v37  ;;  %v1310_v19 = vsel %vm745_vm1, %v1102_v17, 0.0  ;;  %v1313_v37 = vsel %vm745_vm1, %v1103_v33, 0.0  ;;  %v6433_v17 = vsub.f32 %v4037_v48, %v4035_v0  ;;  %v6434_v33 = vsub.f32 %v3996_v50, %v3994_v2  ;;  %v1720_v50 = vld [vmem:[%s6196_s3 + $0x130] sm:$0xff] }
 0x209   :  { %v4410_v32 = vpop.xlane.xlu0 %795  ;;  %v4412_v36 = vpop.xlane.xlu1 %798 }
 0x20a   :  { %6430 = vst [vmem:[#allocation106_spill] sm:$0xff] %v4410_v32  ;;  %v1574_v51 = vadd.f32 0.001, %v6433_v17 }
 0x20c   :  { %1203 = vadd.xlane.f32.xlu0 %v1202_v34  ;;  %1206 = vadd.xlane.f32.xlu1 %v1205_v61  ;;  %3249 = vrsqrt.f32 %v1574_v51 }
 0x20d   :  { %v4420_v25 = vpop.xlane.xlu0 %903  ;;  %v4422_v15 = vpop.xlane.xlu1 %906 }
 0x20e   :  { %6431 = vst [vmem:[#allocation107_spill] sm:$0xff] %v4420_v25 }
 0x210   :  { %1311 = vadd.xlane.f32.xlu0 %v1310_v19  ;;  %1314 = vadd.xlane.f32.xlu1 %v1313_v37  ;;  %v1577_v19 = vadd.f32 0.001, %v6434_v33  ;;  %v3248_v0 = vpop.eup %3247 }
 0x211   :  { %v4426_v63 = vpop.xlane.xlu0 %1161  ;;  %v4428_v32 = vpop.xlane.xlu1 %1164  ;;  %v4460_v51 = vmul.f32 %v3248_v0, %v1720_v50 }
 0x212   :  { %3251 = vrsqrt.f32 %v1577_v19 }
 0x213   :  { %3253 = vrsqrt.f32 %v1575_v12  ;;  %6438 = vst [vmem:[#allocation110_spill] sm:$0xff] %v4460_v51 }
 0x215   :  { %v4433_v34 = vpop.xlane.xlu0 %1269  ;;  %v4435_v61 = vpop.xlane.xlu1 %1272 }
 0x216   :  { %v3250_v17 = vpop.eup %3249 }
 0x217   :  { %v4475_v0 = vmul.f32 %v3250_v17, %v1718_v7  ;;  %v6445_v17 = vsub.f32 %v4122_v20, %v4120_v18  ;;  %v1828_v18 = vld [vmem:[%s6197_s4 + $0x10] sm:$0xff] }
 0x219   :  { %v4443_v37 = vpop.xlane.xlu0 %1155  ;;  %v4445_v25 = vpop.xlane.xlu1 %1158  ;;  %6441 = vst [vmem:[#allocation112_spill] sm:$0xff] %v4475_v0  ;;  %v1580_v7 = vadd.f32 0.001, %v6445_v17 }
 0x21c   :  { %v3252_v21 = vpop.eup %3251 }
 0x21d   :  { %v4450_v24 = vpop.xlane.xlu0 %1263  ;;  %v4452_v42 = vpop.xlane.xlu1 %1266  ;;  %v4477_v50 = vmul.f32 %v3252_v21, %v1721_v56 }
 0x21e   :  { %6436 = vst [vmem:[#allocation108_spill] sm:$0xff] %v4450_v24 }
 0x21f   :  { %6442 = vst [vmem:[#allocation113_spill] sm:$0xff] %v4477_v50 }
 0x221   :  { %v4457_v2 = vpop.xlane.xlu0 %813  ;;  %v817_v48 = vpop.xlane.xlu1 %816  ;;  %2054 = vperm.xlu1 %3193, %v4041_v26   ;;  %v6440_v26 = vsub.f32 %v4128_v11, %v4126_v41 }
 0x222   :  { %6437 = vst [vmem:[#allocation109_spill] sm:$0xff] %v4457_v2  ;;  %v3254_v2 = vpop.eup %3253 }
 0x223   :  { %v1581_v12 = vadd.f32 0.001, %v6440_v26  ;;  %v1829_v26 = vld [vmem:[%s6197_s4 + $0x18] sm:$0xff] }
 0x224   :  { %v1973_v20 = vsub.f32 %v1829_v26, %v4064_v46  ;;  %v6449_v46 = vsub.f32 %v4250_v43, %v4244_v45  ;;  %v1367_v45 = vmul.f32 0.020408163, %v4308_v38  ;;  %v1725_v38 = vld [vmem:[%s6196_s3 + $0x158] sm:$0xff] }
 0x225   :  { %v4465_v33 = vpop.xlane.xlu0 %921  ;;  %v925_v19 = vpop.xlane.xlu1 %924  ;;  %2234 = vperm.xlu1 %3193, %v4460_v51   ;;  %v1719_v51 = vld [vmem:[%s6196_s3 + $0x128] sm:$0xff]  ;;  %3255 = vrsqrt.f32 %v1581_v12  ;;  %v4502_v12 = vmul.f32 0.020408163, %v817_v48 }
 0x226   :  { %6439 = vst [vmem:[#allocation111_spill] sm:$0xff] %v4465_v33  ;;  %2044 = vperm.xlu0 %3194, %v4086_v23   ;;  %v6443_v23 = vsub.f32 %v4164_v31, %v4162_v62  ;;  %v4489_v11 = vmul.f32 %v3254_v2, %v1719_v51  ;;  %v6446_v62 = vsub.f32 %v4158_v39, %v4156_v16  ;;  %v1827_v39 = vld [vmem:[%s6197_s4 + $0x8] sm:$0xff]  ;;  %v1549_v16 = vadd.f32 0.001, %v6449_v46 }
 0x227   :  { %v6448_v2 = vsub.f32 %v4248_v22, %v4240_v28  ;;  %v1826_v28 = vld [vmem:[%s6197_s4] sm:$0xff]  ;;  %v4535_v17 = vmul.f32 0.020408163, %v925_v19 }
 0x228   :  { %v1579_v41 = vadd.f32 0.001, %v6443_v23  ;;  %6444 = vst [vmem:[#allocation114_spill] sm:$0xff] %v4489_v11  ;;  %v1578_v31 = vadd.f32 0.001, %v6446_v62  ;;  %v6452_v62 = vld [vmem:[#allocation79_spill] sm:$0xff] }
 0x229   :  { %v4479_v24 = vpop.xlane.xlu0 %807  ;;  %v811_v33 = vpop.xlane.xlu1 %810  ;;  %2224 = vperm.xlu1 %3193, %v4475_v0   ;;  %v1548_v48 = vadd.f32 0.001, %v6448_v2  ;;  %v1971_v2 = vsub.f32 %v1827_v39, %v6452_v62 }
 0x22a   :  { %2239 = vperm.xlu0 %3194, %v4477_v50   ;;  %3257 = vrsqrt.f32 %v1579_v41  ;;  %v4554_v39 = vmul.f32 0.020408163, %v811_v33  ;;  %v4567_v33 = vmul.f32 0.020408163, %v4320_v52 }
 0x22b   :  { %3259 = vrsqrt.f32 %v1580_v7  ;;  %v6451_v7 = vld [vmem:[#allocation78_spill] sm:$0xff] }
 0x22c   :  { %3261 = vrsqrt.f32 %v1578_v31  ;;  %v1972_v26 = vsub.f32 %v1828_v18, %v6451_v7  ;;  %v6455_v18 = vsub.f32 %v4276_v14, %v4274_v35  ;;  %v1415_v62 = vmul.f32 %v4554_v39, %v4554_v39 }
 0x22d   :  { %v4494_v21 = vpop.xlane.xlu0 %915  ;;  %v4496_v56 = vpop.xlane.xlu1 %918  ;;  %2059 = vperm.xlu1 %3193, %v4060_v13   ;;  %v4513_v13 = vmul.f32 0.020408163, %v4224_v59  ;;  %v1417_v59 = vmul.f32 %v4502_v12, %v4502_v12  ;;  %3263 = vrsqrt.f32 %v1548_v48  ;;  %v1366_v48 = vmul.f32 0.020408163, %v4306_v40 }
 0x22e   :  { %2229 = vperm.xlu0 %3194, %v4489_v11   ;;  %3265 = vrsqrt.f32 %v1549_v16 }
 0x22f   :  { %6447 = vst [vmem:[#allocation115_spill] sm:$0xff] %v4513_v13  ;;  %v1439_v31 = vmul.f32 %v4513_v13, %v4513_v13 }
 0x231   :  { %v4518_v51 = vpop.xlane.xlu0 %1173  ;;  %v1177_v23 = vpop.xlane.xlu1 %1176  ;;  %2049 = vperm.xlu1 %3193, %v4084_v44   ;;  %v6450_v44 = vsub.f32 %v4270_v8, %v4264_v1  ;;  %v6454_v1 = vld [vmem:[#allocation80_spill] sm:$0xff]  ;;  %v1511_v16 = vsub.f32 %v1367_v45, %v1439_v31 }
 0x232   :  { %v1345_v41 = vmul.f32 0.020408163, %v1177_v23  ;;  %2491 = vperm.xlu0 %3194, %v1973_v20   ;;  %v3256_v23 = vpop.eup %3255  ;;  %v4541_v20 = vmul.f32 0.020408163, %v4222_v57  ;;  %v1970_v19 = vsub.f32 %v1826_v28, %v6454_v1  ;;  %v1585_v57 = vadd.f32 0.001, %v6455_v18 }
 0x233   :  { %v1584_v22 = vadd.f32 0.001, %v6450_v44  ;;  %v6456_v44 = vsub.f32 %v4294_v4, %v4288_v29  ;;  %6458 = vst [vmem:[#allocation80_spill] sm:$0xff] %v4567_v33  ;;  %v1723_v4 = vld [vmem:[%s6196_s3 + $0x148] sm:$0xff]  ;;  %v6459_v29 = vsub.f32 %v4296_v60, %v4292_v6  ;;  %v1337_v60 = vmul.f32 0.020408163, %v4356_v9 }
 0x234   :  { %v1489_v43 = vsub.f32 %v1345_v41, %v1417_v59  ;;  %6453 = vst [vmem:[#allocation78_spill] sm:$0xff] %v4541_v20  ;;  %v1453_v41 = vmul.f32 %v4535_v17, %v4535_v17  ;;  %v3258_v14 = vpop.eup %3257  ;;  %v1438_v35 = vmul.f32 %v4541_v20, %v4541_v20  ;;  %v4590_v6 = vmul.f32 0.020408163, %v4496_v56  ;;  %v1833_v9 = vld [vmem:[%s6197_s4 + $0x38] sm:$0xff]  ;;  %v1722_v56 = vld [vmem:[%s6196_s3 + $0x140] sm:$0xff] }
 0x235   :  { %v4545_v46 = vpop.xlane.xlu0 %1281  ;;  %v1285_v8 = vpop.xlane.xlu1 %1284  ;;  %2486 = vperm.xlu1 %3193, %v1972_v26   ;;  %3267 = vrsqrt.f32 %v1584_v22  ;;  %v1546_v7 = vadd.f32 0.001, %v6456_v44  ;;  %v4562_v26 = vmul.f32 %v3256_v23, %v1725_v38  ;;  %v1547_v45 = vadd.f32 0.001, %v6459_v29  ;;  %v4586_v23 = vld [vmem:[%s6197_s4 + $0x30] sm:$0xff] }
 0x236   :  { %v1561_v59 = vadd.f32 0.001, %v1489_v43  ;;  %2481 = vperm.xlu0 %3194, %v1971_v2   ;;  %v1381_v28 = vmul.f32 0.020408163, %v1285_v8  ;;  %v1724_v2 = vld [vmem:[%s6196_s3 + $0x150] sm:$0xff]  ;;  %v3260_v31 = vpop.eup %3259  ;;  %v1510_v8 = vsub.f32 %v1366_v48, %v1438_v35  ;;  %v4592_v18 = vmul.f32 %v3258_v14, %v1723_v4  ;;  %v1831_v4 = vld [vmem:[%s6197_s4 + $0x28] sm:$0xff] }
 0x237   :  { %6457 = vst [vmem:[#allocation79_spill] sm:$0xff] %v4562_v26  ;;  %v4606_v44 = vmul.f32 %v3260_v31, %v1724_v2  ;;  %v1692_v29 = vld [vmem:[%s6196_s3 + $0x50] sm:$0xff]  ;;  %v6464_v2 = vld [vmem:[#allocation86_spill] sm:$0xff]  ;;  %v1373_v20 = vmul.f32 0.020408163, %v4364_v10 }
 0x238   :  { %3269 = vrsqrt.f32 %v1561_v59  ;;  %v1525_v40 = vsub.f32 %v1381_v28, %v1453_v41  ;;  %6460 = vst [vmem:[#allocation116_spill] sm:$0xff] %v4592_v18  ;;  %v1409_v59 = vmul.f32 %v4567_v33, %v4567_v33  ;;  %v1582_v14 = vadd.f32 0.001, %v1510_v8 }
 0x239   :  { %v4569_v22 = vpop.xlane.xlu0 %1167  ;;  %v1171_v43 = vpop.xlane.xlu1 %1170  ;;  %2476 = vperm.xlu1 %3193, %v1970_v19   ;;  %3271 = vrsqrt.f32 %v1585_v57  ;;  %v1583_v19 = vadd.f32 0.001, %v1511_v16  ;;  %6461 = vst [vmem:[#allocation117_spill] sm:$0xff] %v4606_v44  ;;  %v1977_v31 = vsub.f32 %v1833_v9, %v6464_v2  ;;  %v1705_v9 = vld [vmem:[%s6196_s3 + $0xb8] sm:$0xff] }
 0x23a   :  { %v1343_v52 = vmul.f32 0.020408163, %v1171_v43  ;;  %2259 = vperm.xlu0 %3194, %v4562_v26   ;;  %v1597_v1 = vadd.f32 0.001, %v1525_v40  ;;  %3273 = vrsqrt.f32 %v1546_v7  ;;  %v3262_v57 = vpop.eup %3261  ;;  %v1481_v35 = vsub.f32 %v1337_v60, %v1409_v59 }
 0x23b   :  { %v3264_v16 = vpop.eup %3263  ;;  %v1451_v40 = vmul.f32 %v4590_v6, %v4590_v6  ;;  %v4627_v8 = vmul.f32 %v3262_v57, %v1722_v56  ;;  %v4649_v56 = vmul.f32 0.020408163, %v4328_v5 }
 0x23c   :  { %v1487_v38 = vsub.f32 %v1343_v52, %v1415_v62  ;;  %3275 = vrsqrt.f32 %v1597_v1  ;;  %v6462_v62 = vld [vmem:[#allocation97_spill] sm:$0xff]  ;;  %v4630_v1 = vmul.f32 0.020408163, %v4330_v3  ;;  %v1728_v3 = vld [vmem:[%s6196_s3 + $0x170] sm:$0xff]  ;;  %v4653_v2 = vmul.f32 %v3264_v16, %v1692_v29 }
 0x23d   :  { %v4596_v41 = vpop.xlane.xlu0 %1275  ;;  %v1279_v28 = vpop.xlane.xlu1 %1278  ;;  %2074 = vperm.xlu1 %3193, %v4186_v58   ;;  %3277 = vrsqrt.f32 %v1547_v45  ;;  %v4613_v58 = vld [vmem:[%s6197_s4 + $0x20] sm:$0xff]  ;;  %v4624_v52 = vmul.f32 0.020408163, %v6462_v62  ;;  %6465 = vst [vmem:[#allocation86_spill] sm:$0xff] %v4627_v8  ;;  %v1553_v57 = vadd.f32 0.001, %v1481_v35 }
 0x23e   :  { %v1559_v48 = vadd.f32 0.001, %v1487_v38  ;;  %2249 = vperm.xlu0 %3194, %v4592_v18   ;;  %v1379_v43 = vmul.f32 0.020408163, %v1279_v28  ;;  %v3266_v45 = vpop.eup %3265  ;;  %3279 = vrsqrt.f32 %v1583_v19  ;;  %6466 = vst [vmem:[#allocation118_spill] sm:$0xff] %v4630_v1  ;;  %v1693_v19 = vld [vmem:[%s6196_s3 + $0x58] sm:$0xff]  ;;  %v1445_v16 = vmul.f32 %v4630_v1, %v4630_v1 }
 0x23f   :  { %6463 = vst [vmem:[#allocation97_spill] sm:$0xff] %v4624_v52  ;;  %v3268_v60 = vpop.eup %3267  ;;  %v6467_v62 = vld [vmem:[#allocation90_spill] sm:$0xff]  ;;  %v1408_v13 = vmul.f32 %v4624_v52, %v4624_v52  ;;  %v4658_v26 = vmul.f32 %v3266_v45, %v1693_v19  ;;  %v6474_v45 = vld [vmem:[#allocation87_spill] sm:$0xff] }
 0x240   :  { %3281 = vrsqrt.f32 %v1559_v48  ;;  %v1523_v38 = vsub.f32 %v1379_v43, %v1451_v40  ;;  %6468 = vst [vmem:[#allocation90_spill] sm:$0xff] %v4649_v56  ;;  %v1336_v48 = vmul.f32 0.020408163, %v4354_v47  ;;  %v6469_v40 = vld [vmem:[#allocation92_spill] sm:$0xff]  ;;  %v4660_v5 = vmul.f32 %v3268_v60, %v1728_v3  ;;  %v1690_v3 = vld [vmem:[%s6196_s3 + $0x40] sm:$0xff] }
 0x241   :  { %v4632_v59 = vpop.xlane.xlu0 %825  ;;  %v4634_v28 = vpop.xlane.xlu1 %828  ;;  %2254 = vperm.xlu1 %3193, %v4606_v44   ;;  %v1975_v43 = vsub.f32 %v1831_v4, %v6469_v40  ;;  %3283 = vrsqrt.f32 %v1582_v14  ;;  %v4667_v4 = vmul.f32 0.020408163, %v4338_v55  ;;  %v6472_v14 = vld [vmem:[#allocation98_spill] sm:$0xff]  ;;  %v4684_v60 = vmul.f32 0.020408163, %v4350_v30 }
 0x242   :  { %2511 = vperm.xlu0 %3194, %v1977_v31   ;;  %v3270_v7 = vpop.eup %3269  ;;  %v1595_v44 = vadd.f32 0.001, %v1523_v38  ;;  %6470 = vst [vmem:[#allocation92_spill] sm:$0xff] %v4660_v5  ;;  %v4670_v35 = vmul.f32 0.020408163, %v6472_v14  ;;  %v1741_v31 = vld [vmem:[%s6196_s3 + $0x1d8] sm:$0xff]  ;;  %v1480_v38 = vsub.f32 %v1336_v48, %v1408_v13  ;;  %v1444_v14 = vmul.f32 %v4649_v56, %v4649_v56 }
 0x243   :  { %v3272_v0 = vpop.eup %3271  ;;  %v4662_v47 = vmul.f32 %v3270_v7, %v1705_v9  ;;  %6471 = vst [vmem:[#allocation119_spill] sm:$0xff] %v4667_v4  ;;  %v1729_v7 = vld [vmem:[%s6196_s3 + $0x178] sm:$0xff]  ;;  %6475 = vst [vmem:[#allocation87_spill] sm:$0xff] %v4684_v60  ;;  %v6478_v30 = vld [vmem:[#allocation102_spill] sm:$0xff] }
 0x244   :  { %6473 = vst [vmem:[#allocation98_spill] sm:$0xff] %v4670_v35  ;;  %3285 = vrsqrt.f32 %v1595_v44  ;;  %v3274_v55 = vpop.eup %3273  ;;  %v6476_v44 = vld [vmem:[#allocation100_spill] sm:$0xff]  ;;  %v1335_v1 = vmul.f32 0.020408163, %v6478_v30  ;;  %v6479_v48 = vld [vmem:[#allocation99_spill] sm:$0xff]  ;;  %v4701_v50 = vmul.f32 %v3272_v0, %v1729_v7 }
 0x245   :  { %v4672_v10 = vpop.xlane.xlu0 %933  ;;  %v4674_v29 = vpop.xlane.xlu1 %936  ;;  %2064 = vperm.xlu1 %3193, %v6474_v45   ;;  %v1372_v19 = vmul.f32 0.020408163, %v6476_v44  ;;  %v4692_v9 = vmul.f32 %v4662_v47, %v4502_v12  ;;  %3287 = vrsqrt.f32 %v1553_v57  ;;  %v1517_v45 = vsub.f32 %v1373_v20, %v1445_v16  ;;  %v1691_v12 = vld [vmem:[%s6196_s3 + $0x48] sm:$0xff] }
 0x246   :  { %2501 = vperm.xlu0 %3194, %v1975_v43   ;;  %v3276_v40 = vpop.eup %3275  ;;  %v4698_v44 = vmul.f32 0.020408163, %v6479_v48  ;;  %v6481_v43 = vld [vmem:[#allocation104_spill] sm:$0xff]  ;;  %6482 = vst [vmem:[#allocation99_spill] sm:$0xff] %v4701_v50  ;;  %v4710_v57 = vmul.f32 %v4667_v4, %v4667_v4  ;;  %v1407_v20 = vmul.f32 %v4670_v35, %v4670_v35  ;;  %v4715_v16 = vmul.f32 0.020408163, %v4392_v27 }
 0x247   :  { %6477 = vst [vmem:[#allocation100_spill] sm:$0xff] %v4692_v9  ;;  %v3278_v13 = vpop.eup %3277  ;;  %v1371_v18 = vmul.f32 0.020408163, %v6481_v43  ;;  %v4706_v11 = vmul.f32 %v3276_v40, %v1741_v31  ;;  %v4722_v7 = vmul.f32 %v3274_v55, %v1690_v3  ;;  %v1703_v31 = vld [vmem:[%s6196_s3 + $0xa8] sm:$0xff]  ;;  %v1443_v48 = vmul.f32 %v4684_v60, %v4684_v60 }
 0x248   :  { %6480 = vst [vmem:[#allocation102_spill] sm:$0xff] %v4698_v44  ;;  %6483 = vst [vmem:[#allocation104_spill] sm:$0xff] %v4715_v16  ;;  %v3280_v40 = vpop.eup %3279  ;;  %v1552_v43 = vadd.f32 0.001, %v1480_v38  ;;  %v1516_v56 = vsub.f32 %v1372_v19, %v1444_v14  ;;  %v1479_v55 = vsub.f32 %v1335_v1, %v1407_v20  ;;  %v1341_v3 = vmul.f32 0.020408163, %v4428_v32 }
 0x249   :  { %v4717_v30 = vpop.xlane.xlu0 %819  ;;  %v4719_v0 = vpop.xlane.xlu1 %822  ;;  %2244 = vperm.xlu1 %3193, %v4627_v8   ;;  %v4732_v27 = vmul.f32 %v4706_v11, %v4535_v17  ;;  %v1589_v8 = vadd.f32 0.001, %v1517_v45  ;;  %v4735_v52 = vmul.f32 %v3278_v13, %v1691_v12  ;;  %v1727_v4 = vld [vmem:[%s6196_s3 + $0x168] sm:$0xff]  ;;  %v4742_v38 = vmul.f32 %v4698_v44, %v4698_v44  ;;  %v6485_v19 = vld [vmem:[#allocation101_spill] sm:$0xff] }
 0x24a   :  { %2099 = vperm.xlu0 %3194, %v4658_v26   ;;  %v3282_v9 = vpop.eup %3281  ;;  %v4745_v14 = vmul.f32 0.020408163, %v6485_v19  ;;  %v1515_v17 = vsub.f32 %v1371_v18, %v1443_v48  ;;  %v1739_v32 = vld [vmem:[%s6196_s3 + $0x1c8] sm:$0xff]  ;;  %v1413_v45 = vmul.f32 %v4715_v16, %v4715_v16  ;;  %v4757_v13 = vmul.f32 0.020408163, %v4402_v54 }
 0x24b   :  { %6484 = vst [vmem:[#allocation120_spill] sm:$0xff] %v4732_v27  ;;  %v4747_v27 = vmul.f32 %v3282_v9, %v1703_v31  ;;  %v4752_v1 = vpop.eup %3283  ;;  %v4760_v12 = vmul.f32 0.020408163, %v4632_v59  ;;  %v4763_v20 = vmul.f32 0.020408163, %v4634_v28  ;;  %v6487_v31 = vld [vmem:[#allocation85_spill] sm:$0xff]  ;;  %3289 = vrsqrt.f32 %v1552_v43 }
 0x24c   :  { %6486 = vst [vmem:[#allocation101_spill] sm:$0xff] %v4757_v13  ;;  %v4768_v48 = vadd.f32 0.001, %v1516_v56  ;;  %v4771_v19 = vmul.f32 %v3280_v40, %v1727_v4  ;;  %3291 = vrsqrt.f32 %v1589_v8  ;;  %v1551_v28 = vadd.f32 0.001, %v1479_v55  ;;  %v6490_v43 = vld [vmem:[#allocation103_spill] sm:$0xff] }
 0x24d   :  { %v928_v18 = vpop.xlane.xlu0 %927  ;;  %v4765_v9 = vpop.xlane.xlu1 %930  ;;  %2079 = vperm.xlu1 %3193, %v6487_v31   ;;  %v4775_v54 = vmul.f32 %v4747_v27, %v4554_v39  ;;  %v1485_v44 = vsub.f32 %v1341_v3, %v1413_v45  ;;  %v1377_v60 = vmul.f32 0.020408163, %v4435_v61  ;;  %v4781_v56 = vmul.f32 0.020408163, %v6490_v43  ;;  %v6491_v45 = vld [vmem:[#allocation88_spill] sm:$0xff] }
 0x24e   :  { %2279 = vperm.xlu0 %3194, %v4701_v50   ;;  %6488 = vst [vmem:[#allocation85_spill] sm:$0xff] %v4771_v19  ;;  %v3286_v59 = vpop.eup %3285  ;;  %v1587_v16 = vadd.f32 0.001, %v1515_v17  ;;  %v1449_v39 = vmul.f32 %v4757_v13, %v4757_v13  ;;  %v4788_v40 = vmul.f32 0.020408163, %v4412_v36  ;;  %v1420_v8 = vmul.f32 %v4760_v12, %v4760_v12  ;;  %v1697_v17 = vld [vmem:[%s6196_s3 + $0x78] sm:$0xff] }
 0x24f   :  { %6489 = vst [vmem:[#allocation121_spill] sm:$0xff] %v4775_v54  ;;  %v4783_v50 = vmul.f32 %v3286_v59, %v1739_v32  ;;  %v3288_v4 = vpop.eup %3287  ;;  %v1421_v61 = vmul.f32 %v4763_v20, %v4763_v20  ;;  %v4799_v32 = vmul.f32 0.020408163, %v4672_v10  ;;  %3293 = vrsqrt.f32 %v1551_v28 }
 0x250   :  { %v1557_v31 = vadd.f32 0.001, %v1485_v44  ;;  %v1521_v13 = vsub.f32 %v1377_v60, %v1449_v39  ;;  %v1339_v54 = vmul.f32 0.020408163, %v4445_v25  ;;  %v4810_v10 = vmul.f32 %v3288_v4, %v1697_v17 }
 0x251   :  { %v1186_v55 = vpop.xlane.xlu0 %1185  ;;  %v1189_v3 = vpop.xlane.xlu1 %1188  ;;  %2069 = vperm.xlu1 %3193, %v6491_v45   ;;  %v4804_v43 = vmul.f32 %v4783_v50, %v4590_v6  ;;  %v4807_v45 = vmul.f32 0.020408163, %v4674_v29  ;;  %3295 = vrsqrt.f32 %v1587_v16  ;;  %v4818_v6 = vmul.f32 0.020408163, %v4719_v0 }
 0x252   :  { %v1348_v59 = vmul.f32 0.020408163, %v1186_v55  ;;  %v1349_v36 = vmul.f32 0.020408163, %v1189_v3  ;;  %2089 = vperm.xlu0 %3194, %v4735_v52   ;;  %v1411_v55 = vmul.f32 %v4788_v40, %v4788_v40  ;;  %v4815_v3 = vmul.f32 0.020408163, %v4717_v30 }
 0x253   :  { %6492 = vst [vmem:[#allocation103_spill] sm:$0xff] %v4804_v43  ;;  %v6493_v29 = vsub.f32 %v4586_v23, %v4192_v49  ;;  %v1456_v25 = vmul.f32 %v4799_v32, %v4799_v32  ;;  %3297 = vrsqrt.f32 %v1557_v31  ;;  %v1593_v30 = vadd.f32 0.001, %v1521_v13 }
 0x254   :  { %v1492_v33 = vsub.f32 %v1348_v59, %v1420_v8  ;;  %v1493_v35 = vsub.f32 %v1349_v36, %v1421_v61  ;;  %v1457_v0 = vmul.f32 %v4807_v45, %v4807_v45  ;;  %v4831_v61 = vmul.f32 0.020408163, %v4422_v15  ;;  %v1733_v15 = vld [vmem:[%s6196_s3 + $0x198] sm:$0xff] }
 0x255   :  { %v1294_v60 = vpop.xlane.xlu0 %1293  ;;  %v1297_v44 = vpop.xlane.xlu1 %1296  ;;  %2506 = vperm.xlu1 %3193, %v6493_v29   ;;  %v1483_v49 = vsub.f32 %v1339_v54, %v1411_v55  ;;  %v6495_v36 = vsub.f32 %v4613_v58, %v6467_v62  ;;  %v1419_v54 = vmul.f32 %v4818_v6, %v4818_v6  ;;  %v4848_v29 = vmul.f32 0.020408163, %v4765_v9 }
 0x256   :  { %v1564_v28 = vadd.f32 0.001, %v1492_v33  ;;  %v1565_v16 = vadd.f32 0.001, %v1493_v35  ;;  %v1384_v4 = vmul.f32 0.020408163, %v1294_v60  ;;  %2269 = vperm.xlu0 %3194, %v4771_v19   ;;  %v4828_v8 = vpop.eup %3289  ;;  %v1418_v33 = vmul.f32 %v4815_v3, %v4815_v3 }
 0x257   :  { %v1385_v39 = vmul.f32 0.020408163, %v1297_v44  ;;  %6494 = vst [vmem:[#allocation88_spill] sm:$0xff] %v4831_v61  ;;  %v3292_v17 = vpop.eup %3291  ;;  %v4835_v35 = vmul.f32 0.020408163, %v928_v18 }
 0x258   :  { %3299 = vrsqrt.f32 %v1564_v28  ;;  %v1528_v23 = vsub.f32 %v1384_v4, %v1456_v25  ;;  %v1375_v18 = vmul.f32 0.020408163, %v4452_v42  ;;  %v4850_v28 = vmul.f32 %v3292_v17, %v1733_v15 }
 0x259   :  { %3301 = vrsqrt.f32 %v1565_v16  ;;  %v1529_v13 = vsub.f32 %v1385_v39, %v1457_v0  ;;  %v1180_v31 = vpop.xlane.xlu0 %1179  ;;  %v1183_v59 = vpop.xlane.xlu1 %1182  ;;  %2496 = vperm.xlu1 %3193, %v6495_v36   ;;  %v6497_v4 = vsub.f32 %v4745_v14, %v4710_v57  ;;  %v1514_v39 = vsub.f32 %v4781_v56, %v4742_v38  ;;  %v6498_v36 = vld [vmem:[#allocation105_spill] sm:$0xff] }
 0x25a   :  { %v1600_v55 = vadd.f32 0.001, %v1528_v23  ;;  %v1346_v60 = vmul.f32 0.020408163, %v1180_v31  ;;  %v1347_v44 = vmul.f32 0.020408163, %v1183_v59  ;;  %2119 = vperm.xlu0 %3194, %v4810_v10   ;;  %3303 = vrsqrt.f32 %v1593_v30  ;;  %v3294_v16 = vpop.eup %3293 }
 0x25b   :  { %v1601_v58 = vadd.f32 0.001, %v1529_v13  ;;  %6496 = vst [vmem:[#allocation122_spill] sm:$0xff] %v4850_v28  ;;  %v1550_v0 = vadd.f32 0.001, %v6497_v4  ;;  %v1447_v42 = vmul.f32 %v4831_v61, %v4831_v61  ;;  %v1695_v23 = vld [vmem:[%s6196_s3 + $0x68] sm:$0xff]  ;;  %v1454_v17 = vmul.f32 %v4835_v35, %v4835_v35  ;;  %v3296_v38 = vpop.eup %3295 }
 0x25c   :  { %3305 = vrsqrt.f32 %v1600_v55  ;;  %v1490_v62 = vsub.f32 %v1346_v60, %v1418_v33  ;;  %v1491_v25 = vsub.f32 %v1347_v44, %v1419_v54  ;;  %v1555_v56 = vadd.f32 0.001, %v1483_v49  ;;  %v1708_v60 = vld [vmem:[%s6196_s3 + $0xd0] sm:$0xff]  ;;  %v1709_v4 = vld [vmem:[%s6196_s3 + $0xd8] sm:$0xff] }
 0x25d   :  { %3307 = vrsqrt.f32 %v1601_v58  ;;  %v1288_v9 = vpop.xlane.xlu0 %1287  ;;  %v1291_v30 = vpop.xlane.xlu1 %1290  ;;  %2094 = vperm.xlu1 %3193, %v4653_v2   ;;  %v1519_v13 = vsub.f32 %v1375_v18, %v1447_v42  ;;  %v1455_v31 = vmul.f32 %v4848_v29, %v4848_v29  ;;  %v4869_v15 = vmul.f32 0.020408163, %v6498_v36  ;;  %v1745_v36 = vld [vmem:[%s6196_s3 + $0x1f8] sm:$0xff] }
 0x25e   :  { %v1562_v57 = vadd.f32 0.001, %v1490_v62  ;;  %v1563_v14 = vadd.f32 0.001, %v1491_v25  ;;  %v1382_v33 = vmul.f32 0.020408163, %v1288_v9  ;;  %2299 = vperm.xlu0 %3194, %v4850_v28   ;;  %v4871_v55 = vmul.f32 %v3294_v16, %v1695_v23  ;;  %v3298_v44 = vpop.eup %3297 }
 0x25f   :  { %v1383_v59 = vmul.f32 0.020408163, %v1291_v30  ;;  %6499 = vst [vmem:[#allocation105_spill] sm:$0xff] %v4869_v15  ;;  %v1586_v58 = vadd.f32 0.001, %v1514_v39  ;;  %v1731_v16 = vld [vmem:[%s6196_s3 + $0x188] sm:$0xff] }
 0x260   :  { %3309 = vrsqrt.f32 %v1562_v57  ;;  %v1526_v54 = vsub.f32 %v1382_v33, %v1454_v17  ;;  %v4877_v49 = vmul.f32 0.020408163, %v4400_v53  ;;  %v1340_v53 = vmul.f32 0.020408163, %v4426_v63  ;;  %v1726_v63 = vld [vmem:[%s6196_s3 + $0x160] sm:$0xff] }
 0x261   :  { %3311 = vrsqrt.f32 %v1563_v14  ;;  %v1527_v18 = vsub.f32 %v1383_v59, %v1455_v31  ;;  %v4879_v62 = vpop.xlane.xlu0 %837  ;;  %v4881_v25 = vpop.xlane.xlu1 %840  ;;  %2274 = vperm.xlu1 %3193, %v4660_v5   ;;  %v1376_v42 = vmul.f32 0.020408163, %v4433_v34  ;;  %v1591_v23 = vadd.f32 0.001, %v1519_v13 }
 0x262   :  { %6500 = vst [vmem:[#allocation123_spill] sm:$0xff] %v4877_v49  ;;  %v3300_v39 = vpop.eup %3299  ;;  %3313 = vrsqrt.f32 %v4768_v48  ;;  %v1598_v9 = vadd.f32 0.001, %v1526_v54  ;;  %2109 = vperm.xlu0 %3194, %v4871_v55   ;;  %v1412_v14 = vmul.f32 %v4869_v15, %v4869_v15  ;;  %v4898_v33 = vmul.f32 %v3296_v38, %v1731_v16  ;;  %v1744_v48 = vld [vmem:[%s6196_s3 + $0x1f0] sm:$0xff]  ;;  %v1701_v38 = vld [vmem:[%s6196_s3 + $0x98] sm:$0xff] }
 0x263   :  { %v3302_v30 = vpop.eup %3301  ;;  %3315 = vrsqrt.f32 %v1555_v56  ;;  %v1599_v17 = vadd.f32 0.001, %v1527_v18  ;;  %v4894_v57 = vmul.f32 %v3300_v39, %v1708_v60  ;;  %v1448_v13 = vmul.f32 %v4877_v49, %v4877_v49  ;;  %v6503_v18 = vld [vmem:[#allocation106_spill] sm:$0xff] }
 0x264   :  { %3317 = vrsqrt.f32 %v1598_v9  ;;  %6501 = vst [vmem:[#allocation124_spill] sm:$0xff] %v4898_v33  ;;  %v4903_v34 = vmul.f32 %v3302_v30, %v1709_v4  ;;  %v3304_v56 = vpop.eup %3303  ;;  %v4926_v16 = vmul.f32 0.020408163, %v6503_v18  ;;  %v1484_v4 = vsub.f32 %v1340_v53, %v1412_v14  ;;  %v1696_v53 = vld [vmem:[%s6196_s3 + $0x70] sm:$0xff] }
 0x265   :  { %3319 = vrsqrt.f32 %v1599_v17  ;;  %v4910_v31 = vpop.xlane.xlu0 %945  ;;  %v4912_v59 = vpop.xlane.xlu1 %948  ;;  %2084 = vperm.xlu1 %3193, %v4722_v7   ;;  %v4923_v54 = vmul.f32 %v4894_v57, %v4760_v12  ;;  %v1520_v30 = vsub.f32 %v1376_v42, %v1448_v13  ;;  %v4934_v17 = vmul.f32 %v4752_v1, %v1726_v63 }
 0x266   :  { %v3306_v60 = vpop.eup %3305  ;;  %3321 = vrsqrt.f32 %v1550_v0  ;;  %2289 = vperm.xlu0 %3194, %v4898_v33   ;;  %v4931_v39 = vmul.f32 %v4903_v34, %v4763_v20  ;;  %v1338_v0 = vmul.f32 0.020408163, %v4443_v37  ;;  %v4939_v18 = vmul.f32 %v3298_v44, %v1701_v38  ;;  %v1706_v20 = vld [vmem:[%s6196_s3 + $0xc0] sm:$0xff]  ;;  %v1737_v37 = vld [vmem:[%s6196_s3 + $0x1b8] sm:$0xff]  ;;  %v1707_v44 = vld [vmem:[%s6196_s3 + $0xc8] sm:$0xff] }
 0x267   :  { %6502 = vst [vmem:[#allocation125_spill] sm:$0xff] %v4923_v54  ;;  %v3308_v9 = vpop.eup %3307  ;;  %3323 = vrsqrt.f32 %v1591_v23  ;;  %6505 = vst [vmem:[#allocation126_spill] sm:$0xff] %v4934_v17  ;;  %v4936_v12 = vmul.f32 %v3306_v60, %v1744_v48  ;;  %v1410_v63 = vmul.f32 %v4926_v16, %v4926_v16  ;;  %v6507_v48 = vld [vmem:[#allocation107_spill] sm:$0xff]  ;;  %v1556_v38 = vadd.f32 0.001, %v1484_v4  ;;  %v6510_v4 = vld [vmem:[#allocation108_spill] sm:$0xff] }
 0x268   :  { %6504 = vst [vmem:[#allocation106_spill] sm:$0xff] %v4931_v39  ;;  %3325 = vrsqrt.f32 %v1586_v58  ;;  %v4944_v14 = vmul.f32 %v3308_v9, %v1745_v36  ;;  %v4967_v13 = vmul.f32 0.020408163, %v6507_v48  ;;  %v1592_v9 = vadd.f32 0.001, %v1520_v30 }
 0x269   :  { %v4949_v42 = vpop.xlane.xlu0 %831  ;;  %v4951_v1 = vpop.xlane.xlu1 %834  ;;  %2264 = vperm.xlu1 %3193, %v4934_v17   ;;  %v4962_v58 = vmul.f32 %v4936_v12, %v4799_v32  ;;  %v4975_v49 = vmul.f32 %v4828_v8, %v1696_v53  ;;  %v1732_v32 = vld [vmem:[%s6196_s3 + $0x190] sm:$0xff]  ;;  %v1482_v43 = vsub.f32 %v1338_v0, %v1410_v63  ;;  %v1374_v5 = vmul.f32 0.020408163, %v6510_v4  ;;  %v1743_v8 = vld [vmem:[%s6196_s3 + $0x1e8] sm:$0xff]  ;;  %v1742_v53 = vld [vmem:[%s6196_s3 + $0x1e0] sm:$0xff] }
 0x26a   :  { %v3310_v23 = vpop.eup %3309  ;;  %6508 = vst [vmem:[#allocation107_spill] sm:$0xff] %v4967_v13  ;;  %2139 = vperm.xlu0 %3194, %v4939_v18   ;;  %v4972_v36 = vmul.f32 %v4944_v14, %v4807_v45  ;;  %v4983_v17 = vmul.f32 %v3304_v56, %v1737_v37  ;;  %v1699_v45 = vld [vmem:[%s6196_s3 + $0x88] sm:$0xff]  ;;  %v6512_v0 = vld [vmem:[#allocation109_spill] sm:$0xff]  ;;  %v5000_v56 = vmul.f32 0.020408163, %v4879_v62  ;;  %3327 = vrsqrt.f32 %v1556_v38  ;;  %v1694_v38 = vld [vmem:[%s6196_s3 + $0x60] sm:$0xff] }
 0x26b   :  { %6506 = vst [vmem:[#allocation127_spill] sm:$0xff] %v4962_v58  ;;  %v3312_v60 = vpop.eup %3311  ;;  %v4980_v58 = vmul.f32 %v3310_v23, %v1706_v20  ;;  %v4997_v23 = vmul.f32 0.020408163, %v6512_v0  ;;  %v5003_v37 = vmul.f32 0.020408163, %v4881_v25  ;;  %v1446_v0 = vmul.f32 %v4967_v13, %v4967_v13 }
 0x26c   :  { %6509 = vst [vmem:[#allocation128_spill] sm:$0xff] %v4972_v36  ;;  %v3314_v48 = vpop.eup %3313  ;;  %6511 = vst [vmem:[#allocation108_spill] sm:$0xff] %v4983_v17  ;;  %v4988_v30 = vmul.f32 %v3312_v60, %v1707_v44  ;;  %3329 = vrsqrt.f32 %v1592_v9  ;;  %v1344_v36 = vmul.f32 0.020408163, %v4518_v51  ;;  %v1554_v33 = vadd.f32 0.001, %v1482_v43 }
 0x26d   :  { %v3316_v20 = vpop.eup %3315  ;;  %6513 = vst [vmem:[#allocation109_spill] sm:$0xff] %v4997_v23  ;;  %v5005_v44 = vpop.xlane.xlu0 %939  ;;  %2114 = vperm.xlu1 %3193, %v4975_v49   ;;  %v5012_v60 = vmul.f32 %v4980_v58, %v4815_v3  ;;  %v5022_v61 = vmul.f32 %v3314_v48, %v1732_v32  ;;  %v1518_v19 = vsub.f32 %v1374_v5, %v1446_v0  ;;  %v1735_v48 = vld [vmem:[%s6196_s3 + $0x1a8] sm:$0xff] }
 0x26e   :  { %v5007_v63 = vpop.xlane.xlu1 %942  ;;  %v3318_v4 = vpop.eup %3317  ;;  %2319 = vperm.xlu0 %3194, %v4983_v17   ;;  %v5019_v62 = vmul.f32 %v4988_v30, %v4818_v6  ;;  %v5026_v54 = vmul.f32 %v3316_v20, %v1699_v45  ;;  %v1416_v9 = vmul.f32 %v4997_v23, %v4997_v23  ;;  %v1424_v51 = vmul.f32 %v5000_v56, %v5000_v56  ;;  %v1730_v45 = vld [vmem:[%s6196_s3 + $0x180] sm:$0xff] }
 0x26f   :  { %6514 = vst [vmem:[#allocation129_spill] sm:$0xff] %v5012_v60  ;;  %v3320_v25 = vpop.eup %3319  ;;  %6515 = vst [vmem:[#allocation130_spill] sm:$0xff] %v5022_v61  ;;  %v5024_v28 = vmul.f32 %v3318_v4, %v1742_v53  ;;  %v1425_v32 = vmul.f32 %v5003_v37, %v5003_v37  ;;  %v5051_v20 = vmul.f32 0.020408163, %v4910_v31  ;;  %v5062_v23 = vmul.f32 0.020408163, %v4912_v59 }
 0x270   :  { %v3322_v3 = vpop.eup %3321  ;;  %v5031_v13 = vmul.f32 %v3320_v25, %v1743_v8  ;;  %v1488_v60 = vsub.f32 %v1344_v36, %v1416_v9  ;;  %3331 = vrsqrt.f32 %v1554_v33 }
 0x271   :  { %v3324_v6 = vpop.eup %3323  ;;  %v1198_v43 = vpop.xlane.xlu0 %1197  ;;  %2294 = vperm.xlu1 %3193, %v5022_v61   ;;  %v5048_v8 = vmul.f32 %v5024_v28, %v4835_v35  ;;  %v6518_v61 = vld [vmem:[#allocation111_spill] sm:$0xff]  ;;  %v5064_v35 = vmul.f32 %v3322_v3, %v1694_v38  ;;  %v1460_v59 = vmul.f32 %v5051_v20, %v5051_v20 }
 0x272   :  { %v1201_v5 = vpop.xlane.xlu1 %1200  ;;  %v3326_v53 = vpop.eup %3325  ;;  %v1352_v4 = vmul.f32 0.020408163, %v1198_v43  ;;  %2129 = vperm.xlu0 %3194, %v5026_v54   ;;  %v5056_v25 = vmul.f32 %v5031_v13, %v4848_v29  ;;  %v5059_v17 = vmul.f32 0.020408163, %v6518_v61  ;;  %v5066_v39 = vmul.f32 %v3324_v6, %v1735_v48 }
 0x273   :  { %6516 = vst [vmem:[#allocation131_spill] sm:$0xff] %v5048_v8  ;;  %v1353_v0 = vmul.f32 0.020408163, %v1201_v5  ;;  %v1590_v43 = vadd.f32 0.001, %v1518_v19  ;;  %v5070_v61 = vmul.f32 %v3326_v53, %v1730_v45 }
 0x274   :  { %6517 = vst [vmem:[#allocation132_spill] sm:$0xff] %v5056_v25  ;;  %6519 = vst [vmem:[#allocation111_spill] sm:$0xff] %v5059_v17  ;;  %v1496_v8 = vsub.f32 %v1352_v4, %v1424_v51  ;;  %v1380_v5 = vmul.f32 0.020408163, %v4545_v46  ;;  %v1452_v33 = vmul.f32 %v5059_v17, %v5059_v17  ;;  %v1560_v19 = vadd.f32 0.001, %v1488_v60  ;;  %v3328_v9 = vpop.eup %3327 }
 0x275   :  { %v1497_v31 = vsub.f32 %v1353_v0, %v1425_v32  ;;  %v1306_v15 = vpop.xlane.xlu0 %1305  ;;  %2104 = vperm.xlu1 %3193, %v5064_v35   ;;  %v1461_v46 = vmul.f32 %v5062_v23, %v5062_v23  ;;  %v5080_v51 = vmul.f32 0.020408163, %v4479_v24  ;;  %v1342_v24 = vmul.f32 0.020408163, %v4569_v22  ;;  %v1736_v22 = vld [vmem:[%s6196_s3 + $0x1b0] sm:$0xff] }
 0x276   :  { %v1309_v29 = vpop.xlane.xlu1 %1308  ;;  %v1568_v36 = vadd.f32 0.001, %v1496_v8  ;;  %v1388_v38 = vmul.f32 0.020408163, %v1306_v15  ;;  %2309 = vperm.xlu0 %3194, %v5066_v39   ;;  %v1700_v15 = vld [vmem:[%s6196_s3 + $0x90] sm:$0xff]  ;;  %v3330_v48 = vpop.eup %3329  ;;  %v1524_v45 = vsub.f32 %v1380_v5, %v1452_v33 }
 0x277   :  { %v1569_v3 = vadd.f32 0.001, %v1497_v31  ;;  %v1389_v6 = vmul.f32 0.020408163, %v1309_v29  ;;  %v5092_v4 = vmul.f32 0.020408163, %v5005_v44  ;;  %v5098_v29 = vmul.f32 %v3328_v9, %v1700_v15 }
 0x278   :  { %3333 = vrsqrt.f32 %v1568_v36  ;;  %v1532_v32 = vsub.f32 %v1388_v38, %v1460_v59  ;;  %v5096_v31 = vmul.f32 0.020408163, %v5007_v63  ;;  %v1414_v59 = vmul.f32 %v5080_v51, %v5080_v51  ;;  %v1712_v15 = vld [vmem:[%s6196_s3 + $0xf0] sm:$0xff] }
 0x279   :  { %3335 = vrsqrt.f32 %v1569_v3  ;;  %v1533_v8 = vsub.f32 %v1389_v6, %v1461_v46  ;;  %v5085_v53 = vpop.xlane.xlu0 %1191  ;;  %2284 = vperm.xlu1 %3193, %v5070_v61   ;;  %v1596_v44 = vadd.f32 0.001, %v1524_v45  ;;  %v1378_v3 = vmul.f32 0.020408163, %v4596_v41  ;;  %v1698_v41 = vld [vmem:[%s6196_s3 + $0x80] sm:$0xff] }
 0x27a   :  { %v5087_v60 = vpop.xlane.xlu1 %1194  ;;  %3337 = vrsqrt.f32 %v1590_v43  ;;  %v1604_v0 = vadd.f32 0.001, %v1532_v32  ;;  %2159 = vperm.xlu0 %3194, %v4662_v47   ;;  %v5103_v43 = vmul.f32 0.020408163, %v4494_v21  ;;  %v1486_v63 = vsub.f32 %v1342_v24, %v1414_v59  ;;  %v3332_v21 = vpop.eup %3331 }
 0x27b   :  { %3339 = vrsqrt.f32 %v1560_v19  ;;  %v1605_v5 = vadd.f32 0.001, %v1533_v8  ;;  %v1458_v38 = vmul.f32 %v5092_v4, %v5092_v4  ;;  %v1459_v19 = vmul.f32 %v5096_v31, %v5096_v31 }
 0x27c   :  { %6520 = vst [vmem:[#allocation133_spill] sm:$0xff] %v5103_v43  ;;  %3341 = vrsqrt.f32 %v1604_v0  ;;  %v5115_v6 = vmul.f32 %v3330_v48, %v1736_v22  ;;  %v1450_v9 = vmul.f32 %v5103_v43, %v5103_v43  ;;  %v1713_v48 = vld [vmem:[%s6196_s3 + $0xf8] sm:$0xff]  ;;  %v1558_v0 = vadd.f32 0.001, %v1486_v63 }
 0x27d   :  { %3343 = vrsqrt.f32 %v1605_v5  ;;  %v1300_v47 = vpop.xlane.xlu0 %1299  ;;  %2134 = vperm.xlu1 %3193, %v5098_v29  }
 0x27e   :  { %v1303_v36 = vpop.xlane.xlu1 %1302  ;;  %v1386_v33 = vmul.f32 0.020408163, %v1300_v47  ;;  %2339 = vperm.xlu0 %3194, %v4706_v11   ;;  %6521 = vst [vmem:[#allocation134_spill] sm:$0xff] %v5115_v6  ;;  %3345 = vrsqrt.f32 %v1596_v44  ;;  %v1522_v5 = vsub.f32 %v1378_v3, %v1450_v9  ;;  %v1748_v44 = vld [vmem:[%s6196_s3 + $0x210] sm:$0xff]  ;;  %v1749_v9 = vld [vmem:[%s6196_s3 + $0x218] sm:$0xff] }
 0x27f   :  { %v1387_v46 = vmul.f32 0.020408163, %v1303_v36  ;;  %v5130_v36 = vmul.f32 %v3332_v21, %v1698_v41 }
 0x280   :  { %v1530_v32 = vsub.f32 %v1386_v33, %v1458_v38 }
 0x281   :  { %v1531_v11 = vsub.f32 %v1387_v46, %v1459_v19  ;;  %v850_v45 = vpop.xlane.xlu0 %849  ;;  %2314 = vperm.xlu1 %3193, %v5115_v6   ;;  %v1734_v19 = vld [vmem:[%s6196_s3 + $0x1a0] sm:$0xff] }
 0x282   :  { %v853_v8 = vpop.xlane.xlu1 %852  ;;  %v3334_v24 = vpop.eup %3333  ;;  %v1602_v59 = vadd.f32 0.001, %v1530_v32  ;;  %2149 = vperm.xlu0 %3194, %v4747_v27   ;;  %v5143_v27 = vmul.f32 0.020408163, %v4951_v1 }
 0x283   :  { %v3336_v22 = vpop.eup %3335  ;;  %v1603_v47 = vadd.f32 0.001, %v1531_v11  ;;  %v5132_v38 = vmul.f32 %v3334_v24, %v1712_v15  ;;  %v1594_v15 = vadd.f32 0.001, %v1522_v5 }
 0x284   :  { %v3338_v33 = vpop.eup %3337  ;;  %3347 = vrsqrt.f32 %v1602_v59  ;;  %v5137_v46 = vmul.f32 %v3336_v22, %v1713_v48  ;;  %v1351_v48 = vmul.f32 0.020408163, %v5087_v60 }
 0x285   :  { %v3340_v63 = vpop.eup %3339  ;;  %3349 = vrsqrt.f32 %v1603_v47  ;;  %v958_v3 = vpop.xlane.xlu0 %957  ;;  %2124 = vperm.xlu1 %3193, %v5130_v36   ;;  %v5151_v32 = vmul.f32 %v5132_v38, %v5000_v56  ;;  %v5159_v24 = vmul.f32 %v3338_v33, %v1734_v19  ;;  %v1704_v56 = vld [vmem:[%s6196_s3 + $0xb0] sm:$0xff] }
 0x286   :  { %v961_v21 = vpop.xlane.xlu1 %960  ;;  %v3342_v41 = vpop.eup %3341  ;;  %3351 = vrsqrt.f32 %v1558_v0  ;;  %2329 = vperm.xlu0 %3194, %v4783_v50   ;;  %v5156_v1 = vmul.f32 %v5137_v46, %v5003_v37  ;;  %v1423_v50 = vmul.f32 %v5143_v27, %v5143_v27  ;;  %v5182_v33 = vmul.f32 %v3340_v63, %v1704_v56  ;;  %v1747_v63 = vld [vmem:[%s6196_s3 + $0x208] sm:$0xff] }
 0x287   :  { %v3344_v11 = vpop.eup %3343  ;;  %v5161_v59 = vmul.f32 %v3342_v41, %v1748_v44  ;;  %3353 = vrsqrt.f32 %v1594_v15  ;;  %v1740_v44 = vld [vmem:[%s6196_s3 + $0x1d0] sm:$0xff]  ;;  %v5192_v41 = vmul.f32 0.020408163, %v853_v8  ;;  %v1702_v8 = vld [vmem:[%s6196_s3 + $0xa0] sm:$0xff] }
 0x288   :  { %v5166_v22 = vmul.f32 %v3344_v11, %v1749_v9  ;;  %v1495_v47 = vsub.f32 %v1351_v48, %v1423_v50  ;;  %v3346_v19 = vpop.eup %3345  ;;  %v5190_v9 = vmul.f32 0.020408163, %v850_v45 }
 0x289   :  { %v5170_v0 = vpop.xlane.xlu0 %843  ;;  %2304 = vperm.xlu1 %3193, %v5159_v24   ;;  %v5175_v60 = vmul.f32 %v5161_v59, %v5051_v20  ;;  %v1746_v20 = vld [vmem:[%s6196_s3 + $0x200] sm:$0xff]  ;;  %v5199_v56 = vmul.f32 %v3346_v19, %v1740_v44  ;;  %v1429_v17 = vmul.f32 %v5192_v41, %v5192_v41  ;;  %v5217_v44 = vmul.f32 0.020408163, %v958_v3 }
 0x28a   :  { %v847_v37 = vpop.xlane.xlu1 %846  ;;  %2179 = vperm.xlu0 %3194, %v4903_v34   ;;  %v5180_v5 = vmul.f32 %v5166_v22, %v5062_v23  ;;  %v1567_v48 = vadd.f32 0.001, %v1495_v47 }
 0x28b   :  { %6522 = vst [vmem:[#allocation135_spill] sm:$0xff] %v5175_v60  ;;  %6524 = vst [vmem:[#allocation137_spill] sm:$0xff] %v5199_v56  ;;  %v5231_v3 = vmul.f32 0.020408163, %v847_v37  ;;  %v5242_v37 = vmul.f32 0.020408163, %v4949_v42 }
 0x28c   :  { %6523 = vst [vmem:[#allocation136_spill] sm:$0xff] %v5180_v5  ;;  %v1428_v5 = vmul.f32 %v5190_v9, %v5190_v9  ;;  %3355 = vrsqrt.f32 %v1567_v48 }
 0x28d   :  { %v952_v34 = vpop.xlane.xlu0 %951  ;;  %2154 = vperm.xlu1 %3193, %v5182_v33  }
 0x28e   :  { %v955_v23 = vpop.xlane.xlu1 %954  ;;  %v3348_v15 = vpop.eup %3347  ;;  %2359 = vperm.xlu0 %3194, %v4944_v14  }
 0x28f   :  { %v3350_v11 = vpop.eup %3349  ;;  %v5201_v50 = vmul.f32 %v3348_v15, %v1746_v20  ;;  %v5251_v42 = vmul.f32 0.020408163, %v955_v23 }
 0x290   :  { %v3352_v45 = vpop.eup %3351  ;;  %v5206_v60 = vmul.f32 %v3350_v11, %v1747_v63  ;;  %v5224_v11 = vmul.f32 0.020408163, %v961_v21 }
 0x291   :  { %v1210_v14 = vpop.xlane.xlu0 %1209  ;;  %2334 = vperm.xlu1 %3193, %v5199_v56   ;;  %v5215_v19 = vmul.f32 %v5201_v50, %v5092_v4  ;;  %v5226_v43 = vmul.f32 %v3352_v45, %v1702_v8  ;;  %v3354_v56 = vpop.eup %3353  ;;  %v1738_v4 = vld [vmem:[%s6196_s3 + $0x1c0] sm:$0xff] }
 0x292   :  { %v1213_v47 = vpop.xlane.xlu1 %1212  ;;  %v1356_v20 = vmul.f32 0.020408163, %v1210_v14  ;;  %2169 = vperm.xlu0 %3194, %v4988_v30   ;;  %v5222_v63 = vmul.f32 %v5206_v60, %v5096_v31  ;;  %v1464_v31 = vmul.f32 %v5217_v44, %v5217_v44  ;;  %v5239_v8 = vmul.f32 %v3354_v56, %v1738_v4 }
 0x293   :  { %v1357_v15 = vmul.f32 0.020408163, %v1213_v47 }
 0x294   :  { %v1500_v6 = vsub.f32 %v1356_v20, %v1428_v5  ;;  %v1350_v20 = vmul.f32 0.020408163, %v5085_v53  ;;  %v1422_v53 = vmul.f32 %v5242_v37, %v5242_v37 }
 0x295   :  { %v1501_v25 = vsub.f32 %v1357_v15, %v1429_v17  ;;  %v1318_v14 = vpop.xlane.xlu0 %1317  ;;  %2144 = vperm.xlu1 %3193, %v5226_v43   ;;  %v1465_v17 = vmul.f32 %v5224_v11, %v5224_v11 }
 0x296   :  { %v1321_v30 = vpop.xlane.xlu1 %1320  ;;  %v1572_v21 = vadd.f32 0.001, %v1500_v6  ;;  %v1392_v45 = vmul.f32 0.020408163, %v1318_v14  ;;  %2349 = vperm.xlu0 %3194, %v5031_v13   ;;  %v1427_v13 = vmul.f32 %v5231_v3, %v5231_v3  ;;  %v5248_v14 = vmul.f32 0.020408163, %v952_v34 }
 0x297   :  { %v1573_v48 = vadd.f32 0.001, %v1501_v25  ;;  %v1393_v5 = vmul.f32 0.020408163, %v1321_v30  ;;  %v1711_v34 = vld [vmem:[%s6196_s3 + $0xe8] sm:$0xff] }
 0x298   :  { %3357 = vrsqrt.f32 %v1572_v21  ;;  %v1536_v47 = vsub.f32 %v1392_v45, %v1464_v31  ;;  %v3356_v21 = vpop.eup %3355 }
 0x299   :  { %3359 = vrsqrt.f32 %v1573_v48  ;;  %v1537_v15 = vsub.f32 %v1393_v5, %v1465_v17  ;;  %v1204_v6 = vpop.xlane.xlu0 %1203  ;;  %2324 = vperm.xlu1 %3193, %v5239_v8   ;;  %v1494_v17 = vsub.f32 %v1350_v20, %v1422_v53  ;;  %v1463_v5 = vmul.f32 %v5251_v42, %v5251_v42 }
 0x29a   :  { %v1207_v25 = vpop.xlane.xlu1 %1206  ;;  %v1608_v56 = vadd.f32 0.001, %v1536_v47  ;;  %2199 = vperm.xlu0 %3194, %v5137_v46   ;;  %v1462_v46 = vmul.f32 %v5248_v14, %v5248_v14 }
 0x29b   :  { %v1355_v4 = vmul.f32 0.020408163, %v1207_v25  ;;  %v1609_v30 = vadd.f32 0.001, %v1537_v15 }
 0x29c   :  { %3361 = vrsqrt.f32 %v1608_v56 }
 0x29d   :  { %v1499_v31 = vsub.f32 %v1355_v4, %v1427_v13  ;;  %3363 = vrsqrt.f32 %v1609_v30  ;;  %v1312_v48 = vpop.xlane.xlu0 %1311  ;;  %2174 = vperm.xlu1 %3193, %v4894_v57   ;;  %v5264_v13 = vmul.f32 %v3356_v21, %v1711_v34  ;;  %v1716_v57 = vld [vmem:[%s6196_s3 + $0x110] sm:$0xff]  ;;  %v1566_v30 = vadd.f32 0.001, %v1494_v17  ;;  %v1753_v17 = vld [vmem:[%s6196_s3 + $0x238] sm:$0xff] }
 0x29e   :  { %v1315_v45 = vpop.xlane.xlu1 %1314  ;;  %v1390_v23 = vmul.f32 0.020408163, %v1312_v48  ;;  %2379 = vperm.xlu0 %3194, %v5166_v22   ;;  %v1717_v22 = vld [vmem:[%s6196_s3 + $0x118] sm:$0xff] }
 0x29f   :  { %v1571_v47 = vadd.f32 0.001, %v1499_v31  ;;  %v1391_v15 = vmul.f32 0.020408163, %v1315_v45 }
 0x2a0   :  { %v1534_v25 = vsub.f32 %v1390_v23, %v1462_v46 }
 0x2a1   :  { %v1535_v56 = vsub.f32 %v1391_v15, %v1463_v5  ;;  %2354 = vperm.xlu1 %3193, %v4936_v12   ;;  %3365 = vrsqrt.f32 %v1571_v47  ;;  %v1752_v12 = vld [vmem:[%s6196_s3 + $0x230] sm:$0xff] }
 0x2a2   :  { %v2055_v20 = vpop.permute.xlu1 %2054  ;;  %v3358_v4 = vpop.eup %3357  ;;  %v1606_v53 = vadd.f32 0.001, %v1534_v25  ;;  %2189 = vperm.xlu0 %3194, %v5264_v13  }
 0x2a3   :  { %v3360_v31 = vpop.eup %3359  ;;  %v1607_v21 = vadd.f32 0.001, %v1535_v56  ;;  %v5274_v48 = vmul.f32 %v3358_v4, %v1716_v57  ;;  %v1750_v4 = vld [vmem:[%s6196_s3 + $0x220] sm:$0xff] }
 0x2a4   :  { %3367 = vrsqrt.f32 %v1606_v53  ;;  %v1789_v45 = vmul.f32 %v3360_v31, %v1717_v22 }
 0x2a5   :  { %3369 = vrsqrt.f32 %v1607_v21  ;;  %v2045_v34 = vpop.permute.xlu0 %2044  ;;  %2164 = vperm.xlu1 %3193, %v4980_v58   ;;  %v5287_v23 = vmul.f32 %v5274_v48, %v5190_v9  ;;  %v5296_v58 = vmul.f32 0.020408163, %v5170_v0 }
 0x2a6   :  { %v5280_v46 = vpop.permute.xlu1 %2234  ;;  %v3362_v5 = vpop.eup %3361  ;;  %3371 = vrsqrt.f32 %v1566_v30  ;;  %2369 = vperm.xlu0 %3194, %v5206_v60   ;;  %v5291_v47 = vmul.f32 %v1789_v45, %v5192_v41  ;;  %v1354_v60 = vmul.f32 0.020408163, %v1204_v6 }
 0x2a7   :  { %6525 = vst [vmem:[#allocation138_spill] sm:$0xff] %v5280_v46  ;;  %v3364_v15 = vpop.eup %3363  ;;  %v5293_v25 = vmul.f32 %v3362_v5, %v1752_v12  ;;  %v1426_v0 = vmul.f32 %v5296_v58, %v5296_v58 }
 0x2a8   :  { %v1825_v57 = vmul.f32 %v3364_v15, %v1753_v17  ;;  %v6528_v17 = vld [vmem:[#allocation6_spill] sm:$0xff] }
 0x2a9   :  { %v5298_v56 = vpop.permute.xlu0 %2239  ;;  %2344 = vperm.xlu1 %3193, %v5024_v28   ;;  %v5305_v22 = vmul.f32 %v5293_v25, %v5217_v44  ;;  %v1715_v44 = vld [vmem:[%s6196_s3 + $0x108] sm:$0xff]  ;;  %v1498_v31 = vsub.f32 %v1354_v60, %v1426_v0 }
 0x2aa   :  { %6526 = vst [vmem:[#allocation139_spill] sm:$0xff] %v5298_v56  ;;  %v5301_v9 = vpop.permute.xlu1 %2224  ;;  %2219 = vperm.xlu0 %3194, %v1789_v45   ;;  %v5308_v41 = vmul.f32 %v1825_v57, %v5224_v11  ;;  %v1751_v11 = vld [vmem:[%s6196_s3 + $0x228] sm:$0xff] }
 0x2ab   :  { %6527 = vst [vmem:[#allocation140_spill] sm:$0xff] %v5301_v9  ;;  %v3366_v30 = vpop.eup %3365  ;;  %v1570_v60 = vadd.f32 0.001, %v1498_v31 }
 0x2ac   :  { %v5327_v15 = vmul.f32 %v3366_v30, %v1715_v44 }
 0x2ad   :  { %v5315_v28 = vpop.permute.xlu0 %2229  ;;  %2194 = vperm.xlu1 %3193, %v5132_v38   ;;  %v1710_v38 = vld [vmem:[%s6196_s3 + $0xe0] sm:$0xff]  ;;  %3373 = vrsqrt.f32 %v1570_v60 }
 0x2ae   :  { %v2060_v53 = vpop.permute.xlu1 %2059  ;;  %v3368_v6 = vpop.eup %3367  ;;  %2399 = vperm.xlu0 %3194, %v1825_v57  }
 0x2af   :  { %v3370_v21 = vpop.eup %3369  ;;  %v5324_v45 = vmul.f32 %v3368_v6, %v1750_v4  ;;  %v2405_v5 = vmul.f32 %v6528_v17, %v2060_v53  ;;  %v6529_v53 = vld [vmem:[#allocation2_spill] sm:$0xff] }
 0x2b0   :  { %v3372_v12 = vpop.eup %3371  ;;  %v1823_v46 = vmul.f32 %v3370_v21, %v1751_v11  ;;  %v2404_v44 = vmul.f32 %v6529_v53, %v2055_v20  ;;  %v6534_v53 = vld [vmem:[#allocation98_spill] sm:$0xff] }
 0x2b1   :  { %v2492_v9 = vpop.permute.xlu0 %2491  ;;  %2374 = vperm.xlu1 %3193, %v5161_v59   ;;  %v5335_v57 = vmul.f32 %v5324_v45, %v5248_v14  ;;  %v5341_v30 = vmul.f32 %v3372_v12, %v1710_v38  ;;  %v6530_v59 = vld [vmem:[#allocation8_spill] sm:$0xff] }
 0x2b2   :  { %v2050_v56 = vpop.permute.xlu1 %2049  ;;  %v2837_v0 = vadd.f32 %v2492_v9, %v2405_v5  ;;  %2209 = vperm.xlu0 %3194, %v5327_v15   ;;  %v5339_v4 = vmul.f32 %v1823_v46, %v5251_v42  ;;  %v6531_v14 = vld [vmem:[#allocation96_spill] sm:$0xff]  ;;  %v1835_v42 = vld [vmem:[%s6197_s4 + $0x48] sm:$0xff] }
 0x2b3   :  { %v2403_v11 = vmul.f32 %v2050_v56, %v6530_v59  ;;  %v1907_v6 = vmul.f32 %v4735_v52, %v6531_v14  ;;  %v6532_v12 = vld [vmem:[#allocation4_spill] sm:$0xff]  ;;  %v6533_v56 = vld [vmem:[#allocation91_spill] sm:$0xff] }
 0x2b4   :  { %2909 = vst.msk [vmem:[%s6198_s5 + $0x18] sm:$0xff] %vm745_vm1, %v2837_v0  ;;  %v2402_v17 = vmul.f32 %v2045_v34, %v6532_v12  ;;  %v1909_v5 = vmul.f32 %v4658_v26, %v6533_v56  ;;  %v1837_v34 = vld [vmem:[%s6197_s4 + $0x58] sm:$0xff]  ;;  %v1911_v26 = vmul.f32 %v4871_v55, %v6534_v53  ;;  %v1839_v59 = vld [vmem:[%s6197_s4 + $0x68] sm:$0xff]  ;;  %v1915_v12 = vmul.f32 %v5026_v54, %v4788_v40 }
 0x2b5   :  { %v2482_v9 = vpop.permute.xlu0 %2481  ;;  %2184 = vperm.xlu1 %3193, %v5341_v30   ;;  %v1979_v52 = vsub.f32 %v1835_v42, %v1907_v6  ;;  %v1714_v6 = vld [vmem:[%s6196_s3 + $0x100] sm:$0xff]  ;;  %v6538_v53 = vld [vmem:[#allocation89_spill] sm:$0xff] }
 0x2b6   :  { %v2487_v31 = vpop.permute.xlu1 %2486  ;;  %v2835_v20 = vadd.f32 %v2482_v9, %v2403_v11  ;;  %2389 = vperm.xlu0 %3194, %v1823_v46   ;;  %v1981_v0 = vsub.f32 %v1837_v34, %v1909_v5  ;;  %v1983_v14 = vsub.f32 %v1839_v59, %v1911_v26  ;;  %v6535_v9 = vld [vmem:[#allocation80_spill] sm:$0xff]  ;;  %v1908_v26 = vmul.f32 %v4653_v2, %v6538_v53 }
 0x2b7   :  { %v2836_v21 = vadd.f32 %v2487_v31, %v2404_v44  ;;  %v3374_v11 = vpop.eup %3373  ;;  %v1913_v31 = vmul.f32 %v4810_v10, %v6535_v9  ;;  %v6537_v34 = vld [vmem:[#allocation104_spill] sm:$0xff] }
 0x2b8   :  { %2907 = vst.msk [vmem:[%s6198_s5 + $0x8] sm:$0xff] %vm745_vm1, %v2835_v20  ;;  %v5395_v20 = vmul.f32 %v3374_v11, %v1714_v6  ;;  %v1917_v40 = vmul.f32 %v4939_v18, %v6537_v34  ;;  %v1836_v18 = vld [vmem:[%s6197_s4 + $0x50] sm:$0xff]  ;;  %v6539_v6 = vld [vmem:[#allocation14_spill] sm:$0xff] }
 0x2b9   :  { %2908 = vst.msk [vmem:[%s6198_s5 + $0x10] sm:$0xff] %vm745_vm1, %v2836_v21  ;;  %v5366_v38 = vpop.permute.xlu0 %2259  ;;  %2364 = vperm.xlu1 %3193, %v5201_v50  }
 0x2ba   :  { %v2477_v46 = vpop.permute.xlu1 %2476  ;;  %2521 = vperm.xlu0 %3194, %v1979_v52   ;;  %v6536_v52 = vld [vmem:[#allocation95_spill] sm:$0xff] }
 0x2bb   :  { %v2834_v60 = vadd.f32 %v2477_v46, %v2402_v17  ;;  %v1906_v56 = vmul.f32 %v4722_v7, %v6536_v52  ;;  %v1834_v46 = vld [vmem:[%s6197_s4 + $0x40] sm:$0xff] }
 0x2bc   :  { %v1838_v52 = vld [vmem:[%s6197_s4 + $0x60] sm:$0xff] }
 0x2bd   :  { %2906 = vst.msk [vmem:[%s6198_s5] sm:$0xff] %vm745_vm1, %v2834_v60  ;;  %v5378_v44 = vpop.permute.xlu0 %2249  ;;  %2214 = vperm.xlu1 %3193, %v5274_v48   ;;  %v1841_v48 = vld [vmem:[%s6197_s4 + $0x78] sm:$0xff]  ;;  %v1978_v7 = vsub.f32 %v1834_v46, %v1906_v56 }
 0x2be   :  { %v2075_v50 = vpop.permute.xlu1 %2074  ;;  %2531 = vperm.xlu0 %3194, %v1981_v0   ;;  %v1985_v21 = vsub.f32 %v1841_v48, %v1913_v31  ;;  %v1845_v0 = vld [vmem:[%s6197_s4 + $0x98] sm:$0xff]  ;;  %v1980_v31 = vsub.f32 %v1836_v18, %v1908_v26  ;;  %v6540_v48 = vld [vmem:[#allocation119_spill] sm:$0xff] }
 0x2bf   :  { %v1989_v59 = vsub.f32 %v1845_v0, %v1917_v40  ;;  %v1910_v2 = vmul.f32 %v5064_v35, %v6540_v48  ;;  %v1849_v46 = vld [vmem:[%s6197_s4 + $0xb8] sm:$0xff]  ;;  %v6542_v35 = vld [vmem:[#allocation16_spill] sm:$0xff] }
 0x2c0   :  { %v6543_v40 = vld [vmem:[#allocation97_spill] sm:$0xff] }
 0x2c1   :  { %v2512_v55 = vpop.permute.xlu0 %2511  ;;  %2394 = vperm.xlu1 %3193, %v5293_v25   ;;  %v1843_v25 = vld [vmem:[%s6197_s4 + $0x88] sm:$0xff]  ;;  %v1982_v34 = vsub.f32 %v1838_v52, %v1910_v2  ;;  %v1912_v0 = vmul.f32 %v4975_v49, %v6543_v40  ;;  %v6547_v52 = vld [vmem:[#allocation105_spill] sm:$0xff] }
 0x2c2   :  { %v5390_v42 = vpop.permute.xlu1 %2254  ;;  %2541 = vperm.xlu0 %3194, %v1983_v14   ;;  %v1987_v5 = vsub.f32 %v1843_v25, %v1915_v12  ;;  %v1847_v14 = vld [vmem:[%s6197_s4 + $0xa8] sm:$0xff]  ;;  %v6541_v12 = vld [vmem:[#allocation121_spill] sm:$0xff] }
 0x2c3   :  { %v1991_v25 = vsub.f32 %v1847_v14, %v6541_v12 }
 0x2c5   :  { %v2502_v17 = vpop.permute.xlu0 %2501  ;;  %2204 = vperm.xlu1 %3193, %v5395_v20  }
 0x2c6   :  { %v2065_v10 = vpop.permute.xlu1 %2064  ;;  %2551 = vperm.xlu0 %3194, %v1985_v21  }
 0x2c9   :  { %v5410_v54 = vpop.permute.xlu0 %2099  ;;  %2384 = vperm.xlu1 %3193, %v5324_v45  }
 0x2ca   :  { %v5413_v60 = vpop.permute.xlu1 %2244  ;;  %2561 = vperm.xlu0 %3194, %v1987_v5  }
 0x2cd   :  { %v5423_v11 = vpop.permute.xlu0 %2279  ;;  %2516 = vperm.xlu1 %3193, %v1978_v7   ;;  %v6544_v7 = vld [vmem:[#allocation10_spill] sm:$0xff] }
 0x2ce   :  { %v2080_v45 = vpop.permute.xlu1 %2079  ;;  %2571 = vperm.xlu0 %3194, %v1989_v59   ;;  %v2408_v53 = vmul.f32 %v6544_v7, %v2075_v50  ;;  %v6545_v59 = vld [vmem:[#allocation100_spill] sm:$0xff]  ;;  %v1918_v7 = vmul.f32 %v5226_v43, %v5080_v51 }
 0x2cf   :  { %v2409_v9 = vmul.f32 %v6539_v6, %v2080_v45  ;;  %v1993_v18 = vsub.f32 %v1849_v46, %v6545_v59  ;;  %v1840_v45 = vld [vmem:[%s6197_s4 + $0x70] sm:$0xff]  ;;  %v1857_v59 = vld [vmem:[%s6197_s4 + $0xf8] sm:$0xff] }
 0x2d0   :  { %v1984_v50 = vsub.f32 %v1840_v45, %v1912_v0  ;;  %v6549_v45 = vld [vmem:[#allocation109_spill] sm:$0xff]  ;;  %v2001_v51 = vsub.f32 %v1857_v59, %v5156_v1  ;;  %v1848_v43 = vld [vmem:[%s6197_s4 + $0xb0] sm:$0xff]  ;;  %v1850_v1 = vld [vmem:[%s6197_s4 + $0xc0] sm:$0xff] }
 0x2d1   :  { %v2841_v21 = vadd.f32 %v2512_v55, %v2409_v9  ;;  %v5435_v56 = vpop.permute.xlu0 %2089  ;;  %2526 = vperm.xlu1 %3193, %v1980_v31   ;;  %v1851_v9 = vld [vmem:[%s6197_s4 + $0xc8] sm:$0xff]  ;;  %v6546_v31 = vld [vmem:[#allocation12_spill] sm:$0xff] }
 0x2d2   :  { %v2070_v5 = vpop.permute.xlu1 %2069  ;;  %2581 = vperm.xlu0 %3194, %v1991_v25   ;;  %v2406_v48 = vmul.f32 %v2065_v10, %v6546_v31  ;;  %v1995_v2 = vsub.f32 %v1851_v9, %v5019_v62  ;;  %v6548_v62 = vld [vmem:[#allocation106_spill] sm:$0xff]  ;;  %v1931_v9 = vmul.f32 %v5327_v15, %v5231_v3  ;;  %v1861_v15 = vld [vmem:[%s6197_s4 + $0x118] sm:$0xff] }
 0x2d3   :  { %2913 = vst.msk [vmem:[%s6198_s5 + $0x38] sm:$0xff] %vm745_vm1, %v2841_v21  ;;  %v2407_v55 = vmul.f32 %v2070_v5, %v6542_v35  ;;  %v1842_v21 = vld [vmem:[%s6197_s4 + $0x80] sm:$0xff]  ;;  %v1916_v5 = vmul.f32 %v5098_v29, %v6547_v52  ;;  %v1844_v35 = vld [vmem:[%s6197_s4 + $0x90] sm:$0xff]  ;;  %v1855_v29 = vld [vmem:[%s6197_s4 + $0xe8] sm:$0xff] }
 0x2d5   :  { %v2839_v26 = vadd.f32 %v2502_v17, %v2407_v55  ;;  %v5452_v14 = vpop.permute.xlu0 %2269  ;;  %2536 = vperm.xlu1 %3193, %v1982_v34   ;;  %v1914_v17 = vmul.f32 %v5130_v36, %v4926_v16  ;;  %v1853_v16 = vld [vmem:[%s6197_s4 + $0xd8] sm:$0xff]  ;;  %v1927_v55 = vmul.f32 %v5264_v13, %v5143_v27  ;;  %v1988_v0 = vsub.f32 %v1844_v35, %v1916_v5 }
 0x2d6   :  { %v2507_v6 = vpop.permute.xlu1 %2506  ;;  %2591 = vperm.xlu0 %3194, %v1993_v18   ;;  %v1997_v46 = vsub.f32 %v1853_v16, %v6548_v62  ;;  %v1852_v16 = vld [vmem:[%s6197_s4 + $0xd0] sm:$0xff]  ;;  %v6553_v35 = vld [vmem:[#allocation125_spill] sm:$0xff] }
 0x2d7   :  { %2911 = vst.msk [vmem:[%s6198_s5 + $0x28] sm:$0xff] %vm745_vm1, %v2839_v26  ;;  %v2840_v49 = vadd.f32 %v2507_v6, %v2408_v53  ;;  %v1986_v10 = vsub.f32 %v1842_v21, %v1914_v17  ;;  %v1999_v53 = vsub.f32 %v1855_v29, %v1927_v55  ;;  %v1846_v26 = vld [vmem:[%s6197_s4 + $0xa0] sm:$0xff]  ;;  %v1920_v6 = vmul.f32 %v5182_v33, %v6549_v45  ;;  %v1859_v17 = vld [vmem:[%s6197_s4 + $0x108] sm:$0xff]  ;;  %v1865_v45 = vld [vmem:[%s6197_s4 + $0x138] sm:$0xff] }
 0x2d8   :  { %v1990_v18 = vsub.f32 %v1846_v26, %v1918_v7  ;;  %v2003_v31 = vsub.f32 %v1859_v17, %v1931_v9  ;;  %v1996_v55 = vsub.f32 %v1852_v16, %v6553_v35  ;;  %v6554_v7 = vld [vmem:[#allocation75_spill] sm:$0xff]  ;;  %v1858_v16 = vld [vmem:[%s6197_s4 + $0x100] sm:$0xff] }
 0x2d9   :  { %2912 = vst.msk [vmem:[%s6198_s5 + $0x30] sm:$0xff] %vm745_vm1, %v2840_v49  ;;  %v5472_v12 = vpop.permute.xlu0 %2119  ;;  %2546 = vperm.xlu1 %3193, %v1984_v50   ;;  %v1992_v33 = vsub.f32 %v1848_v43, %v1920_v6  ;;  %v6557_v43 = vld [vmem:[#allocation116_spill] sm:$0xff] }
 0x2da   :  { %v2497_v25 = vpop.permute.xlu1 %2496  ;;  %2601 = vperm.xlu0 %3194, %v1995_v2   ;;  %v6550_v2 = vld [vmem:[#allocation129_spill] sm:$0xff] }
 0x2db   :  { %v2838_v36 = vadd.f32 %v2497_v25, %v2406_v48  ;;  %v1994_v21 = vsub.f32 %v1850_v1, %v6550_v2  ;;  %v2005_v25 = vsub.f32 %v1861_v15, %v5291_v47  ;;  %v1926_v47 = vmul.f32 %v5341_v30, %v5242_v37  ;;  %v1856_v30 = vld [vmem:[%s6197_s4 + $0xf0] sm:$0xff]  ;;  %v6558_v1 = vld [vmem:[#allocation41_spill] sm:$0xff] }
 0x2dc   :  { %v2000_v2 = vsub.f32 %v1856_v30, %v5151_v32  ;;  %v6561_v32 = vld [vmem:[#allocation46_spill] sm:$0xff] }
 0x2dd   :  { %2910 = vst.msk [vmem:[%s6198_s5 + $0x20] sm:$0xff] %vm745_vm1, %v2838_v36  ;;  %v5489_v34 = vpop.permute.xlu0 %2299  ;;  %2556 = vperm.xlu1 %3193, %v1986_v10   ;;  %v6551_v36 = vld [vmem:[#allocation76_spill] sm:$0xff]  ;;  %v6552_v10 = vld [vmem:[#allocation114_spill] sm:$0xff] }
 0x2de   :  { %v5491_v40 = vpop.permute.xlu1 %2094  ;;  %2611 = vperm.xlu0 %3194, %v1997_v46   ;;  %v1935_v52 = vmul.f32 %v6552_v10, %v6551_v36  ;;  %v1863_v46 = vld [vmem:[%s6197_s4 + $0x128] sm:$0xff]  ;;  %v6559_v36 = vld [vmem:[#allocation82_spill] sm:$0xff] }
 0x2df   :  { %v6560_v10 = vld [vmem:[#allocation79_spill] sm:$0xff] }
 0x2e0   :  { %v2007_v29 = vsub.f32 %v1863_v46, %v1935_v52  ;;  %v1941_v52 = vmul.f32 %v6560_v10, %v6559_v36  ;;  %v1873_v10 = vld [vmem:[%s6197_s4 + $0x178] sm:$0xff] }
 0x2e1   :  { %v5501_v27 = vpop.permute.xlu0 %2109  ;;  %2566 = vperm.xlu1 %3193, %v1988_v0   ;;  %v1854_v0 = vld [vmem:[%s6197_s4 + $0xe0] sm:$0xff] }
 0x2e2   :  { %v5503_v13 = vpop.permute.xlu1 %2274  ;;  %2621 = vperm.xlu0 %3194, %v1999_v53   ;;  %v6555_v53 = vld [vmem:[#allocation113_spill] sm:$0xff]  ;;  %v1998_v6 = vsub.f32 %v1854_v0, %v1926_v47  ;;  %v6562_v0 = vld [vmem:[#allocation115_spill] sm:$0xff] }
 0x2e3   :  { %v1937_v26 = vmul.f32 %v6555_v53, %v6554_v7  ;;  %v6563_v7 = vld [vmem:[#allocation85_spill] sm:$0xff] }
 0x2e4   :  { %v1943_v53 = vmul.f32 %v6563_v7, %v6562_v0  ;;  %v6573_v0 = vld [vmem:[#allocation87_spill] sm:$0xff]  ;;  %v6574_v7 = vld [vmem:[#allocation124_spill] sm:$0xff] }
 0x2e5   :  { %v5516_v49 = vpop.permute.xlu0 %2289  ;;  %2576 = vperm.xlu1 %3193, %v1990_v18   ;;  %v2009_v37 = vsub.f32 %v1865_v45, %v1937_v26 }
 0x2e6   :  { %v5518_v50 = vpop.permute.xlu1 %2084  ;;  %2631 = vperm.xlu0 %3194, %v2001_v51   ;;  %v6556_v51 = vld [vmem:[#allocation84_spill] sm:$0xff] }
 0x2e7   :  { %v1939_v9 = vmul.f32 %v6557_v43, %v6556_v51  ;;  %v6565_v43 = vld [vmem:[#allocation77_spill] sm:$0xff] }
 0x2e9   :  { %v5526_v48 = vpop.permute.xlu0 %2139  ;;  %2586 = vperm.xlu1 %3193, %v1992_v33  }
 0x2ea   :  { %v5528_v3 = vpop.permute.xlu1 %2264  ;;  %2641 = vperm.xlu0 %3194, %v2003_v31   ;;  %v1867_v31 = vld [vmem:[%s6197_s4 + $0x148] sm:$0xff] }
 0x2ed   :  { %v5540_v5 = vpop.permute.xlu0 %2319  ;;  %2596 = vperm.xlu1 %3193, %v1994_v21   ;;  %v1930_v21 = vmul.f32 %v5395_v20, %v5296_v58 }
 0x2ee   :  { %v5542_v62 = vpop.permute.xlu1 %2114  ;;  %2651 = vperm.xlu0 %3194, %v2005_v25   ;;  %v2011_v25 = vsub.f32 %v1867_v31, %v1939_v9  ;;  %v6566_v9 = vld [vmem:[#allocation112_spill] sm:$0xff] }
 0x2ef   :  { %v2002_v58 = vsub.f32 %v1858_v16, %v1930_v21  ;;  %v6568_v21 = vld [vmem:[#allocation99_spill] sm:$0xff] }
 0x2f1   :  { %v5555_v59 = vpop.permute.xlu0 %2129  ;;  %2606 = vperm.xlu1 %3193, %v1996_v55   ;;  %v1869_v55 = vld [vmem:[%s6197_s4 + $0x158] sm:$0xff] }
 0x2f2   :  { %v5557_v18 = vpop.permute.xlu1 %2294  ;;  %2661 = vperm.xlu0 %3194, %v2007_v29   ;;  %v2013_v20 = vsub.f32 %v1869_v55, %v1941_v52  ;;  %v1860_v29 = vld [vmem:[%s6197_s4 + $0x110] sm:$0xff]  ;;  %v6571_v55 = vld [vmem:[#allocation74_spill] sm:$0xff] }
 0x2f3   :  { %v2004_v51 = vsub.f32 %v1860_v29, %v5287_v23  ;;  %v6570_v23 = vld [vmem:[#allocation48_spill] sm:$0xff] }
 0x2f4   :  { %v1864_v29 = vld [vmem:[%s6197_s4 + $0x130] sm:$0xff] }
 0x2f5   :  { %v2310_v17 = vpop.permute.xlu0 %2309  ;;  %2616 = vperm.xlu1 %3193, %v1998_v6   ;;  %v1871_v6 = vld [vmem:[%s6197_s4 + $0x168] sm:$0xff] }
 0x2f6   :  { %v5567_v33 = vpop.permute.xlu1 %2104  ;;  %v5573_v15 = vmul.f32 %v2310_v17, %v6558_v1  ;;  %2671 = vperm.xlu0 %3194, %v2009_v37   ;;  %v6564_v37 = vld [vmem:[#allocation47_spill] sm:$0xff]  ;;  %v1934_v17 = vmul.f32 %v6566_v9, %v6565_v43  ;;  %v2015_v31 = vsub.f32 %v1871_v6, %v1943_v53  ;;  %v1862_v1 = vld [vmem:[%s6197_s4 + $0x120] sm:$0xff]  ;;  %v1947_v53 = vmul.f32 %v6574_v7, %v6573_v0  ;;  %v6583_v7 = vld [vmem:[#allocation81_spill] sm:$0xff] }
 0x2f9   :  { %v2160_v46 = vpop.permute.xlu0 %2159  ;;  %2626 = vperm.xlu1 %3193, %v2000_v2   ;;  %v6567_v2 = vld [vmem:[#allocation94_spill] sm:$0xff] }
 0x2fa   :  { %v5583_v35 = vpop.permute.xlu1 %2284  ;;  %v5589_v47 = vmul.f32 %v6561_v32, %v2160_v46  ;;  %2681 = vperm.xlu0 %3194, %v2011_v25   ;;  %v1945_v25 = vmul.f32 %v6568_v21, %v6567_v2  ;;  %v2006_v46 = vsub.f32 %v1862_v1, %v1934_v17  ;;  %v6572_v32 = vld [vmem:[#allocation110_spill] sm:$0xff]  ;;  %v6576_v17 = vld [vmem:[#allocation83_spill] sm:$0xff] }
 0x2fb   :  { %v1866_v21 = vld [vmem:[%s6197_s4 + $0x140] sm:$0xff] }
 0x2fd   :  { %v2340_v26 = vpop.permute.xlu0 %2339  ;;  %2636 = vperm.xlu1 %3193, %v2002_v58   ;;  %v1936_v58 = vmul.f32 %v6572_v32, %v6571_v55  ;;  %v1877_v55 = vld [vmem:[%s6197_s4 + $0x198] sm:$0xff]  ;;  %v6580_v32 = vld [vmem:[#allocation52_spill] sm:$0xff] }
 0x2fe   :  { %v5596_v45 = vpop.permute.xlu1 %2134  ;;  %v5602_v30 = vmul.f32 %v6564_v37, %v2340_v26  ;;  %2691 = vperm.xlu0 %3194, %v2013_v20   ;;  %v2017_v20 = vsub.f32 %v1873_v10, %v1945_v25  ;;  %v1875_v37 = vld [vmem:[%s6197_s4 + $0x188] sm:$0xff]  ;;  %v6578_v25 = vld [vmem:[#allocation118_spill] sm:$0xff] }
 0x2ff   :  { %v2008_v9 = vsub.f32 %v1864_v29, %v1936_v58  ;;  %v2019_v2 = vsub.f32 %v1875_v37, %v1947_v53  ;;  %v6584_v53 = vld [vmem:[#allocation117_spill] sm:$0xff] }
 0x301   :  { %v2150_v16 = vpop.permute.xlu0 %2149  ;;  %2646 = vperm.xlu1 %3193, %v2004_v51   ;;  %v6575_v51 = vld [vmem:[#allocation49_spill] sm:$0xff] }
 0x302   :  { %v5612_v36 = vpop.permute.xlu1 %2314  ;;  %v5618_v52 = vmul.f32 %v2150_v16, %v6570_v23  ;;  %2701 = vperm.xlu0 %3194, %v2015_v31   ;;  %v6577_v31 = vld [vmem:[#allocation86_spill] sm:$0xff] }
 0x303   :  { %6569 = vst [vmem:[#allocation6_spill] sm:$0xff] %v5612_v36  ;;  %v1938_v1 = vmul.f32 %v6577_v31, %v6576_v17  ;;  %v6579_v16 = vld [vmem:[#allocation122_spill] sm:$0xff] }
 0x304   :  { %v1949_v10 = vmul.f32 %v6579_v16, %v6578_v25  ;;  %v1879_v16 = vld [vmem:[%s6197_s4 + $0x1a8] sm:$0xff] }
 0x305   :  { %v2330_v26 = vpop.permute.xlu0 %2329  ;;  %2656 = vperm.xlu1 %3193, %v2006_v46   ;;  %v2010_v0 = vsub.f32 %v1866_v21, %v1938_v1  ;;  %v6588_v21 = vld [vmem:[#allocation42_spill] sm:$0xff] }
 0x306   :  { %v5627_v6 = vpop.permute.xlu1 %2124  ;;  %v5633_v43 = vmul.f32 %v2330_v26, %v6575_v51  ;;  %2711 = vperm.xlu0 %3194, %v2017_v20   ;;  %v6581_v20 = vld [vmem:[#allocation37_spill] sm:$0xff]  ;;  %v1940_v26 = vmul.f32 %v6584_v53, %v6583_v7  ;;  %v2021_v37 = vsub.f32 %v1877_v55, %v1949_v10  ;;  %v1868_v51 = vld [vmem:[%s6197_s4 + $0x150] sm:$0xff]  ;;  %v6590_v55 = vld [vmem:[#allocation126_spill] sm:$0xff] }
 0x307   :  { %v6592_v7 = vld [vmem:[#allocation108_spill] sm:$0xff] }
 0x308   :  { %v2012_v10 = vsub.f32 %v1868_v51, %v1940_v26  ;;  %v6594_v51 = vld [vmem:[#allocation43_spill] sm:$0xff] }
 0x309   :  { %v2180_v23 = vpop.permute.xlu0 %2179  ;;  %2666 = vperm.xlu1 %3193, %v2008_v9   ;;  %v6585_v9 = vld [vmem:[#allocation88_spill] sm:$0xff] }
 0x30a   :  { %v2305_v46 = vpop.permute.xlu1 %2304  ;;  %v5646_v58 = vmul.f32 %v6580_v32, %v2180_v23  ;;  %2721 = vperm.xlu0 %3194, %v2019_v2   ;;  %v1951_v17 = vmul.f32 %v5066_v39, %v6585_v9  ;;  %v6586_v2 = vld [vmem:[#allocation56_spill] sm:$0xff]  ;;  %v1870_v39 = vld [vmem:[%s6197_s4 + $0x160] sm:$0xff] }
 0x30b   :  { %v5649_v29 = vmul.f32 %v2305_v46, %v6581_v20  ;;  %v6589_v46 = vld [vmem:[#allocation78_spill] sm:$0xff] }
 0x30c   :  { %v1942_v32 = vmul.f32 %v6590_v55, %v6589_v46  ;;  %v2023_v20 = vsub.f32 %v1879_v16, %v1951_v17  ;;  %v6596_v16 = vld [vmem:[#allocation93_spill] sm:$0xff] }
 0x30d   :  { %6582 = vst [vmem:[#allocation2_spill] sm:$0xff] %v5649_v29  ;;  %v2360_v31 = vpop.permute.xlu0 %2359  ;;  %2676 = vperm.xlu1 %3193, %v2010_v0   ;;  %v6591_v0 = vld [vmem:[#allocation101_spill] sm:$0xff] }
 0x30e   :  { %v2155_v25 = vpop.permute.xlu1 %2154  ;;  %v5662_v1 = vmul.f32 %v6586_v2, %v2360_v31  ;;  %2731 = vperm.xlu0 %3194, %v2021_v37   ;;  %v1953_v53 = vmul.f32 %v6592_v7, %v6591_v0  ;;  %v6593_v37 = vld [vmem:[#allocation54_spill] sm:$0xff]  ;;  %v2014_v17 = vsub.f32 %v1870_v39, %v1942_v32 }
 0x30f   :  { %v5665_v23 = vmul.f32 %v6588_v21, %v2155_v25  ;;  %v1881_v25 = vld [vmem:[%s6197_s4 + $0x1b8] sm:$0xff]  ;;  %v6597_v21 = vld [vmem:[#allocation92_spill] sm:$0xff] }
 0x310   :  { %6587 = vst [vmem:[#allocation8_spill] sm:$0xff] %v5662_v1  ;;  %v1944_v46 = vmul.f32 %v6597_v21, %v6596_v16  ;;  %v2025_v55 = vsub.f32 %v1881_v25, %v1953_v53  ;;  %v6600_v53 = vld [vmem:[#allocation102_spill] sm:$0xff] }
 0x311   :  { %v2170_v9 = vpop.permute.xlu0 %2169  ;;  %2686 = vperm.xlu1 %3193, %v2012_v10   ;;  %v1872_v10 = vld [vmem:[%s6197_s4 + $0x170] sm:$0xff]  ;;  %v1946_v25 = vmul.f32 %v5070_v61, %v6600_v53 }
 0x312   :  { %v2335_v31 = vpop.permute.xlu1 %2334  ;;  %v5678_v26 = vmul.f32 %v2170_v9, %v6593_v37  ;;  %2741 = vperm.xlu0 %3194, %v2023_v20   ;;  %v1883_v9 = vld [vmem:[%s6197_s4 + $0x1c8] sm:$0xff]  ;;  %v6598_v37 = vld [vmem:[#allocation57_spill] sm:$0xff]  ;;  %v6599_v20 = vld [vmem:[#allocation44_spill] sm:$0xff]  ;;  %v2016_v39 = vsub.f32 %v1872_v10, %v1944_v46 }
 0x313   :  { %v5681_v2 = vmul.f32 %v6594_v51, %v2335_v31  ;;  %v6601_v51 = vld [vmem:[#allocation103_spill] sm:$0xff]  ;;  %v6603_v46 = vld [vmem:[#allocation45_spill] sm:$0xff]  ;;  %v6605_v10 = vld [vmem:[#allocation90_spill] sm:$0xff] }
 0x314   :  { %v2027_v16 = vsub.f32 %v1883_v9, %v6601_v51  ;;  %v6606_v9 = vld [vmem:[#allocation130_spill] sm:$0xff]  ;;  %v6607_v53 = vld [vmem:[#allocation120_spill] sm:$0xff] }
 0x315   :  { %6595 = vst [vmem:[#allocation96_spill] sm:$0xff] %v5681_v2  ;;  %v2350_v0 = vpop.permute.xlu0 %2349  ;;  %2696 = vperm.xlu1 %3193, %v2014_v17   ;;  %v1874_v17 = vld [vmem:[%s6197_s4 + $0x180] sm:$0xff] }
 0x316   :  { %v2145_v7 = vpop.permute.xlu1 %2144  ;;  %v5692_v31 = vmul.f32 %v2350_v0, %v6598_v37  ;;  %2751 = vperm.xlu0 %3194, %v2025_v55   ;;  %v1885_v0 = vld [vmem:[%s6197_s4 + $0x1d8] sm:$0xff]  ;;  %v2018_v61 = vsub.f32 %v1874_v17, %v1946_v25  ;;  %v6610_v25 = vld [vmem:[#allocation50_spill] sm:$0xff] }
 0x317   :  { %v5695_v32 = vmul.f32 %v2145_v7, %v6599_v20  ;;  %v6602_v7 = vld [vmem:[#allocation60_spill] sm:$0xff]  ;;  %v1948_v20 = vmul.f32 %v6606_v9, %v6605_v10  ;;  %v2029_v51 = vsub.f32 %v1885_v0, %v6607_v53  ;;  %v6611_v0 = vld [vmem:[#allocation107_spill] sm:$0xff] }
 0x318   :  { %v6612_v10 = vld [vmem:[#allocation132_spill] sm:$0xff] }
 0x319   :  { %v2200_v21 = vpop.permute.xlu0 %2199  ;;  %2706 = vperm.xlu1 %3193, %v2016_v39   ;;  %v1876_v39 = vld [vmem:[%s6197_s4 + $0x190] sm:$0xff] }
 0x31a   :  { %v2325_v2 = vpop.permute.xlu1 %2324  ;;  %v5707_v37 = vmul.f32 %v6602_v7, %v2200_v21  ;;  %2761 = vperm.xlu0 %3194, %v2027_v16   ;;  %v1887_v21 = vld [vmem:[%s6197_s4 + $0x1e8] sm:$0xff]  ;;  %v2020_v17 = vsub.f32 %v1876_v39, %v1948_v20  ;;  %v6616_v39 = vld [vmem:[#allocation134_spill] sm:$0xff] }
 0x31b   :  { %v5710_v55 = vmul.f32 %v2325_v2, %v6603_v46  ;;  %v6608_v2 = vld [vmem:[#allocation64_spill] sm:$0xff]  ;;  %v1950_v46 = vmul.f32 %v5159_v24, %v6611_v0  ;;  %v2031_v9 = vsub.f32 %v1887_v21, %v6612_v10  ;;  %v6615_v24 = vld [vmem:[#allocation123_spill] sm:$0xff] }
 0x31c   :  { %v1952_v21 = vmul.f32 %v6616_v39, %v6615_v24  ;;  %v1880_v0 = vld [vmem:[%s6197_s4 + $0x1b0] sm:$0xff] }
 0x31d   :  { %6604 = vst [vmem:[#allocation4_spill] sm:$0xff] %v5710_v55  ;;  %v2380_v36 = vpop.permute.xlu0 %2379  ;;  %2716 = vperm.xlu1 %3193, %v2018_v61   ;;  %v1878_v61 = vld [vmem:[%s6197_s4 + $0x1a0] sm:$0xff] }
 0x31e   :  { %v2175_v29 = vpop.permute.xlu1 %2174  ;;  %v5722_v7 = vmul.f32 %v6608_v2, %v2380_v36  ;;  %2771 = vperm.xlu0 %3194, %v2029_v51   ;;  %v1889_v36 = vld [vmem:[%s6197_s4 + $0x1f8] sm:$0xff]  ;;  %v2022_v20 = vsub.f32 %v1878_v61, %v1950_v46  ;;  %v6617_v2 = vld [vmem:[#allocation128_spill] sm:$0xff]  ;;  %v6620_v46 = vld [vmem:[#allocation51_spill] sm:$0xff]  ;;  %v2024_v61 = vsub.f32 %v1880_v0, %v1952_v21 }
 0x31f   :  { %v5725_v16 = vmul.f32 %v6610_v25, %v2175_v29  ;;  %v6613_v29 = vld [vmem:[#allocation53_spill] sm:$0xff]  ;;  %v2033_v25 = vsub.f32 %v1889_v36, %v6617_v2  ;;  %v6623_v21 = vld [vmem:[#allocation55_spill] sm:$0xff] }
 0x320   :  { %6609 = vst [vmem:[#allocation91_spill] sm:$0xff] %v5722_v7  ;;  %v1891_v7 = vld [vmem:[%s6197_s4 + $0x208] sm:$0xff]  ;;  %v6621_v36 = vld [vmem:[#allocation133_spill] sm:$0xff] }
 0x321   :  { %v5733_v53 = vpop.permute.xlu0 %2189  ;;  %2726 = vperm.xlu1 %3193, %v2020_v17   ;;  %v1954_v24 = vmul.f32 %v5239_v8, %v6621_v36  ;;  %v2035_v39 = vsub.f32 %v1891_v7, %v5222_v63  ;;  %v6624_v63 = vld [vmem:[#allocation111_spill] sm:$0xff]  ;;  %v6625_v7 = vld [vmem:[#allocation137_spill] sm:$0xff] }
 0x322   :  { %v2355_v55 = vpop.permute.xlu1 %2354  ;;  %2781 = vperm.xlu0 %3194, %v2031_v9   ;;  %v1956_v0 = vmul.f32 %v6625_v7, %v6624_v63  ;;  %v6629_v7 = vld [vmem:[#allocation62_spill] sm:$0xff] }
 0x323   :  { %v5739_v51 = vmul.f32 %v6613_v29, %v2355_v55  ;;  %v6618_v55 = vld [vmem:[#allocation65_spill] sm:$0xff] }
 0x325   :  { %6614 = vst [vmem:[#allocation98_spill] sm:$0xff] %v5739_v51  ;;  %v2370_v17 = vpop.permute.xlu0 %2369  ;;  %2736 = vperm.xlu1 %3193, %v2022_v20   ;;  %v1882_v20 = vld [vmem:[%s6197_s4 + $0x1c0] sm:$0xff] }
 0x326   :  { %v2165_v10 = vpop.permute.xlu1 %2164  ;;  %v5751_v29 = vmul.f32 %v2370_v17, %v6618_v55  ;;  %2791 = vperm.xlu0 %3194, %v2033_v25   ;;  %v1893_v17 = vld [vmem:[%s6197_s4 + $0x218] sm:$0xff]  ;;  %v2026_v8 = vsub.f32 %v1882_v20, %v1954_v24  ;;  %v6628_v24 = vld [vmem:[#allocation58_spill] sm:$0xff] }
 0x327   :  { %v5754_v9 = vmul.f32 %v2165_v10, %v6620_v46  ;;  %v6622_v10 = vld [vmem:[#allocation68_spill] sm:$0xff] }
 0x328   :  { %6619 = vst [vmem:[#allocation80_spill] sm:$0xff] %v5751_v29  ;;  %v6626_v46 = vld [vmem:[#allocation136_spill] sm:$0xff] }
 0x329   :  { %v2220_v2 = vpop.permute.xlu0 %2219  ;;  %2746 = vperm.xlu1 %3193, %v2024_v61   ;;  %v2037_v36 = vsub.f32 %v1893_v17, %v6626_v46  ;;  %v1884_v61 = vld [vmem:[%s6197_s4 + $0x1d0] sm:$0xff] }
 0x32a   :  { %v2345_v51 = vpop.permute.xlu1 %2344  ;;  %v5766_v55 = vmul.f32 %v6622_v10, %v2220_v2  ;;  %2801 = vperm.xlu0 %3194, %v2035_v39   ;;  %v1895_v2 = vld [vmem:[%s6197_s4 + $0x228] sm:$0xff]  ;;  %v2028_v20 = vsub.f32 %v1884_v61, %v1956_v0 }
 0x32b   :  { %v5769_v25 = vmul.f32 %v2345_v51, %v6623_v21  ;;  %v6627_v51 = vld [vmem:[#allocation72_spill] sm:$0xff]  ;;  %v2039_v17 = vsub.f32 %v1895_v2, %v5339_v4  ;;  %v1886_v21 = vld [vmem:[%s6197_s4 + $0x1e0] sm:$0xff] }
 0x32d   :  { %v2400_v29 = vpop.permute.xlu0 %2399  ;;  %2756 = vperm.xlu1 %3193, %v2026_v8  }
 0x32e   :  { %v2195_v1 = vpop.permute.xlu1 %2194  ;;  %v5781_v10 = vmul.f32 %v6627_v51, %v2400_v29  ;;  %2811 = vperm.xlu0 %3194, %v2037_v36   ;;  %v1897_v29 = vld [vmem:[%s6197_s4 + $0x238] sm:$0xff]  ;;  %v1888_v36 = vld [vmem:[%s6197_s4 + $0x1f0] sm:$0xff] }
 0x32f   :  { %v5784_v39 = vmul.f32 %v6628_v24, %v2195_v1  ;;  %v6631_v1 = vld [vmem:[#allocation131_spill] sm:$0xff]  ;;  %v2041_v4 = vsub.f32 %v1897_v29, %v5308_v41  ;;  %v6632_v51 = vld [vmem:[#allocation73_spill] sm:$0xff]  ;;  %v1890_v41 = vld [vmem:[%s6197_s4 + $0x200] sm:$0xff] }
 0x330   :  { %v2030_v0 = vsub.f32 %v1886_v21, %v6631_v1 }
 0x331   :  { %v5790_v8 = vpop.permute.xlu0 %2209  ;;  %2766 = vperm.xlu1 %3193, %v2028_v20   ;;  %v6633_v20 = vld [vmem:[#allocation127_spill] sm:$0xff] }
 0x332   :  { %v2375_v63 = vpop.permute.xlu1 %2374  ;;  %2821 = vperm.xlu0 %3194, %v2039_v17  }
 0x333   :  { %v5796_v46 = vmul.f32 %v6629_v7, %v2375_v63  ;;  %v2032_v63 = vsub.f32 %v1888_v36, %v6633_v20  ;;  %v6634_v7 = vld [vmem:[#allocation24_spill] sm:$0xff] }
 0x334   :  { %v2411_v17 = vmul.f32 %v5435_v56, %v6634_v7  ;;  %v1892_v56 = vld [vmem:[%s6197_s4 + $0x210] sm:$0xff]  ;;  %v6637_v7 = vld [vmem:[#allocation66_spill] sm:$0xff] }
 0x335   :  { %6630 = vst [vmem:[#allocation95_spill] sm:$0xff] %v5796_v46  ;;  %v2390_v61 = vpop.permute.xlu0 %2389  ;;  %2776 = vperm.xlu1 %3193, %v2030_v0   ;;  %v6635_v0 = vld [vmem:[#allocation63_spill] sm:$0xff] }
 0x336   :  { %v5803_v2 = vpop.permute.xlu1 %2184  ;;  %v5806_v24 = vmul.f32 %v2390_v61, %v6632_v51  ;;  %2831 = vperm.xlu0 %3194, %v2041_v4   ;;  %v2034_v61 = vsub.f32 %v1890_v41, %v5215_v19  ;;  %v6636_v4 = vld [vmem:[#allocation22_spill] sm:$0xff]  ;;  %v6638_v19 = vld [vmem:[#allocation135_spill] sm:$0xff] }
 0x337   :  { %v2413_v51 = vmul.f32 %v6636_v4, %v5410_v54  ;;  %v2036_v41 = vsub.f32 %v1892_v56, %v6638_v19  ;;  %v6640_v4 = vld [vmem:[#allocation70_spill] sm:$0xff] }
 0x339   :  { %v2522_v21 = vpop.permute.xlu0 %2521  ;;  %2786 = vperm.xlu1 %3193, %v2032_v63  }
 0x33a   :  { %v2365_v29 = vpop.permute.xlu1 %2364  ;;  %v2843_v1 = vadd.f32 %v2522_v21, %v2411_v17  ;;  %v6639_v21 = vld [vmem:[#allocation32_spill] sm:$0xff] }
 0x33b   :  { %v5815_v46 = vmul.f32 %v2365_v29, %v6635_v0  ;;  %v2415_v54 = vmul.f32 %v5501_v27, %v6639_v21  ;;  %v1894_v29 = vld [vmem:[%s6197_s4 + $0x220] sm:$0xff] }
 0x33c   :  { %2915 = vst.msk [vmem:[%s6198_s5 + $0x48] sm:$0xff] %vm745_vm1, %v2843_v1  ;;  %v2038_v56 = vsub.f32 %v1894_v29, %v5335_v57  ;;  %v6641_v27 = vld [vmem:[#allocation30_spill] sm:$0xff]  ;;  %v6642_v57 = vld [vmem:[#allocation40_spill] sm:$0xff] }
 0x33d   :  { %v2532_v36 = vpop.permute.xlu0 %2531  ;;  %2796 = vperm.xlu1 %3193, %v2034_v61   ;;  %v2419_v21 = vmul.f32 %v5555_v59, %v6642_v57 }
 0x33e   :  { %v2215_v20 = vpop.permute.xlu1 %2214  ;;  %v2845_v63 = vadd.f32 %v2532_v36, %v2413_v51  ;;  %v2417_v36 = vmul.f32 %v6641_v27, %v5472_v12 }
 0x33f   :  { %v5828_v17 = vmul.f32 %v6637_v7, %v2215_v20  ;;  %v1896_v20 = vld [vmem:[%s6197_s4 + $0x230] sm:$0xff] }
 0x340   :  { %2917 = vst.msk [vmem:[%s6198_s5 + $0x58] sm:$0xff] %vm745_vm1, %v2845_v63 }
 0x341   :  { %v2542_v1 = vpop.permute.xlu0 %2541  ;;  %2806 = vperm.xlu1 %3193, %v2036_v41   ;;  %v2040_v41 = vsub.f32 %v1896_v20, %v5305_v22  ;;  %v6645_v22 = vld [vmem:[#allocation38_spill] sm:$0xff] }
 0x342   :  { %v2395_v0 = vpop.permute.xlu1 %2394  ;;  %v2847_v61 = vadd.f32 %v2542_v1, %v2415_v54  ;;  %v6643_v1 = vld [vmem:[#allocation71_spill] sm:$0xff] }
 0x343   :  { %v5841_v51 = vmul.f32 %v6640_v4, %v2395_v0 }
 0x344   :  { %2919 = vst.msk [vmem:[%s6198_s5 + $0x68] sm:$0xff] %vm745_vm1, %v2847_v61  ;;  %v6644_v61 = vld [vmem:[#allocation20_spill] sm:$0xff] }
 0x345   :  { %v2552_v63 = vpop.permute.xlu0 %2551  ;;  %2816 = vperm.xlu1 %3193, %v2038_v56   ;;  %v2410_v4 = vmul.f32 %v5518_v50, %v6644_v61  ;;  %v2421_v56 = vmul.f32 %v6645_v22, %v5526_v48 }
 0x346   :  { %v5853_v7 = vpop.permute.xlu1 %2204  ;;  %v2849_v19 = vadd.f32 %v2552_v63, %v2417_v36  ;;  %v6646_v63 = vld [vmem:[#allocation18_spill] sm:$0xff] }
 0x348   :  { %2921 = vst.msk [vmem:[%s6198_s5 + $0x78] sm:$0xff] %vm745_vm1, %v2849_v19  ;;  %v2412_v19 = vmul.f32 %v6646_v63, %v5491_v40 }
 0x349   :  { %v2562_v12 = vpop.permute.xlu0 %2561  ;;  %2826 = vperm.xlu1 %3193, %v2040_v41  }
 0x34a   :  { %v2385_v54 = vpop.permute.xlu1 %2384  ;;  %v2851_v29 = vadd.f32 %v2562_v12, %v2419_v21  ;;  %v6647_v21 = vld [vmem:[#allocation28_spill] sm:$0xff] }
 0x34b   :  { %v5863_v0 = vmul.f32 %v2385_v54, %v6643_v1  ;;  %v2414_v12 = vmul.f32 %v5567_v33, %v6647_v21 }
 0x34c   :  { %2923 = vst.msk [vmem:[%s6198_s5 + $0x88] sm:$0xff] %vm745_vm1, %v2851_v29 }
 0x34d   :  { %v2572_v59 = vpop.permute.xlu0 %2571 }
 0x34e   :  { %v2517_v27 = vpop.permute.xlu1 %2516  ;;  %v2853_v36 = vadd.f32 %v2572_v59, %v2421_v56 }
 0x34f   :  { %v2842_v20 = vadd.f32 %v2517_v27, %v2410_v4 }
 0x350   :  { %2925 = vst.msk [vmem:[%s6198_s5 + $0x98] sm:$0xff] %vm745_vm1, %v2853_v36 }
 0x351   :  { %2914 = vst.msk [vmem:[%s6198_s5 + $0x40] sm:$0xff] %vm745_vm1, %v2842_v20  ;;  %v2582_v50 = vpop.permute.xlu0 %2581 }
 0x352   :  { %v2527_v48 = vpop.permute.xlu1 %2526  ;;  %v2855_v41 = vadd.f32 %v2582_v50, %v5618_v52  ;;  %v6648_v52 = vld [vmem:[#allocation26_spill] sm:$0xff] }
 0x353   :  { %v2844_v57 = vadd.f32 %v2527_v48, %v2412_v19  ;;  %v2416_v61 = vmul.f32 %v6648_v52, %v5542_v62  ;;  %v6651_v19 = vld [vmem:[#allocation61_spill] sm:$0xff] }
 0x354   :  { %2927 = vst.msk [vmem:[%s6198_s5 + $0xa8] sm:$0xff] %vm745_vm1, %v2855_v41 }
 0x355   :  { %2916 = vst.msk [vmem:[%s6198_s5 + $0x50] sm:$0xff] %vm745_vm1, %v2844_v57  ;;  %v2592_v40 = vpop.permute.xlu0 %2591 }
 0x356   :  { %v2537_v54 = vpop.permute.xlu1 %2536  ;;  %v2857_v29 = vadd.f32 %v2592_v40, %v5589_v47  ;;  %v6649_v47 = vld [vmem:[#allocation36_spill] sm:$0xff] }
 0x357   :  { %v2846_v1 = vadd.f32 %v2537_v54, %v2414_v12  ;;  %v2418_v59 = vmul.f32 %v5627_v6, %v6649_v47  ;;  %v2431_v6 = vmul.f32 %v5733_v53, %v6651_v19  ;;  %v6652_v12 = vld [vmem:[#allocation69_spill] sm:$0xff]  ;;  %v6654_v47 = vld [vmem:[#allocation139_spill] sm:$0xff] }
 0x358   :  { %2929 = vst.msk [vmem:[%s6198_s5 + $0xb8] sm:$0xff] %vm745_vm1, %v2857_v29  ;;  %v2435_v40 = vmul.f32 %v5790_v8, %v6652_v12 }
 0x359   :  { %2918 = vst.msk [vmem:[%s6198_s5 + $0x60] sm:$0xff] %vm745_vm1, %v2846_v1  ;;  %v2602_v33 = vpop.permute.xlu0 %2601 }
 0x35a   :  { %v2547_v4 = vpop.permute.xlu1 %2546  ;;  %v2859_v22 = vadd.f32 %v2602_v33, %v5678_v26  ;;  %v6650_v26 = vld [vmem:[#allocation34_spill] sm:$0xff]  ;;  %v6653_v33 = vld [vmem:[#allocation9_spill] sm:$0xff] }
 0x35b   :  { %v2848_v56 = vadd.f32 %v2547_v4, %v2416_v61  ;;  %v2420_v63 = vmul.f32 %v6650_v26, %v5596_v45  ;;  %v2439_v4 = vmul.f32 %v5315_v28, %v6653_v33  ;;  %v6657_v26 = vld [vmem:[#allocation17_spill] sm:$0xff]  ;;  %v6664_v33 = vld [vmem:[#allocation138_spill] sm:$0xff] }
 0x35c   :  { %2931 = vst.msk [vmem:[%s6198_s5 + $0xc8] sm:$0xff] %vm745_vm1, %v2859_v22 }
 0x35d   :  { %2920 = vst.msk [vmem:[%s6198_s5 + $0x70] sm:$0xff] %vm745_vm1, %v2848_v56  ;;  %v2612_v62 = vpop.permute.xlu0 %2611 }
 0x35e   :  { %v2557_v27 = vpop.permute.xlu1 %2556  ;;  %v2861_v36 = vadd.f32 %v2612_v62, %v5646_v58  ;;  %v6656_v62 = vld [vmem:[#allocation59_spill] sm:$0xff] }
 0x35f   :  { %v2850_v20 = vadd.f32 %v2557_v27, %v2418_v59  ;;  %v2430_v28 = vmul.f32 %v5803_v2, %v6656_v62 }
 0x360   :  { %2933 = vst.msk [vmem:[%s6198_s5 + $0xd8] sm:$0xff] %vm745_vm1, %v2861_v36 }
 0x361   :  { %2922 = vst.msk [vmem:[%s6198_s5 + $0x80] sm:$0xff] %vm745_vm1, %v2850_v20  ;;  %v2622_v50 = vpop.permute.xlu0 %2621 }
 0x362   :  { %v2567_v48 = vpop.permute.xlu1 %2566  ;;  %v2863_v58 = vadd.f32 %v2622_v50, %v2431_v6 }
 0x363   :  { %v2852_v41 = vadd.f32 %v2567_v48, %v2420_v63  ;;  %v2443_v63 = vmul.f32 %v5378_v44, %v6657_v26  ;;  %v6658_v48 = vld [vmem:[#allocation15_spill] sm:$0xff] }
 0x364   :  { %2935 = vst.msk [vmem:[%s6198_s5 + $0xe8] sm:$0xff] %vm745_vm1, %v2863_v58  ;;  %v2445_v58 = vmul.f32 %v6658_v48, %v5366_v38  ;;  %v6669_v26 = vld [vmem:[#allocation11_spill] sm:$0xff] }
 0x365   :  { %2924 = vst.msk [vmem:[%s6198_s5 + $0x90] sm:$0xff] %vm745_vm1, %v2852_v41  ;;  %v2632_v45 = vpop.permute.xlu0 %2631  ;;  %v6659_v41 = vld [vmem:[#allocation67_spill] sm:$0xff] }
 0x366   :  { %v2577_v53 = vpop.permute.xlu1 %2576  ;;  %v2865_v57 = vadd.f32 %v2632_v45, %v5707_v37  ;;  %v2434_v44 = vmul.f32 %v5853_v7, %v6659_v41 }
 0x367   :  { %v2854_v21 = vadd.f32 %v2577_v53, %v5695_v32 }
 0x368   :  { %2937 = vst.msk [vmem:[%s6198_s5 + $0xf8] sm:$0xff] %vm745_vm1, %v2865_v57 }
 0x369   :  { %2926 = vst.msk [vmem:[%s6198_s5 + $0xa0] sm:$0xff] %vm745_vm1, %v2854_v21  ;;  %v2642_v54 = vpop.permute.xlu0 %2641  ;;  %v6660_v21 = vld [vmem:[#allocation25_spill] sm:$0xff] }
 0x36a   :  { %v2587_v29 = vpop.permute.xlu1 %2586  ;;  %v2867_v1 = vadd.f32 %v2642_v54, %v2435_v40  ;;  %v2447_v38 = vmul.f32 %v5452_v14, %v6660_v21  ;;  %v6663_v14 = vld [vmem:[#allocation23_spill] sm:$0xff]  ;;  %v6673_v21 = vld [vmem:[#allocation29_spill] sm:$0xff] }
 0x36b   :  { %v2856_v37 = vadd.f32 %v2587_v29, %v5665_v23  ;;  %v6661_v29 = vld [vmem:[#allocation5_spill] sm:$0xff] }
 0x36c   :  { %2939 = vst.msk [vmem:[%s6198_s5 + $0x108] sm:$0xff] %vm745_vm1, %v2867_v1  ;;  %v6662_v1 = vld [vmem:[#allocation140_spill] sm:$0xff] }
 0x36d   :  { %2928 = vst.msk [vmem:[%s6198_s5 + $0xb0] sm:$0xff] %vm745_vm1, %v2856_v37  ;;  %v2652_v32 = vpop.permute.xlu0 %2651  ;;  %v2438_v37 = vmul.f32 %v6662_v1, %v6661_v29 }
 0x36e   :  { %v2597_v8 = vpop.permute.xlu1 %2596  ;;  %v2869_v52 = vadd.f32 %v2652_v32, %v5766_v55  ;;  %v2449_v32 = vmul.f32 %v6663_v14, %v5423_v11  ;;  %v6675_v14 = vld [vmem:[#allocation8_spill] sm:$0xff] }
 0x36f   :  { %v2858_v61 = vadd.f32 %v2597_v8, %v5754_v9  ;;  %v6655_v9 = vld [vmem:[#allocation7_spill] sm:$0xff] }
 0x370   :  { %2941 = vst.msk [vmem:[%s6198_s5 + $0x118] sm:$0xff] %vm745_vm1, %v2869_v52  ;;  %v2441_v59 = vmul.f32 %v6655_v9, %v6654_v47 }
 0x371   :  { %2930 = vst.msk [vmem:[%s6198_s5 + $0xc0] sm:$0xff] %vm745_vm1, %v2858_v61  ;;  %v2662_v23 = vpop.permute.xlu0 %2661 }
 0x372   :  { %v2607_v22 = vpop.permute.xlu1 %2606  ;;  %v2871_v56 = vadd.f32 %v2662_v23, %v2439_v4  ;;  %v6665_v4 = vld [vmem:[#allocation3_spill] sm:$0xff] }
 0x373   :  { %v2860_v55 = vadd.f32 %v2607_v22, %v5725_v16  ;;  %v2440_v23 = vmul.f32 %v6665_v4, %v6664_v33  ;;  %v6666_v22 = vld [vmem:[#allocation33_spill] sm:$0xff] }
 0x374   :  { %2943 = vst.msk [vmem:[%s6198_s5 + $0x128] sm:$0xff] %vm745_vm1, %v2871_v56  ;;  %v2451_v11 = vmul.f32 %v5516_v49, %v6666_v22 }
 0x375   :  { %2932 = vst.msk [vmem:[%s6198_s5 + $0xd0] sm:$0xff] %vm745_vm1, %v2860_v55  ;;  %v2672_v27 = vpop.permute.xlu0 %2671 }
 0x376   :  { %v2617_v36 = vpop.permute.xlu1 %2616  ;;  %v2873_v20 = vadd.f32 %v2672_v27, %v2441_v59  ;;  %v6667_v59 = vld [vmem:[#allocation13_spill] sm:$0xff] }
 0x377   :  { %v2862_v16 = vadd.f32 %v2617_v36, %v2430_v28  ;;  %v2442_v62 = vmul.f32 %v5413_v60, %v6667_v59  ;;  %v6668_v28 = vld [vmem:[#allocation31_spill] sm:$0xff]  ;;  %v2444_v60 = vmul.f32 %v6669_v26, %v5390_v42  ;;  %v6681_v59 = vld [vmem:[#allocation4_spill] sm:$0xff] }
 0x378   :  { %2945 = vst.msk [vmem:[%s6198_s5 + $0x138] sm:$0xff] %vm745_vm1, %v2873_v20  ;;  %v2453_v49 = vmul.f32 %v6668_v28, %v5489_v34  ;;  %v6671_v42 = vld [vmem:[#allocation39_spill] sm:$0xff] }
 0x379   :  { %2934 = vst.msk [vmem:[%s6198_s5 + $0xe0] sm:$0xff] %vm745_vm1, %v2862_v16  ;;  %v2682_v2 = vpop.permute.xlu0 %2681  ;;  %v2457_v48 = vmul.f32 %v6671_v42, %v5540_v5 }
 0x37a   :  { %v2627_v19 = vpop.permute.xlu1 %2626  ;;  %v2875_v6 = vadd.f32 %v2682_v2, %v2443_v63 }
 0x37b   :  { %v2864_v50 = vadd.f32 %v2627_v19, %v5784_v39 }
 0x37c   :  { %2947 = vst.msk [vmem:[%s6198_s5 + $0x148] sm:$0xff] %vm745_vm1, %v2875_v6  ;;  %v6670_v6 = vld [vmem:[#allocation21_spill] sm:$0xff] }
 0x37d   :  { %2936 = vst.msk [vmem:[%s6198_s5 + $0xf0] sm:$0xff] %vm745_vm1, %v2864_v50  ;;  %v2692_v45 = vpop.permute.xlu0 %2691  ;;  %v2446_v50 = vmul.f32 %v5528_v3, %v6670_v6  ;;  %v6684_v6 = vld [vmem:[#allocation95_spill] sm:$0xff] }
 0x37e   :  { %v2637_v53 = vpop.permute.xlu1 %2636  ;;  %v2877_v57 = vadd.f32 %v2692_v45, %v2445_v58  ;;  %v6672_v45 = vld [vmem:[#allocation19_spill] sm:$0xff] }
 0x37f   :  { %v2866_v39 = vadd.f32 %v2637_v53, %v2434_v44  ;;  %v2448_v3 = vmul.f32 %v6672_v45, %v5503_v13 }
 0x380   :  { %2949 = vst.msk [vmem:[%s6198_s5 + $0x158] sm:$0xff] %vm745_vm1, %v2877_v57 }
 0x381   :  { %2938 = vst.msk [vmem:[%s6198_s5 + $0x100] sm:$0xff] %vm745_vm1, %v2866_v39  ;;  %v2702_v7 = vpop.permute.xlu0 %2701 }
 0x382   :  { %v2647_v12 = vpop.permute.xlu1 %2646  ;;  %v2879_v40 = vadd.f32 %v2702_v7, %v2447_v38  ;;  %v2450_v38 = vmul.f32 %v5583_v35, %v6673_v21 }
 0x383   :  { %v2868_v54 = vadd.f32 %v2647_v12, %v5828_v17 }
 0x384   :  { %2951 = vst.msk [vmem:[%s6198_s5 + $0x168] sm:$0xff] %vm745_vm1, %v2879_v40 }
 0x385   :  { %2940 = vst.msk [vmem:[%s6198_s5 + $0x110] sm:$0xff] %vm745_vm1, %v2868_v54  ;;  %v2712_v8 = vpop.permute.xlu0 %2711 }
 0x386   :  { %v2657_v52 = vpop.permute.xlu1 %2656  ;;  %v2881_v61 = vadd.f32 %v2712_v8, %v2449_v32  ;;  %v6676_v8 = vld [vmem:[#allocation2_spill] sm:$0xff] }
 0x387   :  { %v2870_v17 = vadd.f32 %v2657_v52, %v2438_v37 }
 0x388   :  { %2953 = vst.msk [vmem:[%s6198_s5 + $0x178] sm:$0xff] %vm745_vm1, %v2881_v61  ;;  %v6677_v61 = vld [vmem:[#allocation6_spill] sm:$0xff] }
 0x389   :  { %2942 = vst.msk [vmem:[%s6198_s5 + $0x120] sm:$0xff] %vm745_vm1, %v2870_v17  ;;  %v2722_v56 = vpop.permute.xlu0 %2721  ;;  %v6678_v17 = vld [vmem:[#allocation35_spill] sm:$0xff] }
 0x38a   :  { %v2667_v55 = vpop.permute.xlu1 %2666  ;;  %v2883_v47 = vadd.f32 %v2722_v56, %v2451_v11 }
 0x38b   :  { %v2872_v9 = vadd.f32 %v2667_v55, %v2440_v23  ;;  %v6679_v23 = vld [vmem:[#allocation80_spill] sm:$0xff] }
 0x38c   :  { %2955 = vst.msk [vmem:[%s6198_s5 + $0x188] sm:$0xff] %vm745_vm1, %v2883_v47  ;;  %v6680_v47 = vld [vmem:[#allocation91_spill] sm:$0xff] }
 0x38d   :  { %2944 = vst.msk [vmem:[%s6198_s5 + $0x130] sm:$0xff] %vm745_vm1, %v2872_v9  ;;  %v2732_v27 = vpop.permute.xlu0 %2731 }
 0x38e   :  { %v2677_v36 = vpop.permute.xlu1 %2676  ;;  %v2885_v20 = vadd.f32 %v2732_v27, %v2453_v49 }
 0x38f   :  { %v2874_v16 = vadd.f32 %v2677_v36, %v2442_v62  ;;  %v6682_v36 = vld [vmem:[#allocation96_spill] sm:$0xff] }
 0x390   :  { %2957 = vst.msk [vmem:[%s6198_s5 + $0x198] sm:$0xff] %vm745_vm1, %v2885_v20 }
 0x391   :  { %2946 = vst.msk [vmem:[%s6198_s5 + $0x140] sm:$0xff] %vm745_vm1, %v2874_v16  ;;  %v2742_v34 = vpop.permute.xlu0 %2741 }
 0x392   :  { %v2687_v63 = vpop.permute.xlu1 %2686  ;;  %v2887_v2 = vadd.f32 %v2742_v34, %v5573_v15 }
 0x393   :  { %v2876_v19 = vadd.f32 %v2687_v63, %v2444_v60  ;;  %v6683_v63 = vld [vmem:[#allocation98_spill] sm:$0xff] }
 0x394   :  { %2959 = vst.msk [vmem:[%s6198_s5 + $0x1a8] sm:$0xff] %vm745_vm1, %v2887_v2 }
 0x395   :  { %2948 = vst.msk [vmem:[%s6198_s5 + $0x150] sm:$0xff] %vm745_vm1, %v2876_v19  ;;  %v2752_v58 = vpop.permute.xlu0 %2751 }
 0x396   :  { %v2697_v41 = vpop.permute.xlu1 %2696  ;;  %v2889_v15 = vadd.f32 %v2752_v58, %v2457_v48 }
 0x397   :  { %v2878_v44 = vadd.f32 %v2697_v41, %v2446_v50 }
 0x398   :  { %2961 = vst.msk [vmem:[%s6198_s5 + $0x1b8] sm:$0xff] %vm745_vm1, %v2889_v15 }
 0x399   :  { %2950 = vst.msk [vmem:[%s6198_s5 + $0x160] sm:$0xff] %vm745_vm1, %v2878_v44  ;;  %v2762_v5 = vpop.permute.xlu0 %2761 }
 0x39a   :  { %v2707_v53 = vpop.permute.xlu1 %2706  ;;  %v2891_v57 = vadd.f32 %v2762_v5, %v5633_v43  ;;  %v6674_v43 = vld [vmem:[#allocation27_spill] sm:$0xff] }
 0x39b   :  { %v2880_v39 = vadd.f32 %v2707_v53, %v2448_v3  ;;  %v2452_v54 = vmul.f32 %v6674_v43, %v5557_v18 }
 0x39c   :  { %2963 = vst.msk [vmem:[%s6198_s5 + $0x1c8] sm:$0xff] %vm745_vm1, %v2891_v57 }
 0x39d   :  { %2952 = vst.msk [vmem:[%s6198_s5 + $0x170] sm:$0xff] %vm745_vm1, %v2880_v39  ;;  %v2772_v13 = vpop.permute.xlu0 %2771 }
 0x39e   :  { %v2717_v7 = vpop.permute.xlu1 %2716  ;;  %v2893_v12 = vadd.f32 %v2772_v13, %v5602_v30 }
 0x39f   :  { %v2882_v40 = vadd.f32 %v2717_v7, %v2450_v38 }
 0x3a0   :  { %2965 = vst.msk [vmem:[%s6198_s5 + $0x1d8] sm:$0xff] %vm745_vm1, %v2893_v12 }
 0x3a1   :  { %2954 = vst.msk [vmem:[%s6198_s5 + $0x180] sm:$0xff] %vm745_vm1, %v2882_v40  ;;  %v2782_v35 = vpop.permute.xlu0 %2781 }
 0x3a2   :  { %v2727_v29 = vpop.permute.xlu1 %2726  ;;  %v2895_v1 = vadd.f32 %v2782_v35, %v5692_v31  ;;  %v2456_v31 = vmul.f32 %v6678_v17, %v6677_v61 }
 0x3a3   :  { %v2884_v37 = vadd.f32 %v2727_v29, %v2452_v54 }
 0x3a4   :  { %2967 = vst.msk [vmem:[%s6198_s5 + $0x1e8] sm:$0xff] %vm745_vm1, %v2895_v1 }
 0x3a5   :  { %2956 = vst.msk [vmem:[%s6198_s5 + $0x190] sm:$0xff] %vm745_vm1, %v2884_v37  ;;  %v2792_v18 = vpop.permute.xlu0 %2791 }
 0x3a6   :  { %v2737_v30 = vpop.permute.xlu1 %2736  ;;  %v2897_v32 = vadd.f32 %v2792_v18, %v6675_v14 }
 0x3a7   :  { %v2886_v52 = vadd.f32 %v2737_v30, %v6676_v8 }
 0x3a8   :  { %2969 = vst.msk [vmem:[%s6198_s5 + $0x1f8] sm:$0xff] %vm745_vm1, %v2897_v32 }
 0x3a9   :  { %2958 = vst.msk [vmem:[%s6198_s5 + $0x1a0] sm:$0xff] %vm745_vm1, %v2886_v52  ;;  %v2802_v33 = vpop.permute.xlu0 %2801 }
 0x3aa   :  { %v2747_v4 = vpop.permute.xlu1 %2746  ;;  %v2899_v22 = vadd.f32 %v2802_v33, %v6679_v23 }
 0x3ab   :  { %v2888_v11 = vadd.f32 %v2747_v4, %v2456_v31 }
 0x3ac   :  { %2971 = vst.msk [vmem:[%s6198_s5 + $0x208] sm:$0xff] %vm745_vm1, %v2899_v22 }
 0x3ad   :  { %2960 = vst.msk [vmem:[%s6198_s5 + $0x1b0] sm:$0xff] %vm745_vm1, %v2888_v11  ;;  %v2812_v56 = vpop.permute.xlu0 %2811 }
 0x3ae   :  { %v2757_v55 = vpop.permute.xlu1 %2756  ;;  %v2901_v9 = vadd.f32 %v2812_v56, %v6680_v47 }
 0x3af   :  { %v2890_v62 = vadd.f32 %v2757_v55, %v6681_v59 }
 0x3b0   :  { %2973 = vst.msk [vmem:[%s6198_s5 + $0x218] sm:$0xff] %vm745_vm1, %v2901_v9 }
 0x3b1   :  { %2962 = vst.msk [vmem:[%s6198_s5 + $0x1c0] sm:$0xff] %vm745_vm1, %v2890_v62  ;;  %v2822_v28 = vpop.permute.xlu0 %2821 }
 0x3b2   :  { %v2767_v49 = vpop.permute.xlu1 %2766  ;;  %v2903_v27 = vadd.f32 %v2822_v28, %v5806_v24 }
 0x3b3   :  { %v2892_v20 = vadd.f32 %v2767_v49, %v6682_v36 }
 0x3b4   :  { %2975 = vst.msk [vmem:[%s6198_s5 + $0x228] sm:$0xff] %vm745_vm1, %v2903_v27 }
 0x3b5   :  { %2964 = vst.msk [vmem:[%s6198_s5 + $0x1d0] sm:$0xff] %vm745_vm1, %v2892_v20  ;;  %v2832_v16 = vpop.permute.xlu0 %2831 }
 0x3b6   :  { %v2777_v26 = vpop.permute.xlu1 %2776  ;;  %v2905_v60 = vadd.f32 %v2832_v16, %v5781_v10 }
 0x3b7   :  { %v2894_v34 = vadd.f32 %v2777_v26, %v5769_v25 }
 0x3b8   :  { %2977 = vst.msk [vmem:[%s6198_s5 + $0x238] sm:$0xff] %vm745_vm1, %v2905_v60 }
 0x3b9   :  { %2966 = vst.msk [vmem:[%s6198_s5 + $0x1e0] sm:$0xff] %vm745_vm1, %v2894_v34 }
 0x3ba   :  { %v2787_v24 = vpop.permute.xlu1 %2786 }
 0x3bb   :  { %v2896_v2 = vadd.f32 %v2787_v24, %v6683_v63 }
 0x3bd   :  { %2968 = vst.msk [vmem:[%s6198_s5 + $0x1f0] sm:$0xff] %vm745_vm1, %v2896_v2 }
 0x3be   :  { %v2797_v10 = vpop.permute.xlu1 %2796 }
 0x3bf   :  { %v2898_v25 = vadd.f32 %v2797_v10, %v5815_v46 }
 0x3c1   :  { %2970 = vst.msk [vmem:[%s6198_s5 + $0x200] sm:$0xff] %vm745_vm1, %v2898_v25 }
 0x3c2   :  { %v2807_v19 = vpop.permute.xlu1 %2806 }
 0x3c3   :  { %v2900_v50 = vadd.f32 %v2807_v19, %v6684_v6 }
 0x3c5   :  { %2972 = vst.msk [vmem:[%s6198_s5 + $0x210] sm:$0xff] %vm745_vm1, %v2900_v50 }
 0x3c6   :  { %v2817_v42 = vpop.permute.xlu1 %2816 }
 0x3c7   :  { %v2902_v48 = vadd.f32 %v2817_v42, %v5863_v0 }
 0x3c9   :  { %2974 = vst.msk [vmem:[%s6198_s5 + $0x220] sm:$0xff] %vm745_vm1, %v2902_v48 }
 0x3ca   :  { %v2827_v46 = vpop.permute.xlu1 %2826 }
 0x3cb   :  { %v2904_v58 = vadd.f32 %v2827_v46, %v5841_v51 }
 0x3cd   :  { %2976 = vst.msk [vmem:[%s6198_s5 + $0x230] sm:$0xff] %vm745_vm1, %v2904_v58 }

</bundles_post_ra>
